<compile_context>
chip_gen: v7x
topology: tpu7x:2x2x1
jax: 0.10.0
libtpu: 0.0.40
codegen_flags: <defaults>
</compile_context>

<pallas_src>
import functools

import numpy as np
import jax
import jax.numpy as jnp
from jax import lax
from jax.experimental import pallas as pl
from jax.experimental.pallas import tpu as pltpu

EPS = 1e-5


# ---------------------------------------------------------------------------
# Fused encoder kernel: init embedding + all transformer layers.
# One grid step handles a (Bblk, N) batch chunk; h stays in VMEM throughout.
# ---------------------------------------------------------------------------
def parco_encoder_kernel(
    locs_ref, dem_ref,                     # (Bblk, N, 2), (Bblk, N, 1)
    w_loc_ref, w_dem_ref, b_init_ref,      # (2, E), (1, E), (1, E)
    wq_ref, wk_ref, wv_ref, wo_ref,        # (L, E, E) each (stacked per layer)
    g1_ref, be1_ref,                       # (L, 1, E)
    w1_ref, b1_ref, w2_ref, b2_ref,        # (L, E, F), (L, 1, F), (L, F, E), (L, 1, E)
    g2_ref, be2_ref,                       # (L, 1, E)
    h_out_ref, init_out_ref,               # (Bblk, N, E) each
    *, num_heads, mxu_dtype,
):
    f32 = jnp.float32
    Bblk, N, E = h_out_ref.shape
    L = wq_ref.shape[0]
    dh = E // num_heads
    rows = Bblk * N
    scale = 1.0 / float(dh) ** 0.5

    def mm(a, b):
        # MXU matmul: narrow operands (bf16 by default), f32 accumulation.
        return jnp.dot(a.astype(mxu_dtype), b.astype(mxu_dtype),
                       preferred_element_type=f32)

    def inorm(x2d, gamma, beta):
        # InstanceNorm1d(affine=True): per (batch, channel) over N, biased var.
        x3 = x2d.reshape(Bblk, N, E)
        mean = jnp.mean(x3, axis=1, keepdims=True)
        var = jnp.mean(jnp.square(x3 - mean), axis=1, keepdims=True)
        xn = (x3 - mean) * lax.rsqrt(var + EPS)
        return (xn * gamma + beta).reshape(rows, E)

    # ---- init embedding: feature concat/pad folded in (pure VPU broadcasts)
    # TODO(synk): real env_init_embedding('hcvrp') assembles several TensorDict
    # fields (depot/customer split etc.); here a single linear projection of
    # (locs, demand) covers the hot-path compute.
    locs = locs_ref[...].astype(f32)                      # (Bblk, N, 2)
    dem = dem_ref[...].astype(f32)                        # (Bblk, N, 1)
    w_loc = w_loc_ref[...]                                # (2, E)
    h3 = (locs[..., 0:1] * w_loc[0:1, :]
          + locs[..., 1:2] * w_loc[1:2, :]
          + dem * w_dem_ref[...]
          + b_init_ref[...])                              # (Bblk, N, E)
    init_out_ref[...] = h3.astype(init_out_ref.dtype)
    h = h3.reshape(rows, E)                               # f32, VMEM-resident

    # ---- transformer layers (statically unrolled; weights stacked on L) ----
    for l in range(L):
        wq, wk, wv, wo = wq_ref[l], wk_ref[l], wv_ref[l], wo_ref[l]

        # pre-norm multi-head self-attention
        hn = inorm(h, g1_ref[l], be1_ref[l])
        q = mm(hn, wq)                                    # (rows, E), row-batched
        k = mm(hn, wk)
        v = mm(hn, wv)

        attn_chunks = []
        for b in range(Bblk):                             # static unroll
            rs = slice(b * N, (b + 1) * N)
            acc = jnp.zeros((N, E), f32)
            for hd in range(num_heads):                   # static unroll
                cs = slice(hd * dh, (hd + 1) * dh)
                qh, kh, vh = q[rs, cs], k[rs, cs], v[rs, cs]   # (N, dh)
                s = mm(qh, kh.T) * scale                       # (N, N)
                s = s - jnp.max(s, axis=-1, keepdims=True)
                p = jnp.exp(s)
                p = p * pl.reciprocal(jnp.sum(p, axis=-1, keepdims=True),
                                      approx=True)
                # Wo-split accumulation: no per-head lane concat.
                acc = acc + mm(mm(p, vh), wo[cs, :])
            attn_chunks.append(acc)
        attn = attn_chunks[0] if Bblk == 1 else jnp.concatenate(attn_chunks, 0)
        h = h + attn

        # pre-norm feed-forward
        hn2 = inorm(h, g2_ref[l], be2_ref[l])
        ff = mm(hn2, w1_ref[l]) + b1_ref[l]
        ff = jnp.maximum(ff, 0.0)
        ff = mm(ff, w2_ref[l]) + b2_ref[l]
        h = h + ff

    h_out_ref[...] = h.reshape(Bblk, N, E).astype(h_out_ref.dtype)


# ---------------------------------------------------------------------------
# Wrapper
# ---------------------------------------------------------------------------
_WEIGHT_ORDER = ("w_loc", "w_dem", "b_init", "wq", "wk", "wv", "wo",
                 "g1", "be1", "w1", "b1", "w2", "b2", "g2", "be2")


def parco_encoder_forward(td, params, num_heads, *, block_batch=None,
                          mxu_dtype=jnp.bfloat16):
    """Returns (h, init_h) like PARCOEncoder.forward with default flags
    (no pos token, no final norm, norm_after=False, mask=None)."""
    locs, demand = td["locs"], td["demand"]
    B, N, _ = locs.shape
    E = params["w_loc"].shape[1]
    assert E % num_heads == 0, "embed_dim must be divisible by num_heads"

    if block_batch is None:
        # Keep a >=2-wide parallel grid axis when possible (v7x: 2 TCs/chip);
        # raise block_batch for larger B to batch more rows per MXU call.
        block_batch = 1 if B >= 2 else B
    assert B % block_batch == 0
    grid = (B // block_batch,)

    kernel = functools.partial(parco_encoder_kernel,
                               num_heads=num_heads, mxu_dtype=mxu_dtype)

    def full(arr):
        shape = arr.shape
        return pl.BlockSpec(shape, lambda i: (0,) * len(shape))

    def act(last):
        return pl.BlockSpec((block_batch, N, last), lambda i: (i, 0, 0))

    weights = [params[k] for k in _WEIGHT_ORDER]

    h, init_h = pl.pallas_call(
        kernel,
        out_shape=(jax.ShapeDtypeStruct((B, N, E), jnp.float32),
                   jax.ShapeDtypeStruct((B, N, E), jnp.float32)),
        grid=grid,
        in_specs=[act(locs.shape[-1]), act(demand.shape[-1])]
                 + [full(w) for w in weights],
        out_specs=(pl.BlockSpec((block_batch, N, E), lambda i: (i, 0, 0)),
                   pl.BlockSpec((block_batch, N, E), lambda i: (i, 0, 0))),
        compiler_params=pltpu.CompilerParams(
            dimension_semantics=("parallel",)),
    )(locs, demand, *weights)
    return h, init_h


# ---------------------------------------------------------------------------
# Pure-JAX reference mirroring the kernel math (bf16 MXU operands, f32
# elementwise; exact divide instead of approx reciprocal in softmax).
# ---------------------------------------------------------------------------
def encoder_reference(td, params, num_heads, mxu_dtype=jnp.bfloat16):
    f32 = jnp.float32
    locs, demand = td["locs"].astype(f32), td["demand"].astype(f32)
    B, N, _ = locs.shape
    E = params["w_loc"].shape[1]
    L = params["wq"].shape[0]
    dh = E // num_heads
    rows = B * N
    scale = 1.0 / float(dh) ** 0.5

    def mm(a, b):
        return jnp.dot(a.astype(mxu_dtype), b.astype(mxu_dtype),
                       preferred_element_type=f32)

    def inorm(x2d, gamma, beta):
        x3 = x2d.reshape(B, N, E)
        mean = jnp.mean(x3, axis=1, keepdims=True)
        var = jnp.mean(jnp.square(x3 - mean), axis=1, keepdims=True)
        return ((x3 - mean) * lax.rsqrt(var + EPS) * gamma + beta).reshape(rows, E)

    h3 = (locs[..., 0:1] * params["w_loc"][0:1, :]
          + locs[..., 1:2] * params["w_loc"][1:2, :]
          + demand * params["w_dem"]
          + params["b_init"])
    init_h = h3
    h = h3.reshape(rows, E)

    for l in range(L):
        wq, wk, wv, wo = (params[k][l] for k in ("wq", "wk", "wv", "wo"))
        hn = inorm(h, params["g1"][l], params["be1"][l])
        q, k, v = mm(hn, wq), mm(hn, wk), mm(hn, wv)
        outs = []
        for b in range(B):
            rs = slice(b * N, (b + 1) * N)
            acc = jnp.zeros((N, E), f32)
            for hd in range(num_heads):
                cs = slice(hd * dh, (hd + 1) * dh)
                qh, kh, vh = q[rs, cs], k[rs, cs], v[rs, cs]
                p = jax.nn.softmax(mm(qh, kh.T) * scale, axis=-1)
                acc = acc + mm(mm(p, vh), wo[cs, :])
            outs.append(acc)
        h = h + jnp.concatenate(outs, 0)

        hn2 = inorm(h, params["g2"][l], params["be2"][l])
        ff = jnp.maximum(mm(hn2, params["w1"][l]) + params["b1"][l], 0.0)
        ff = mm(ff, params["w2"][l]) + params["b2"][l]
        h = h + ff

    return h.reshape(B, N, E), init_h


# ---------------------------------------------------------------------------
# Deterministic parameter construction (stacked per-layer weights)
# ---------------------------------------------------------------------------
def make_params(key, *, embed_dim, ff_hidden, num_layers):
    E, F, L = embed_dim, ff_hidden, num_layers
    ks = jax.random.split(key, 11)
    s = 0.05
    n = lambda k, shape: s * jax.random.normal(k, shape, jnp.float32)
    return {
        "w_loc": n(ks[0], (2, E)),
        "w_dem": n(ks[1], (1, E)),
        "b_init": n(ks[2], (1, E)),
        "wq": n(ks[3], (L, E, E)),
        "wk": n(ks[4], (L, E, E)),
        "wv": n(ks[5], (L, E, E)),
        "wo": n(ks[6], (L, E, E)),
        "g1": jnp.ones((L, 1, E), jnp.float32),
        "be1": jnp.zeros((L, 1, E), jnp.float32),
        "w1": n(ks[7], (L, E, F)),
        "b1": n(ks[8], (L, 1, F)),
        "w2": n(ks[9], (L, F, E)),
        "b2": n(ks[10], (L, 1, E)),
        "g2": jnp.ones((L, 1, E), jnp.float32),
        "be2": jnp.zeros((L, 1, E), jnp.float32),
    }


if __name__ == "__main__":
    B, N = 2, 8                  # batch, nodes (sequence)
    EMBED_DIM = 32
    NUM_HEADS = 4
    NUM_LAYERS = 3
    FF_HIDDEN = 64

    key = jax.random.PRNGKey(0)
    k_td, k_par = jax.random.split(key)
    k_locs, k_dem = jax.random.split(k_td)

    td = {
        "locs": jax.random.uniform(k_locs, (B, N, 2), jnp.float32),
        "demand": jax.random.uniform(k_dem, (B, N, 1), jnp.float32),
    }
    params = make_params(k_par, embed_dim=EMBED_DIM, ff_hidden=FF_HIDDEN,
                         num_layers=NUM_LAYERS)

    h, init_h = parco_encoder_forward(td, params, NUM_HEADS)
    jax.block_until_ready((h, init_h))

    assert h.shape == (B, N, EMBED_DIM) and init_h.shape == (B, N, EMBED_DIM)
    assert bool(jnp.all(jnp.isfinite(h))) and bool(jnp.all(jnp.isfinite(init_h)))

    h_ref, init_ref = encoder_reference(td, params, NUM_HEADS)
    np.testing.assert_allclose(np.asarray(init_h), np.asarray(init_ref),
                               atol=1e-2, rtol=1e-2)
    np.testing.assert_allclose(np.asarray(h), np.asarray(h_ref),
                               atol=1e-2, rtol=1e-2)

    print("KERNEL_OK")
</pallas_src>

<mosaic_0001>
module attributes {stable_mosaic.version = 11 : i64} {
  func.func @parco_encoder_kernel(%arg0: i32, %arg1: memref<1x8x2xf32, #tpu.memory_space<vmem>>, %arg2: memref<1x8x1xf32, #tpu.memory_space<vmem>>, %arg3: memref<2x32xf32, #tpu.memory_space<vmem>>, %arg4: memref<1x32xf32, #tpu.memory_space<vmem>>, %arg5: memref<1x32xf32, #tpu.memory_space<vmem>>, %arg6: memref<3x32x32xf32, #tpu.memory_space<vmem>>, %arg7: memref<3x32x32xf32, #tpu.memory_space<vmem>>, %arg8: memref<3x32x32xf32, #tpu.memory_space<vmem>>, %arg9: memref<3x32x32xf32, #tpu.memory_space<vmem>>, %arg10: memref<3x1x32xf32, #tpu.memory_space<vmem>>, %arg11: memref<3x1x32xf32, #tpu.memory_space<vmem>>, %arg12: memref<3x32x64xf32, #tpu.memory_space<vmem>>, %arg13: memref<3x1x64xf32, #tpu.memory_space<vmem>>, %arg14: memref<3x64x32xf32, #tpu.memory_space<vmem>>, %arg15: memref<3x1x32xf32, #tpu.memory_space<vmem>>, %arg16: memref<3x1x32xf32, #tpu.memory_space<vmem>>, %arg17: memref<3x1x32xf32, #tpu.memory_space<vmem>>, %arg18: memref<1x8x32xf32, #tpu.memory_space<vmem>>, %arg19: memref<1x8x32xf32, #tpu.memory_space<vmem>>) attributes {dimension_semantics = [#tpu.dimension_semantics<parallel>], iteration_bounds = array<i64: 2>, scalar_prefetch = 0 : i64, scratch_operands = 0 : i64, tpu.core_type = #tpu.core_type<tc>, window_params = [{transform_indices = @transform_0, window_bounds = array<i64: 1, 8, 2>}, {transform_indices = @transform_1, window_bounds = array<i64: 1, 8, 1>}, {pipeline_mode = #tpu.pipeline_mode<synchronous>, transform_indices = @transform_2, window_bounds = array<i64: 2, 32>}, {pipeline_mode = #tpu.pipeline_mode<synchronous>, transform_indices = @transform_3, window_bounds = array<i64: 1, 32>}, {pipeline_mode = #tpu.pipeline_mode<synchronous>, transform_indices = @transform_4, window_bounds = array<i64: 1, 32>}, {pipeline_mode = #tpu.pipeline_mode<synchronous>, transform_indices = @transform_5, window_bounds = array<i64: 3, 32, 32>}, {pipeline_mode = #tpu.pipeline_mode<synchronous>, transform_indices = @transform_6, window_bounds = array<i64: 3, 32, 32>}, {pipeline_mode = #tpu.pipeline_mode<synchronous>, transform_indices = @transform_7, window_bounds = array<i64: 3, 32, 32>}, {pipeline_mode = #tpu.pipeline_mode<synchronous>, transform_indices = @transform_8, window_bounds = array<i64: 3, 32, 32>}, {pipeline_mode = #tpu.pipeline_mode<synchronous>, transform_indices = @transform_9, window_bounds = array<i64: 3, 1, 32>}, {pipeline_mode = #tpu.pipeline_mode<synchronous>, transform_indices = @transform_10, window_bounds = array<i64: 3, 1, 32>}, {pipeline_mode = #tpu.pipeline_mode<synchronous>, transform_indices = @transform_11, window_bounds = array<i64: 3, 32, 64>}, {pipeline_mode = #tpu.pipeline_mode<synchronous>, transform_indices = @transform_12, window_bounds = array<i64: 3, 1, 64>}, {pipeline_mode = #tpu.pipeline_mode<synchronous>, transform_indices = @transform_13, window_bounds = array<i64: 3, 64, 32>}, {pipeline_mode = #tpu.pipeline_mode<synchronous>, transform_indices = @transform_14, window_bounds = array<i64: 3, 1, 32>}, {pipeline_mode = #tpu.pipeline_mode<synchronous>, transform_indices = @transform_15, window_bounds = array<i64: 3, 1, 32>}, {pipeline_mode = #tpu.pipeline_mode<synchronous>, transform_indices = @transform_16, window_bounds = array<i64: 3, 1, 32>}, {transform_indices = @transform_17, window_bounds = array<i64: 1, 8, 32>}, {transform_indices = @transform_18, window_bounds = array<i64: 1, 8, 32>}]} {
    %c0 = arith.constant 0 : index
    %c0_0 = arith.constant 0 : index
    %c0_1 = arith.constant 0 : index
    %0 = vector.load %arg1[%c0, %c0_0, %c0_1] : memref<1x8x2xf32, #tpu.memory_space<vmem>>, vector<1x8x2xf32>
    %c0_2 = arith.constant 0 : index
    %c0_3 = arith.constant 0 : index
    %c0_4 = arith.constant 0 : index
    %1 = vector.load %arg2[%c0_2, %c0_3, %c0_4] : memref<1x8x1xf32, #tpu.memory_space<vmem>>, vector<1x8x1xf32>
    %c0_5 = arith.constant 0 : index
    %c0_6 = arith.constant 0 : index
    %2 = vector.load %arg3[%c0_5, %c0_6] : memref<2x32xf32, #tpu.memory_space<vmem>>, vector<2x32xf32>
    %3 = vector.extract_strided_slice %0 {offsets = [0, 0, 0], sizes = [1, 8, 1], strides = [1, 1, 1]} : vector<1x8x2xf32> to vector<1x8x1xf32>
    %4 = vector.extract_strided_slice %2 {offsets = [0, 0], sizes = [1, 32], strides = [1, 1]} : vector<2x32xf32> to vector<1x32xf32>
    %5 = vector.shape_cast %4 : vector<1x32xf32> to vector<1x1x32xf32>
    %6 = vector.broadcast %3 : vector<1x8x1xf32> to vector<1x8x32xf32>
    %7 = vector.broadcast %5 : vector<1x1x32xf32> to vector<1x8x32xf32>
    %8 = arith.mulf %6, %7 : vector<1x8x32xf32>
    %9 = vector.extract_strided_slice %0 {offsets = [0, 0, 1], sizes = [1, 8, 1], strides = [1, 1, 1]} : vector<1x8x2xf32> to vector<1x8x1xf32>
    %10 = vector.extract_strided_slice %2 {offsets = [1, 0], sizes = [1, 32], strides = [1, 1]} : vector<2x32xf32> to vector<1x32xf32>
    %11 = vector.shape_cast %10 : vector<1x32xf32> to vector<1x1x32xf32>
    %12 = vector.broadcast %9 : vector<1x8x1xf32> to vector<1x8x32xf32>
    %13 = vector.broadcast %11 : vector<1x1x32xf32> to vector<1x8x32xf32>
    %14 = arith.mulf %12, %13 : vector<1x8x32xf32>
    %15 = arith.addf %8, %14 : vector<1x8x32xf32>
    %c0_7 = arith.constant 0 : index
    %c0_8 = arith.constant 0 : index
    %16 = vector.load %arg4[%c0_7, %c0_8] : memref<1x32xf32, #tpu.memory_space<vmem>>, vector<1x32xf32>
    %17 = vector.shape_cast %16 : vector<1x32xf32> to vector<1x1x32xf32>
    %18 = vector.broadcast %1 : vector<1x8x1xf32> to vector<1x8x32xf32>
    %19 = vector.broadcast %17 : vector<1x1x32xf32> to vector<1x8x32xf32>
    %20 = arith.mulf %18, %19 : vector<1x8x32xf32>
    %21 = arith.addf %15, %20 : vector<1x8x32xf32>
    %c0_9 = arith.constant 0 : index
    %c0_10 = arith.constant 0 : index
    %22 = vector.load %arg5[%c0_9, %c0_10] : memref<1x32xf32, #tpu.memory_space<vmem>>, vector<1x32xf32>
    %23 = vector.shape_cast %22 : vector<1x32xf32> to vector<1x1x32xf32>
    %24 = vector.broadcast %23 : vector<1x1x32xf32> to vector<1x8x32xf32>
    %25 = arith.addf %21, %24 : vector<1x8x32xf32>
    %c0_11 = arith.constant 0 : index
    %c0_12 = arith.constant 0 : index
    %c0_13 = arith.constant 0 : index
    %26 = vector.load %arg19[%c0_11, %c0_12, %c0_13] : memref<1x8x32xf32, #tpu.memory_space<vmem>>, vector<1x8x32xf32>
    tpu.vector_store %arg19[%c0_11, %c0_12, %c0_13], %25 {strides = array<i32>} : memref<1x8x32xf32, #tpu.memory_space<vmem>>, vector<1x8x32xf32>,
    %27 = vector.shape_cast %25 : vector<1x8x32xf32> to vector<8x32xf32>
    %c0_14 = arith.constant 0 : index
    %c0_15 = arith.constant 0 : index
    %c0_16 = arith.constant 0 : index
    %28 = vector.load %arg6[%c0_14, %c0_15, %c0_16] : memref<3x32x32xf32, #tpu.memory_space<vmem>>, vector<1x32x32xf32>
    %29 = vector.shape_cast %28 : vector<1x32x32xf32> to vector<32x32xf32>
    %c0_17 = arith.constant 0 : index
    %c0_18 = arith.constant 0 : index
    %c0_19 = arith.constant 0 : index
    %30 = vector.load %arg7[%c0_17, %c0_18, %c0_19] : memref<3x32x32xf32, #tpu.memory_space<vmem>>, vector<1x32x32xf32>
    %31 = vector.shape_cast %30 : vector<1x32x32xf32> to vector<32x32xf32>
    %c0_20 = arith.constant 0 : index
    %c0_21 = arith.constant 0 : index
    %c0_22 = arith.constant 0 : index
    %32 = vector.load %arg8[%c0_20, %c0_21, %c0_22] : memref<3x32x32xf32, #tpu.memory_space<vmem>>, vector<1x32x32xf32>
    %33 = vector.shape_cast %32 : vector<1x32x32xf32> to vector<32x32xf32>
    %c0_23 = arith.constant 0 : index
    %c0_24 = arith.constant 0 : index
    %c0_25 = arith.constant 0 : index
    %34 = vector.load %arg9[%c0_23, %c0_24, %c0_25] : memref<3x32x32xf32, #tpu.memory_space<vmem>>, vector<1x32x32xf32>
    %35 = vector.shape_cast %34 : vector<1x32x32xf32> to vector<32x32xf32>
    %c0_26 = arith.constant 0 : index
    %c0_27 = arith.constant 0 : index
    %c0_28 = arith.constant 0 : index
    %36 = vector.load %arg10[%c0_26, %c0_27, %c0_28] : memref<3x1x32xf32, #tpu.memory_space<vmem>>, vector<1x1x32xf32>
    %37 = vector.shape_cast %36 : vector<1x1x32xf32> to vector<1x32xf32>
    %c0_29 = arith.constant 0 : index
    %c0_30 = arith.constant 0 : index
    %c0_31 = arith.constant 0 : index
    %38 = vector.load %arg11[%c0_29, %c0_30, %c0_31] : memref<3x1x32xf32, #tpu.memory_space<vmem>>, vector<1x1x32xf32>
    %39 = vector.shape_cast %38 : vector<1x1x32xf32> to vector<1x32xf32>
    %40 = vector.shape_cast %27 : vector<8x32xf32> to vector<1x8x32xf32>
    %cst = arith.constant dense<0.000000e+00> : vector<1x32xf32>
    %41 = vector.multi_reduction <add>, %40, %cst [1] : vector<1x8x32xf32> to vector<1x32xf32>
    %42 = vector.shape_cast %41 : vector<1x32xf32> to vector<1x1x32xf32>
    %cst_32 = arith.constant 8.000000e+00 : f32
    %43 = vector.broadcast %cst_32 : f32 to vector<1x1x32xf32>
    %44 = arith.divf %42, %43 : vector<1x1x32xf32>
    %45 = vector.broadcast %44 : vector<1x1x32xf32> to vector<1x8x32xf32>
    %46 = arith.subf %40, %45 : vector<1x8x32xf32>
    %47 = arith.mulf %46, %46 : vector<1x8x32xf32>
    %cst_33 = arith.constant dense<0.000000e+00> : vector<1x32xf32>
    %48 = vector.multi_reduction <add>, %47, %cst_33 [1] : vector<1x8x32xf32> to vector<1x32xf32>
    %49 = vector.shape_cast %48 : vector<1x32xf32> to vector<1x1x32xf32>
    %cst_34 = arith.constant 8.000000e+00 : f32
    %50 = vector.broadcast %cst_34 : f32 to vector<1x1x32xf32>
    %51 = arith.divf %49, %50 : vector<1x1x32xf32>
    %52 = vector.broadcast %44 : vector<1x1x32xf32> to vector<1x8x32xf32>
    %53 = arith.subf %40, %52 : vector<1x8x32xf32>
    %cst_35 = arith.constant 9.99999974E-6 : f32
    %54 = vector.broadcast %cst_35 : f32 to vector<1x1x32xf32>
    %55 = arith.addf %51, %54 : vector<1x1x32xf32>
    %56 = math.rsqrt %55 : vector<1x1x32xf32>
    %57 = vector.broadcast %56 : vector<1x1x32xf32> to vector<1x8x32xf32>
    %58 = arith.mulf %53, %57 : vector<1x8x32xf32>
    %59 = vector.shape_cast %37 : vector<1x32xf32> to vector<1x1x32xf32>
    %60 = vector.broadcast %59 : vector<1x1x32xf32> to vector<1x8x32xf32>
    %61 = arith.mulf %58, %60 : vector<1x8x32xf32>
    %62 = vector.shape_cast %39 : vector<1x32xf32> to vector<1x1x32xf32>
    %63 = vector.broadcast %62 : vector<1x1x32xf32> to vector<1x8x32xf32>
    %64 = arith.addf %61, %63 : vector<1x8x32xf32>
    %65 = vector.shape_cast %64 : vector<1x8x32xf32> to vector<8x32xf32>
    %66 = arith.truncf %65 : vector<8x32xf32> to vector<8x32xbf16>
    %67 = arith.truncf %29 : vector<32x32xf32> to vector<32x32xbf16>
    %cst_36 = arith.constant dense<0.000000e+00> : vector<8x32xf32>
    %68 = tpu.matmul %66, %67, %cst_36 {dimension_numbers = #tpu.dot_dimension_numbers<[1], [0], [0], [1], [0, 0, 1, 1], [], []>} : vector<8x32xbf16>, vector<32x32xbf16>, vector<8x32xf32> -> vector<8x32xf32>
    %69 = arith.truncf %65 : vector<8x32xf32> to vector<8x32xbf16>
    %70 = arith.truncf %31 : vector<32x32xf32> to vector<32x32xbf16>
    %cst_37 = arith.constant dense<0.000000e+00> : vector<8x32xf32>
    %71 = tpu.matmul %69, %70, %cst_37 {dimension_numbers = #tpu.dot_dimension_numbers<[1], [0], [0], [1], [0, 0, 1, 1], [], []>} : vector<8x32xbf16>, vector<32x32xbf16>, vector<8x32xf32> -> vector<8x32xf32>
    %72 = arith.truncf %65 : vector<8x32xf32> to vector<8x32xbf16>
    %73 = arith.truncf %33 : vector<32x32xf32> to vector<32x32xbf16>
    %cst_38 = arith.constant dense<0.000000e+00> : vector<8x32xf32>
    %74 = tpu.matmul %72, %73, %cst_38 {dimension_numbers = #tpu.dot_dimension_numbers<[1], [0], [0], [1], [0, 0, 1, 1], [], []>} : vector<8x32xbf16>, vector<32x32xbf16>, vector<8x32xf32> -> vector<8x32xf32>
    %cst_39 = arith.constant 0.000000e+00 : f32
    %75 = vector.broadcast %cst_39 : f32 to vector<8x32xf32>
    %76 = vector.extract_strided_slice %68 {offsets = [0, 0], sizes = [8, 8], strides = [1, 1]} : vector<8x32xf32> to vector<8x8xf32>
    %77 = vector.extract_strided_slice %71 {offsets = [0, 0], sizes = [8, 8], strides = [1, 1]} : vector<8x32xf32> to vector<8x8xf32>
    %78 = vector.extract_strided_slice %74 {offsets = [0, 0], sizes = [8, 8], strides = [1, 1]} : vector<8x32xf32> to vector<8x8xf32>
    %79 = tpu.transpose %77, [1, 0] : vector<8x8xf32> -> vector<8x8xf32>
    %80 = arith.truncf %76 : vector<8x8xf32> to vector<8x8xbf16>
    %81 = arith.truncf %79 : vector<8x8xf32> to vector<8x8xbf16>
    %cst_40 = arith.constant dense<0.000000e+00> : vector<8x8xf32>
    %82 = tpu.matmul %80, %81, %cst_40 {dimension_numbers = #tpu.dot_dimension_numbers<[1], [0], [0], [1], [0, 0, 1, 1], [], []>} : vector<8x8xbf16>, vector<8x8xbf16>, vector<8x8xf32> -> vector<8x8xf32>
    %cst_41 = arith.constant 0.353553385 : f32
    %83 = vector.broadcast %cst_41 : f32 to vector<8x8xf32>
    %84 = arith.mulf %82, %83 : vector<8x8xf32>
    %cst_42 = arith.constant dense<0xFF800000> : vector<8xf32>
    %85 = vector.multi_reduction <maximumf>, %84, %cst_42 [1] : vector<8x8xf32> to vector<8xf32>
    %86 = vector.shape_cast %85 : vector<8xf32> to vector<8x1xf32>
    %87 = vector.broadcast %86 : vector<8x1xf32> to vector<8x8xf32>
    %88 = arith.subf %84, %87 : vector<8x8xf32>
    %89 = math.exp %88 : vector<8x8xf32>
    %cst_43 = arith.constant dense<0.000000e+00> : vector<8xf32>
    %90 = vector.multi_reduction <add>, %89, %cst_43 [1] : vector<8x8xf32> to vector<8xf32>
    %91 = vector.shape_cast %90 : vector<8xf32> to vector<8x1xf32>
    %92 = tpu.reciprocal %91 {approx = true} : vector<8x1xf32> -> vector<8x1xf32>
    %93 = vector.broadcast %92 : vector<8x1xf32> to vector<8x8xf32>
    %94 = arith.mulf %89, %93 : vector<8x8xf32>
    %95 = arith.truncf %94 : vector<8x8xf32> to vector<8x8xbf16>
    %96 = arith.truncf %78 : vector<8x8xf32> to vector<8x8xbf16>
    %cst_44 = arith.constant dense<0.000000e+00> : vector<8x8xf32>
    %97 = tpu.matmul %95, %96, %cst_44 {dimension_numbers = #tpu.dot_dimension_numbers<[1], [0], [0], [1], [0, 0, 1, 1], [], []>} : vector<8x8xbf16>, vector<8x8xbf16>, vector<8x8xf32> -> vector<8x8xf32>
    %98 = vector.extract_strided_slice %35 {offsets = [0, 0], sizes = [8, 32], strides = [1, 1]} : vector<32x32xf32> to vector<8x32xf32>
    %99 = arith.truncf %97 : vector<8x8xf32> to vector<8x8xbf16>
    %100 = arith.truncf %98 : vector<8x32xf32> to vector<8x32xbf16>
    %cst_45 = arith.constant dense<0.000000e+00> : vector<8x32xf32>
    %101 = tpu.matmul %99, %100, %cst_45 {dimension_numbers = #tpu.dot_dimension_numbers<[1], [0], [0], [1], [0, 0, 1, 1], [], []>} : vector<8x8xbf16>, vector<8x32xbf16>, vector<8x32xf32> -> vector<8x32xf32>
    %102 = arith.addf %75, %101 : vector<8x32xf32>
    %103 = vector.extract_strided_slice %68 {offsets = [0, 8], sizes = [8, 8], strides = [1, 1]} : vector<8x32xf32> to vector<8x8xf32>
    %104 = vector.extract_strided_slice %71 {offsets = [0, 8], sizes = [8, 8], strides = [1, 1]} : vector<8x32xf32> to vector<8x8xf32>
    %105 = vector.extract_strided_slice %74 {offsets = [0, 8], sizes = [8, 8], strides = [1, 1]} : vector<8x32xf32> to vector<8x8xf32>
    %106 = tpu.transpose %104, [1, 0] : vector<8x8xf32> -> vector<8x8xf32>
    %107 = arith.truncf %103 : vector<8x8xf32> to vector<8x8xbf16>
    %108 = arith.truncf %106 : vector<8x8xf32> to vector<8x8xbf16>
    %cst_46 = arith.constant dense<0.000000e+00> : vector<8x8xf32>
    %109 = tpu.matmul %107, %108, %cst_46 {dimension_numbers = #tpu.dot_dimension_numbers<[1], [0], [0], [1], [0, 0, 1, 1], [], []>} : vector<8x8xbf16>, vector<8x8xbf16>, vector<8x8xf32> -> vector<8x8xf32>
    %cst_47 = arith.constant 0.353553385 : f32
    %110 = vector.broadcast %cst_47 : f32 to vector<8x8xf32>
    %111 = arith.mulf %109, %110 : vector<8x8xf32>
    %cst_48 = arith.constant dense<0xFF800000> : vector<8xf32>
    %112 = vector.multi_reduction <maximumf>, %111, %cst_48 [1] : vector<8x8xf32> to vector<8xf32>
    %113 = vector.shape_cast %112 : vector<8xf32> to vector<8x1xf32>
    %114 = vector.broadcast %113 : vector<8x1xf32> to vector<8x8xf32>
    %115 = arith.subf %111, %114 : vector<8x8xf32>
    %116 = math.exp %115 : vector<8x8xf32>
    %cst_49 = arith.constant dense<0.000000e+00> : vector<8xf32>
    %117 = vector.multi_reduction <add>, %116, %cst_49 [1] : vector<8x8xf32> to vector<8xf32>
    %118 = vector.shape_cast %117 : vector<8xf32> to vector<8x1xf32>
    %119 = tpu.reciprocal %118 {approx = true} : vector<8x1xf32> -> vector<8x1xf32>
    %120 = vector.broadcast %119 : vector<8x1xf32> to vector<8x8xf32>
    %121 = arith.mulf %116, %120 : vector<8x8xf32>
    %122 = arith.truncf %121 : vector<8x8xf32> to vector<8x8xbf16>
    %123 = arith.truncf %105 : vector<8x8xf32> to vector<8x8xbf16>
    %cst_50 = arith.constant dense<0.000000e+00> : vector<8x8xf32>
    %124 = tpu.matmul %122, %123, %cst_50 {dimension_numbers = #tpu.dot_dimension_numbers<[1], [0], [0], [1], [0, 0, 1, 1], [], []>} : vector<8x8xbf16>, vector<8x8xbf16>, vector<8x8xf32> -> vector<8x8xf32>
    %125 = vector.extract_strided_slice %35 {offsets = [8, 0], sizes = [8, 32], strides = [1, 1]} : vector<32x32xf32> to vector<8x32xf32>
    %126 = arith.truncf %124 : vector<8x8xf32> to vector<8x8xbf16>
    %127 = arith.truncf %125 : vector<8x32xf32> to vector<8x32xbf16>
    %cst_51 = arith.constant dense<0.000000e+00> : vector<8x32xf32>
    %128 = tpu.matmul %126, %127, %cst_51 {dimension_numbers = #tpu.dot_dimension_numbers<[1], [0], [0], [1], [0, 0, 1, 1], [], []>} : vector<8x8xbf16>, vector<8x32xbf16>, vector<8x32xf32> -> vector<8x32xf32>
    %129 = arith.addf %102, %128 : vector<8x32xf32>
    %130 = vector.extract_strided_slice %68 {offsets = [0, 16], sizes = [8, 8], strides = [1, 1]} : vector<8x32xf32> to vector<8x8xf32>
    %131 = vector.extract_strided_slice %71 {offsets = [0, 16], sizes = [8, 8], strides = [1, 1]} : vector<8x32xf32> to vector<8x8xf32>
    %132 = vector.extract_strided_slice %74 {offsets = [0, 16], sizes = [8, 8], strides = [1, 1]} : vector<8x32xf32> to vector<8x8xf32>
    %133 = tpu.transpose %131, [1, 0] : vector<8x8xf32> -> vector<8x8xf32>
    %134 = arith.truncf %130 : vector<8x8xf32> to vector<8x8xbf16>
    %135 = arith.truncf %133 : vector<8x8xf32> to vector<8x8xbf16>
    %cst_52 = arith.constant dense<0.000000e+00> : vector<8x8xf32>
    %136 = tpu.matmul %134, %135, %cst_52 {dimension_numbers = #tpu.dot_dimension_numbers<[1], [0], [0], [1], [0, 0, 1, 1], [], []>} : vector<8x8xbf16>, vector<8x8xbf16>, vector<8x8xf32> -> vector<8x8xf32>
    %cst_53 = arith.constant 0.353553385 : f32
    %137 = vector.broadcast %cst_53 : f32 to vector<8x8xf32>
    %138 = arith.mulf %136, %137 : vector<8x8xf32>
    %cst_54 = arith.constant dense<0xFF800000> : vector<8xf32>
    %139 = vector.multi_reduction <maximumf>, %138, %cst_54 [1] : vector<8x8xf32> to vector<8xf32>
    %140 = vector.shape_cast %139 : vector<8xf32> to vector<8x1xf32>
    %141 = vector.broadcast %140 : vector<8x1xf32> to vector<8x8xf32>
    %142 = arith.subf %138, %141 : vector<8x8xf32>
    %143 = math.exp %142 : vector<8x8xf32>
    %cst_55 = arith.constant dense<0.000000e+00> : vector<8xf32>
    %144 = vector.multi_reduction <add>, %143, %cst_55 [1] : vector<8x8xf32> to vector<8xf32>
    %145 = vector.shape_cast %144 : vector<8xf32> to vector<8x1xf32>
    %146 = tpu.reciprocal %145 {approx = true} : vector<8x1xf32> -> vector<8x1xf32>
    %147 = vector.broadcast %146 : vector<8x1xf32> to vector<8x8xf32>
    %148 = arith.mulf %143, %147 : vector<8x8xf32>
    %149 = arith.truncf %148 : vector<8x8xf32> to vector<8x8xbf16>
    %150 = arith.truncf %132 : vector<8x8xf32> to vector<8x8xbf16>
    %cst_56 = arith.constant dense<0.000000e+00> : vector<8x8xf32>
    %151 = tpu.matmul %149, %150, %cst_56 {dimension_numbers = #tpu.dot_dimension_numbers<[1], [0], [0], [1], [0, 0, 1, 1], [], []>} : vector<8x8xbf16>, vector<8x8xbf16>, vector<8x8xf32> -> vector<8x8xf32>
    %152 = vector.extract_strided_slice %35 {offsets = [16, 0], sizes = [8, 32], strides = [1, 1]} : vector<32x32xf32> to vector<8x32xf32>
    %153 = arith.truncf %151 : vector<8x8xf32> to vector<8x8xbf16>
    %154 = arith.truncf %152 : vector<8x32xf32> to vector<8x32xbf16>
    %cst_57 = arith.constant dense<0.000000e+00> : vector<8x32xf32>
    %155 = tpu.matmul %153, %154, %cst_57 {dimension_numbers = #tpu.dot_dimension_numbers<[1], [0], [0], [1], [0, 0, 1, 1], [], []>} : vector<8x8xbf16>, vector<8x32xbf16>, vector<8x32xf32> -> vector<8x32xf32>
    %156 = arith.addf %129, %155 : vector<8x32xf32>
    %157 = vector.extract_strided_slice %68 {offsets = [0, 24], sizes = [8, 8], strides = [1, 1]} : vector<8x32xf32> to vector<8x8xf32>
    %158 = vector.extract_strided_slice %71 {offsets = [0, 24], sizes = [8, 8], strides = [1, 1]} : vector<8x32xf32> to vector<8x8xf32>
    %159 = vector.extract_strided_slice %74 {offsets = [0, 24], sizes = [8, 8], strides = [1, 1]} : vector<8x32xf32> to vector<8x8xf32>
    %160 = tpu.transpose %158, [1, 0] : vector<8x8xf32> -> vector<8x8xf32>
    %161 = arith.truncf %157 : vector<8x8xf32> to vector<8x8xbf16>
    %162 = arith.truncf %160 : vector<8x8xf32> to vector<8x8xbf16>
    %cst_58 = arith.constant dense<0.000000e+00> : vector<8x8xf32>
    %163 = tpu.matmul %161, %162, %cst_58 {dimension_numbers = #tpu.dot_dimension_numbers<[1], [0], [0], [1], [0, 0, 1, 1], [], []>} : vector<8x8xbf16>, vector<8x8xbf16>, vector<8x8xf32> -> vector<8x8xf32>
    %cst_59 = arith.constant 0.353553385 : f32
    %164 = vector.broadcast %cst_59 : f32 to vector<8x8xf32>
    %165 = arith.mulf %163, %164 : vector<8x8xf32>
    %cst_60 = arith.constant dense<0xFF800000> : vector<8xf32>
    %166 = vector.multi_reduction <maximumf>, %165, %cst_60 [1] : vector<8x8xf32> to vector<8xf32>
    %167 = vector.shape_cast %166 : vector<8xf32> to vector<8x1xf32>
    %168 = vector.broadcast %167 : vector<8x1xf32> to vector<8x8xf32>
    %169 = arith.subf %165, %168 : vector<8x8xf32>
    %170 = math.exp %169 : vector<8x8xf32>
    %cst_61 = arith.constant dense<0.000000e+00> : vector<8xf32>
    %171 = vector.multi_reduction <add>, %170, %cst_61 [1] : vector<8x8xf32> to vector<8xf32>
    %172 = vector.shape_cast %171 : vector<8xf32> to vector<8x1xf32>
    %173 = tpu.reciprocal %172 {approx = true} : vector<8x1xf32> -> vector<8x1xf32>
    %174 = vector.broadcast %173 : vector<8x1xf32> to vector<8x8xf32>
    %175 = arith.mulf %170, %174 : vector<8x8xf32>
    %176 = arith.truncf %175 : vector<8x8xf32> to vector<8x8xbf16>
    %177 = arith.truncf %159 : vector<8x8xf32> to vector<8x8xbf16>
    %cst_62 = arith.constant dense<0.000000e+00> : vector<8x8xf32>
    %178 = tpu.matmul %176, %177, %cst_62 {dimension_numbers = #tpu.dot_dimension_numbers<[1], [0], [0], [1], [0, 0, 1, 1], [], []>} : vector<8x8xbf16>, vector<8x8xbf16>, vector<8x8xf32> -> vector<8x8xf32>
    %179 = vector.extract_strided_slice %35 {offsets = [24, 0], sizes = [8, 32], strides = [1, 1]} : vector<32x32xf32> to vector<8x32xf32>
    %180 = arith.truncf %178 : vector<8x8xf32> to vector<8x8xbf16>
    %181 = arith.truncf %179 : vector<8x32xf32> to vector<8x32xbf16>
    %cst_63 = arith.constant dense<0.000000e+00> : vector<8x32xf32>
    %182 = tpu.matmul %180, %181, %cst_63 {dimension_numbers = #tpu.dot_dimension_numbers<[1], [0], [0], [1], [0, 0, 1, 1], [], []>} : vector<8x8xbf16>, vector<8x32xbf16>, vector<8x32xf32> -> vector<8x32xf32>
    %183 = arith.addf %156, %182 : vector<8x32xf32>
    %184 = arith.addf %27, %183 : vector<8x32xf32>
    %c0_64 = arith.constant 0 : index
    %c0_65 = arith.constant 0 : index
    %c0_66 = arith.constant 0 : index
    %185 = vector.load %arg16[%c0_64, %c0_65, %c0_66] : memref<3x1x32xf32, #tpu.memory_space<vmem>>, vector<1x1x32xf32>
    %186 = vector.shape_cast %185 : vector<1x1x32xf32> to vector<1x32xf32>
    %c0_67 = arith.constant 0 : index
    %c0_68 = arith.constant 0 : index
    %c0_69 = arith.constant 0 : index
    %187 = vector.load %arg17[%c0_67, %c0_68, %c0_69] : memref<3x1x32xf32, #tpu.memory_space<vmem>>, vector<1x1x32xf32>
    %188 = vector.shape_cast %187 : vector<1x1x32xf32> to vector<1x32xf32>
    %189 = vector.shape_cast %184 : vector<8x32xf32> to vector<1x8x32xf32>
    %cst_70 = arith.constant dense<0.000000e+00> : vector<1x32xf32>
    %190 = vector.multi_reduction <add>, %189, %cst_70 [1] : vector<1x8x32xf32> to vector<1x32xf32>
    %191 = vector.shape_cast %190 : vector<1x32xf32> to vector<1x1x32xf32>
    %cst_71 = arith.constant 8.000000e+00 : f32
    %192 = vector.broadcast %cst_71 : f32 to vector<1x1x32xf32>
    %193 = arith.divf %191, %192 : vector<1x1x32xf32>
    %194 = vector.broadcast %193 : vector<1x1x32xf32> to vector<1x8x32xf32>
    %195 = arith.subf %189, %194 : vector<1x8x32xf32>
    %196 = arith.mulf %195, %195 : vector<1x8x32xf32>
    %cst_72 = arith.constant dense<0.000000e+00> : vector<1x32xf32>
    %197 = vector.multi_reduction <add>, %196, %cst_72 [1] : vector<1x8x32xf32> to vector<1x32xf32>
    %198 = vector.shape_cast %197 : vector<1x32xf32> to vector<1x1x32xf32>
    %cst_73 = arith.constant 8.000000e+00 : f32
    %199 = vector.broadcast %cst_73 : f32 to vector<1x1x32xf32>
    %200 = arith.divf %198, %199 : vector<1x1x32xf32>
    %201 = vector.broadcast %193 : vector<1x1x32xf32> to vector<1x8x32xf32>
    %202 = arith.subf %189, %201 : vector<1x8x32xf32>
    %cst_74 = arith.constant 9.99999974E-6 : f32
    %203 = vector.broadcast %cst_74 : f32 to vector<1x1x32xf32>
    %204 = arith.addf %200, %203 : vector<1x1x32xf32>
    %205 = math.rsqrt %204 : vector<1x1x32xf32>
    %206 = vector.broadcast %205 : vector<1x1x32xf32> to vector<1x8x32xf32>
    %207 = arith.mulf %202, %206 : vector<1x8x32xf32>
    %208 = vector.shape_cast %186 : vector<1x32xf32> to vector<1x1x32xf32>
    %209 = vector.broadcast %208 : vector<1x1x32xf32> to vector<1x8x32xf32>
    %210 = arith.mulf %207, %209 : vector<1x8x32xf32>
    %211 = vector.shape_cast %188 : vector<1x32xf32> to vector<1x1x32xf32>
    %212 = vector.broadcast %211 : vector<1x1x32xf32> to vector<1x8x32xf32>
    %213 = arith.addf %210, %212 : vector<1x8x32xf32>
    %214 = vector.shape_cast %213 : vector<1x8x32xf32> to vector<8x32xf32>
    %c0_75 = arith.constant 0 : index
    %c0_76 = arith.constant 0 : index
    %c0_77 = arith.constant 0 : index
    %215 = vector.load %arg12[%c0_75, %c0_76, %c0_77] : memref<3x32x64xf32, #tpu.memory_space<vmem>>, vector<1x32x64xf32>
    %216 = vector.shape_cast %215 : vector<1x32x64xf32> to vector<32x64xf32>
    %217 = arith.truncf %214 : vector<8x32xf32> to vector<8x32xbf16>
    %218 = arith.truncf %216 : vector<32x64xf32> to vector<32x64xbf16>
    %cst_78 = arith.constant dense<0.000000e+00> : vector<8x64xf32>
    %219 = tpu.matmul %217, %218, %cst_78 {dimension_numbers = #tpu.dot_dimension_numbers<[1], [0], [0], [1], [0, 0, 1, 1], [], []>} : vector<8x32xbf16>, vector<32x64xbf16>, vector<8x64xf32> -> vector<8x64xf32>
    %c0_79 = arith.constant 0 : index
    %c0_80 = arith.constant 0 : index
    %c0_81 = arith.constant 0 : index
    %220 = vector.load %arg13[%c0_79, %c0_80, %c0_81] : memref<3x1x64xf32, #tpu.memory_space<vmem>>, vector<1x1x64xf32>
    %221 = vector.shape_cast %220 : vector<1x1x64xf32> to vector<1x64xf32>
    %222 = vector.broadcast %221 : vector<1x64xf32> to vector<8x64xf32>
    %223 = arith.addf %219, %222 : vector<8x64xf32>
    %cst_82 = arith.constant 0.000000e+00 : f32
    %224 = vector.broadcast %cst_82 : f32 to vector<8x64xf32>
    %225 = arith.maximumf %223, %224 : vector<8x64xf32>
    %c0_83 = arith.constant 0 : index
    %c0_84 = arith.constant 0 : index
    %c0_85 = arith.constant 0 : index
    %226 = vector.load %arg14[%c0_83, %c0_84, %c0_85] : memref<3x64x32xf32, #tpu.memory_space<vmem>>, vector<1x64x32xf32>
    %227 = vector.shape_cast %226 : vector<1x64x32xf32> to vector<64x32xf32>
    %228 = arith.truncf %225 : vector<8x64xf32> to vector<8x64xbf16>
    %229 = arith.truncf %227 : vector<64x32xf32> to vector<64x32xbf16>
    %cst_86 = arith.constant dense<0.000000e+00> : vector<8x32xf32>
    %230 = tpu.matmul %228, %229, %cst_86 {dimension_numbers = #tpu.dot_dimension_numbers<[1], [0], [0], [1], [0, 0, 1, 1], [], []>} : vector<8x64xbf16>, vector<64x32xbf16>, vector<8x32xf32> -> vector<8x32xf32>
    %c0_87 = arith.constant 0 : index
    %c0_88 = arith.constant 0 : index
    %c0_89 = arith.constant 0 : index
    %231 = vector.load %arg15[%c0_87, %c0_88, %c0_89] : memref<3x1x32xf32, #tpu.memory_space<vmem>>, vector<1x1x32xf32>
    %232 = vector.shape_cast %231 : vector<1x1x32xf32> to vector<1x32xf32>
    %233 = vector.broadcast %232 : vector<1x32xf32> to vector<8x32xf32>
    %234 = arith.addf %230, %233 : vector<8x32xf32>
    %235 = arith.addf %184, %234 : vector<8x32xf32>
    %c1 = arith.constant 1 : index
    %c0_90 = arith.constant 0 : index
    %c0_91 = arith.constant 0 : index
    %236 = vector.load %arg6[%c1, %c0_90, %c0_91] : memref<3x32x32xf32, #tpu.memory_space<vmem>>, vector<1x32x32xf32>
    %237 = vector.shape_cast %236 : vector<1x32x32xf32> to vector<32x32xf32>
    %c1_92 = arith.constant 1 : index
    %c0_93 = arith.constant 0 : index
    %c0_94 = arith.constant 0 : index
    %238 = vector.load %arg7[%c1_92, %c0_93, %c0_94] : memref<3x32x32xf32, #tpu.memory_space<vmem>>, vector<1x32x32xf32>
    %239 = vector.shape_cast %238 : vector<1x32x32xf32> to vector<32x32xf32>
    %c1_95 = arith.constant 1 : index
    %c0_96 = arith.constant 0 : index
    %c0_97 = arith.constant 0 : index
    %240 = vector.load %arg8[%c1_95, %c0_96, %c0_97] : memref<3x32x32xf32, #tpu.memory_space<vmem>>, vector<1x32x32xf32>
    %241 = vector.shape_cast %240 : vector<1x32x32xf32> to vector<32x32xf32>
    %c1_98 = arith.constant 1 : index
    %c0_99 = arith.constant 0 : index
    %c0_100 = arith.constant 0 : index
    %242 = vector.load %arg9[%c1_98, %c0_99, %c0_100] : memref<3x32x32xf32, #tpu.memory_space<vmem>>, vector<1x32x32xf32>
    %243 = vector.shape_cast %242 : vector<1x32x32xf32> to vector<32x32xf32>
    %c1_101 = arith.constant 1 : index
    %c0_102 = arith.constant 0 : index
    %c0_103 = arith.constant 0 : index
    %244 = vector.load %arg10[%c1_101, %c0_102, %c0_103] : memref<3x1x32xf32, #tpu.memory_space<vmem>>, vector<1x1x32xf32>
    %245 = vector.shape_cast %244 : vector<1x1x32xf32> to vector<1x32xf32>
    %c1_104 = arith.constant 1 : index
    %c0_105 = arith.constant 0 : index
    %c0_106 = arith.constant 0 : index
    %246 = vector.load %arg11[%c1_104, %c0_105, %c0_106] : memref<3x1x32xf32, #tpu.memory_space<vmem>>, vector<1x1x32xf32>
    %247 = vector.shape_cast %246 : vector<1x1x32xf32> to vector<1x32xf32>
    %248 = vector.shape_cast %235 : vector<8x32xf32> to vector<1x8x32xf32>
    %cst_107 = arith.constant dense<0.000000e+00> : vector<1x32xf32>
    %249 = vector.multi_reduction <add>, %248, %cst_107 [1] : vector<1x8x32xf32> to vector<1x32xf32>
    %250 = vector.shape_cast %249 : vector<1x32xf32> to vector<1x1x32xf32>
    %cst_108 = arith.constant 8.000000e+00 : f32
    %251 = vector.broadcast %cst_108 : f32 to vector<1x1x32xf32>
    %252 = arith.divf %250, %251 : vector<1x1x32xf32>
    %253 = vector.broadcast %252 : vector<1x1x32xf32> to vector<1x8x32xf32>
    %254 = arith.subf %248, %253 : vector<1x8x32xf32>
    %255 = arith.mulf %254, %254 : vector<1x8x32xf32>
    %cst_109 = arith.constant dense<0.000000e+00> : vector<1x32xf32>
    %256 = vector.multi_reduction <add>, %255, %cst_109 [1] : vector<1x8x32xf32> to vector<1x32xf32>
    %257 = vector.shape_cast %256 : vector<1x32xf32> to vector<1x1x32xf32>
    %cst_110 = arith.constant 8.000000e+00 : f32
    %258 = vector.broadcast %cst_110 : f32 to vector<1x1x32xf32>
    %259 = arith.divf %257, %258 : vector<1x1x32xf32>
    %260 = vector.broadcast %252 : vector<1x1x32xf32> to vector<1x8x32xf32>
    %261 = arith.subf %248, %260 : vector<1x8x32xf32>
    %cst_111 = arith.constant 9.99999974E-6 : f32
    %262 = vector.broadcast %cst_111 : f32 to vector<1x1x32xf32>
    %263 = arith.addf %259, %262 : vector<1x1x32xf32>
    %264 = math.rsqrt %263 : vector<1x1x32xf32>
    %265 = vector.broadcast %264 : vector<1x1x32xf32> to vector<1x8x32xf32>
    %266 = arith.mulf %261, %265 : vector<1x8x32xf32>
    %267 = vector.shape_cast %245 : vector<1x32xf32> to vector<1x1x32xf32>
    %268 = vector.broadcast %267 : vector<1x1x32xf32> to vector<1x8x32xf32>
    %269 = arith.mulf %266, %268 : vector<1x8x32xf32>
    %270 = vector.shape_cast %247 : vector<1x32xf32> to vector<1x1x32xf32>
    %271 = vector.broadcast %270 : vector<1x1x32xf32> to vector<1x8x32xf32>
    %272 = arith.addf %269, %271 : vector<1x8x32xf32>
    %273 = vector.shape_cast %272 : vector<1x8x32xf32> to vector<8x32xf32>
    %274 = arith.truncf %273 : vector<8x32xf32> to vector<8x32xbf16>
    %275 = arith.truncf %237 : vector<32x32xf32> to vector<32x32xbf16>
    %cst_112 = arith.constant dense<0.000000e+00> : vector<8x32xf32>
    %276 = tpu.matmul %274, %275, %cst_112 {dimension_numbers = #tpu.dot_dimension_numbers<[1], [0], [0], [1], [0, 0, 1, 1], [], []>} : vector<8x32xbf16>, vector<32x32xbf16>, vector<8x32xf32> -> vector<8x32xf32>
    %277 = arith.truncf %273 : vector<8x32xf32> to vector<8x32xbf16>
    %278 = arith.truncf %239 : vector<32x32xf32> to vector<32x32xbf16>
    %cst_113 = arith.constant dense<0.000000e+00> : vector<8x32xf32>
    %279 = tpu.matmul %277, %278, %cst_113 {dimension_numbers = #tpu.dot_dimension_numbers<[1], [0], [0], [1], [0, 0, 1, 1], [], []>} : vector<8x32xbf16>, vector<32x32xbf16>, vector<8x32xf32> -> vector<8x32xf32>
    %280 = arith.truncf %273 : vector<8x32xf32> to vector<8x32xbf16>
    %281 = arith.truncf %241 : vector<32x32xf32> to vector<32x32xbf16>
    %cst_114 = arith.constant dense<0.000000e+00> : vector<8x32xf32>
    %282 = tpu.matmul %280, %281, %cst_114 {dimension_numbers = #tpu.dot_dimension_numbers<[1], [0], [0], [1], [0, 0, 1, 1], [], []>} : vector<8x32xbf16>, vector<32x32xbf16>, vector<8x32xf32> -> vector<8x32xf32>
    %cst_115 = arith.constant 0.000000e+00 : f32
    %283 = vector.broadcast %cst_115 : f32 to vector<8x32xf32>
    %284 = vector.extract_strided_slice %276 {offsets = [0, 0], sizes = [8, 8], strides = [1, 1]} : vector<8x32xf32> to vector<8x8xf32>
    %285 = vector.extract_strided_slice %279 {offsets = [0, 0], sizes = [8, 8], strides = [1, 1]} : vector<8x32xf32> to vector<8x8xf32>
    %286 = vector.extract_strided_slice %282 {offsets = [0, 0], sizes = [8, 8], strides = [1, 1]} : vector<8x32xf32> to vector<8x8xf32>
    %287 = tpu.transpose %285, [1, 0] : vector<8x8xf32> -> vector<8x8xf32>
    %288 = arith.truncf %284 : vector<8x8xf32> to vector<8x8xbf16>
    %289 = arith.truncf %287 : vector<8x8xf32> to vector<8x8xbf16>
    %cst_116 = arith.constant dense<0.000000e+00> : vector<8x8xf32>
    %290 = tpu.matmul %288, %289, %cst_116 {dimension_numbers = #tpu.dot_dimension_numbers<[1], [0], [0], [1], [0, 0, 1, 1], [], []>} : vector<8x8xbf16>, vector<8x8xbf16>, vector<8x8xf32> -> vector<8x8xf32>
    %cst_117 = arith.constant 0.353553385 : f32
    %291 = vector.broadcast %cst_117 : f32 to vector<8x8xf32>
    %292 = arith.mulf %290, %291 : vector<8x8xf32>
    %cst_118 = arith.constant dense<0xFF800000> : vector<8xf32>
    %293 = vector.multi_reduction <maximumf>, %292, %cst_118 [1] : vector<8x8xf32> to vector<8xf32>
    %294 = vector.shape_cast %293 : vector<8xf32> to vector<8x1xf32>
    %295 = vector.broadcast %294 : vector<8x1xf32> to vector<8x8xf32>
    %296 = arith.subf %292, %295 : vector<8x8xf32>
    %297 = math.exp %296 : vector<8x8xf32>
    %cst_119 = arith.constant dense<0.000000e+00> : vector<8xf32>
    %298 = vector.multi_reduction <add>, %297, %cst_119 [1] : vector<8x8xf32> to vector<8xf32>
    %299 = vector.shape_cast %298 : vector<8xf32> to vector<8x1xf32>
    %300 = tpu.reciprocal %299 {approx = true} : vector<8x1xf32> -> vector<8x1xf32>
    %301 = vector.broadcast %300 : vector<8x1xf32> to vector<8x8xf32>
    %302 = arith.mulf %297, %301 : vector<8x8xf32>
    %303 = arith.truncf %302 : vector<8x8xf32> to vector<8x8xbf16>
    %304 = arith.truncf %286 : vector<8x8xf32> to vector<8x8xbf16>
    %cst_120 = arith.constant dense<0.000000e+00> : vector<8x8xf32>
    %305 = tpu.matmul %303, %304, %cst_120 {dimension_numbers = #tpu.dot_dimension_numbers<[1], [0], [0], [1], [0, 0, 1, 1], [], []>} : vector<8x8xbf16>, vector<8x8xbf16>, vector<8x8xf32> -> vector<8x8xf32>
    %306 = vector.extract_strided_slice %243 {offsets = [0, 0], sizes = [8, 32], strides = [1, 1]} : vector<32x32xf32> to vector<8x32xf32>
    %307 = arith.truncf %305 : vector<8x8xf32> to vector<8x8xbf16>
    %308 = arith.truncf %306 : vector<8x32xf32> to vector<8x32xbf16>
    %cst_121 = arith.constant dense<0.000000e+00> : vector<8x32xf32>
    %309 = tpu.matmul %307, %308, %cst_121 {dimension_numbers = #tpu.dot_dimension_numbers<[1], [0], [0], [1], [0, 0, 1, 1], [], []>} : vector<8x8xbf16>, vector<8x32xbf16>, vector<8x32xf32> -> vector<8x32xf32>
    %310 = arith.addf %283, %309 : vector<8x32xf32>
    %311 = vector.extract_strided_slice %276 {offsets = [0, 8], sizes = [8, 8], strides = [1, 1]} : vector<8x32xf32> to vector<8x8xf32>
    %312 = vector.extract_strided_slice %279 {offsets = [0, 8], sizes = [8, 8], strides = [1, 1]} : vector<8x32xf32> to vector<8x8xf32>
    %313 = vector.extract_strided_slice %282 {offsets = [0, 8], sizes = [8, 8], strides = [1, 1]} : vector<8x32xf32> to vector<8x8xf32>
    %314 = tpu.transpose %312, [1, 0] : vector<8x8xf32> -> vector<8x8xf32>
    %315 = arith.truncf %311 : vector<8x8xf32> to vector<8x8xbf16>
    %316 = arith.truncf %314 : vector<8x8xf32> to vector<8x8xbf16>
    %cst_122 = arith.constant dense<0.000000e+00> : vector<8x8xf32>
    %317 = tpu.matmul %315, %316, %cst_122 {dimension_numbers = #tpu.dot_dimension_numbers<[1], [0], [0], [1], [0, 0, 1, 1], [], []>} : vector<8x8xbf16>, vector<8x8xbf16>, vector<8x8xf32> -> vector<8x8xf32>
    %cst_123 = arith.constant 0.353553385 : f32
    %318 = vector.broadcast %cst_123 : f32 to vector<8x8xf32>
    %319 = arith.mulf %317, %318 : vector<8x8xf32>
    %cst_124 = arith.constant dense<0xFF800000> : vector<8xf32>
    %320 = vector.multi_reduction <maximumf>, %319, %cst_124 [1] : vector<8x8xf32> to vector<8xf32>
    %321 = vector.shape_cast %320 : vector<8xf32> to vector<8x1xf32>
    %322 = vector.broadcast %321 : vector<8x1xf32> to vector<8x8xf32>
    %323 = arith.subf %319, %322 : vector<8x8xf32>
    %324 = math.exp %323 : vector<8x8xf32>
    %cst_125 = arith.constant dense<0.000000e+00> : vector<8xf32>
    %325 = vector.multi_reduction <add>, %324, %cst_125 [1] : vector<8x8xf32> to vector<8xf32>
    %326 = vector.shape_cast %325 : vector<8xf32> to vector<8x1xf32>
    %327 = tpu.reciprocal %326 {approx = true} : vector<8x1xf32> -> vector<8x1xf32>
    %328 = vector.broadcast %327 : vector<8x1xf32> to vector<8x8xf32>
    %329 = arith.mulf %324, %328 : vector<8x8xf32>
    %330 = arith.truncf %329 : vector<8x8xf32> to vector<8x8xbf16>
    %331 = arith.truncf %313 : vector<8x8xf32> to vector<8x8xbf16>
    %cst_126 = arith.constant dense<0.000000e+00> : vector<8x8xf32>
    %332 = tpu.matmul %330, %331, %cst_126 {dimension_numbers = #tpu.dot_dimension_numbers<[1], [0], [0], [1], [0, 0, 1, 1], [], []>} : vector<8x8xbf16>, vector<8x8xbf16>, vector<8x8xf32> -> vector<8x8xf32>
    %333 = vector.extract_strided_slice %243 {offsets = [8, 0], sizes = [8, 32], strides = [1, 1]} : vector<32x32xf32> to vector<8x32xf32>
    %334 = arith.truncf %332 : vector<8x8xf32> to vector<8x8xbf16>
    %335 = arith.truncf %333 : vector<8x32xf32> to vector<8x32xbf16>
    %cst_127 = arith.constant dense<0.000000e+00> : vector<8x32xf32>
    %336 = tpu.matmul %334, %335, %cst_127 {dimension_numbers = #tpu.dot_dimension_numbers<[1], [0], [0], [1], [0, 0, 1, 1], [], []>} : vector<8x8xbf16>, vector<8x32xbf16>, vector<8x32xf32> -> vector<8x32xf32>
    %337 = arith.addf %310, %336 : vector<8x32xf32>
    %338 = vector.extract_strided_slice %276 {offsets = [0, 16], sizes = [8, 8], strides = [1, 1]} : vector<8x32xf32> to vector<8x8xf32>
    %339 = vector.extract_strided_slice %279 {offsets = [0, 16], sizes = [8, 8], strides = [1, 1]} : vector<8x32xf32> to vector<8x8xf32>
    %340 = vector.extract_strided_slice %282 {offsets = [0, 16], sizes = [8, 8], strides = [1, 1]} : vector<8x32xf32> to vector<8x8xf32>
    %341 = tpu.transpose %339, [1, 0] : vector<8x8xf32> -> vector<8x8xf32>
    %342 = arith.truncf %338 : vector<8x8xf32> to vector<8x8xbf16>
    %343 = arith.truncf %341 : vector<8x8xf32> to vector<8x8xbf16>
    %cst_128 = arith.constant dense<0.000000e+00> : vector<8x8xf32>
    %344 = tpu.matmul %342, %343, %cst_128 {dimension_numbers = #tpu.dot_dimension_numbers<[1], [0], [0], [1], [0, 0, 1, 1], [], []>} : vector<8x8xbf16>, vector<8x8xbf16>, vector<8x8xf32> -> vector<8x8xf32>
    %cst_129 = arith.constant 0.353553385 : f32
    %345 = vector.broadcast %cst_129 : f32 to vector<8x8xf32>
    %346 = arith.mulf %344, %345 : vector<8x8xf32>
    %cst_130 = arith.constant dense<0xFF800000> : vector<8xf32>
    %347 = vector.multi_reduction <maximumf>, %346, %cst_130 [1] : vector<8x8xf32> to vector<8xf32>
    %348 = vector.shape_cast %347 : vector<8xf32> to vector<8x1xf32>
    %349 = vector.broadcast %348 : vector<8x1xf32> to vector<8x8xf32>
    %350 = arith.subf %346, %349 : vector<8x8xf32>
    %351 = math.exp %350 : vector<8x8xf32>
    %cst_131 = arith.constant dense<0.000000e+00> : vector<8xf32>
    %352 = vector.multi_reduction <add>, %351, %cst_131 [1] : vector<8x8xf32> to vector<8xf32>
    %353 = vector.shape_cast %352 : vector<8xf32> to vector<8x1xf32>
    %354 = tpu.reciprocal %353 {approx = true} : vector<8x1xf32> -> vector<8x1xf32>
    %355 = vector.broadcast %354 : vector<8x1xf32> to vector<8x8xf32>
    %356 = arith.mulf %351, %355 : vector<8x8xf32>
    %357 = arith.truncf %356 : vector<8x8xf32> to vector<8x8xbf16>
    %358 = arith.truncf %340 : vector<8x8xf32> to vector<8x8xbf16>
    %cst_132 = arith.constant dense<0.000000e+00> : vector<8x8xf32>
    %359 = tpu.matmul %357, %358, %cst_132 {dimension_numbers = #tpu.dot_dimension_numbers<[1], [0], [0], [1], [0, 0, 1, 1], [], []>} : vector<8x8xbf16>, vector<8x8xbf16>, vector<8x8xf32> -> vector<8x8xf32>
    %360 = vector.extract_strided_slice %243 {offsets = [16, 0], sizes = [8, 32], strides = [1, 1]} : vector<32x32xf32> to vector<8x32xf32>
    %361 = arith.truncf %359 : vector<8x8xf32> to vector<8x8xbf16>
    %362 = arith.truncf %360 : vector<8x32xf32> to vector<8x32xbf16>
    %cst_133 = arith.constant dense<0.000000e+00> : vector<8x32xf32>
    %363 = tpu.matmul %361, %362, %cst_133 {dimension_numbers = #tpu.dot_dimension_numbers<[1], [0], [0], [1], [0, 0, 1, 1], [], []>} : vector<8x8xbf16>, vector<8x32xbf16>, vector<8x32xf32> -> vector<8x32xf32>
    %364 = arith.addf %337, %363 : vector<8x32xf32>
    %365 = vector.extract_strided_slice %276 {offsets = [0, 24], sizes = [8, 8], strides = [1, 1]} : vector<8x32xf32> to vector<8x8xf32>
    %366 = vector.extract_strided_slice %279 {offsets = [0, 24], sizes = [8, 8], strides = [1, 1]} : vector<8x32xf32> to vector<8x8xf32>
    %367 = vector.extract_strided_slice %282 {offsets = [0, 24], sizes = [8, 8], strides = [1, 1]} : vector<8x32xf32> to vector<8x8xf32>
    %368 = tpu.transpose %366, [1, 0] : vector<8x8xf32> -> vector<8x8xf32>
    %369 = arith.truncf %365 : vector<8x8xf32> to vector<8x8xbf16>
    %370 = arith.truncf %368 : vector<8x8xf32> to vector<8x8xbf16>
    %cst_134 = arith.constant dense<0.000000e+00> : vector<8x8xf32>
    %371 = tpu.matmul %369, %370, %cst_134 {dimension_numbers = #tpu.dot_dimension_numbers<[1], [0], [0], [1], [0, 0, 1, 1], [], []>} : vector<8x8xbf16>, vector<8x8xbf16>, vector<8x8xf32> -> vector<8x8xf32>
    %cst_135 = arith.constant 0.353553385 : f32
    %372 = vector.broadcast %cst_135 : f32 to vector<8x8xf32>
    %373 = arith.mulf %371, %372 : vector<8x8xf32>
    %cst_136 = arith.constant dense<0xFF800000> : vector<8xf32>
    %374 = vector.multi_reduction <maximumf>, %373, %cst_136 [1] : vector<8x8xf32> to vector<8xf32>
    %375 = vector.shape_cast %374 : vector<8xf32> to vector<8x1xf32>
    %376 = vector.broadcast %375 : vector<8x1xf32> to vector<8x8xf32>
    %377 = arith.subf %373, %376 : vector<8x8xf32>
    %378 = math.exp %377 : vector<8x8xf32>
    %cst_137 = arith.constant dense<0.000000e+00> : vector<8xf32>
    %379 = vector.multi_reduction <add>, %378, %cst_137 [1] : vector<8x8xf32> to vector<8xf32>
    %380 = vector.shape_cast %379 : vector<8xf32> to vector<8x1xf32>
    %381 = tpu.reciprocal %380 {approx = true} : vector<8x1xf32> -> vector<8x1xf32>
    %382 = vector.broadcast %381 : vector<8x1xf32> to vector<8x8xf32>
    %383 = arith.mulf %378, %382 : vector<8x8xf32>
    %384 = arith.truncf %383 : vector<8x8xf32> to vector<8x8xbf16>
    %385 = arith.truncf %367 : vector<8x8xf32> to vector<8x8xbf16>
    %cst_138 = arith.constant dense<0.000000e+00> : vector<8x8xf32>
    %386 = tpu.matmul %384, %385, %cst_138 {dimension_numbers = #tpu.dot_dimension_numbers<[1], [0], [0], [1], [0, 0, 1, 1], [], []>} : vector<8x8xbf16>, vector<8x8xbf16>, vector<8x8xf32> -> vector<8x8xf32>
    %387 = vector.extract_strided_slice %243 {offsets = [24, 0], sizes = [8, 32], strides = [1, 1]} : vector<32x32xf32> to vector<8x32xf32>
    %388 = arith.truncf %386 : vector<8x8xf32> to vector<8x8xbf16>
    %389 = arith.truncf %387 : vector<8x32xf32> to vector<8x32xbf16>
    %cst_139 = arith.constant dense<0.000000e+00> : vector<8x32xf32>
    %390 = tpu.matmul %388, %389, %cst_139 {dimension_numbers = #tpu.dot_dimension_numbers<[1], [0], [0], [1], [0, 0, 1, 1], [], []>} : vector<8x8xbf16>, vector<8x32xbf16>, vector<8x32xf32> -> vector<8x32xf32>
    %391 = arith.addf %364, %390 : vector<8x32xf32>
    %392 = arith.addf %235, %391 : vector<8x32xf32>
    %c1_140 = arith.constant 1 : index
    %c0_141 = arith.constant 0 : index
    %c0_142 = arith.constant 0 : index
    %393 = vector.load %arg16[%c1_140, %c0_141, %c0_142] : memref<3x1x32xf32, #tpu.memory_space<vmem>>, vector<1x1x32xf32>
    %394 = vector.shape_cast %393 : vector<1x1x32xf32> to vector<1x32xf32>
    %c1_143 = arith.constant 1 : index
    %c0_144 = arith.constant 0 : index
    %c0_145 = arith.constant 0 : index
    %395 = vector.load %arg17[%c1_143, %c0_144, %c0_145] : memref<3x1x32xf32, #tpu.memory_space<vmem>>, vector<1x1x32xf32>
    %396 = vector.shape_cast %395 : vector<1x1x32xf32> to vector<1x32xf32>
    %397 = vector.shape_cast %392 : vector<8x32xf32> to vector<1x8x32xf32>
    %cst_146 = arith.constant dense<0.000000e+00> : vector<1x32xf32>
    %398 = vector.multi_reduction <add>, %397, %cst_146 [1] : vector<1x8x32xf32> to vector<1x32xf32>
    %399 = vector.shape_cast %398 : vector<1x32xf32> to vector<1x1x32xf32>
    %cst_147 = arith.constant 8.000000e+00 : f32
    %400 = vector.broadcast %cst_147 : f32 to vector<1x1x32xf32>
    %401 = arith.divf %399, %400 : vector<1x1x32xf32>
    %402 = vector.broadcast %401 : vector<1x1x32xf32> to vector<1x8x32xf32>
    %403 = arith.subf %397, %402 : vector<1x8x32xf32>
    %404 = arith.mulf %403, %403 : vector<1x8x32xf32>
    %cst_148 = arith.constant dense<0.000000e+00> : vector<1x32xf32>
    %405 = vector.multi_reduction <add>, %404, %cst_148 [1] : vector<1x8x32xf32> to vector<1x32xf32>
    %406 = vector.shape_cast %405 : vector<1x32xf32> to vector<1x1x32xf32>
    %cst_149 = arith.constant 8.000000e+00 : f32
    %407 = vector.broadcast %cst_149 : f32 to vector<1x1x32xf32>
    %408 = arith.divf %406, %407 : vector<1x1x32xf32>
    %409 = vector.broadcast %401 : vector<1x1x32xf32> to vector<1x8x32xf32>
    %410 = arith.subf %397, %409 : vector<1x8x32xf32>
    %cst_150 = arith.constant 9.99999974E-6 : f32
    %411 = vector.broadcast %cst_150 : f32 to vector<1x1x32xf32>
    %412 = arith.addf %408, %411 : vector<1x1x32xf32>
    %413 = math.rsqrt %412 : vector<1x1x32xf32>
    %414 = vector.broadcast %413 : vector<1x1x32xf32> to vector<1x8x32xf32>
    %415 = arith.mulf %410, %414 : vector<1x8x32xf32>
    %416 = vector.shape_cast %394 : vector<1x32xf32> to vector<1x1x32xf32>
    %417 = vector.broadcast %416 : vector<1x1x32xf32> to vector<1x8x32xf32>
    %418 = arith.mulf %415, %417 : vector<1x8x32xf32>
    %419 = vector.shape_cast %396 : vector<1x32xf32> to vector<1x1x32xf32>
    %420 = vector.broadcast %419 : vector<1x1x32xf32> to vector<1x8x32xf32>
    %421 = arith.addf %418, %420 : vector<1x8x32xf32>
    %422 = vector.shape_cast %421 : vector<1x8x32xf32> to vector<8x32xf32>
    %c1_151 = arith.constant 1 : index
    %c0_152 = arith.constant 0 : index
    %c0_153 = arith.constant 0 : index
    %423 = vector.load %arg12[%c1_151, %c0_152, %c0_153] : memref<3x32x64xf32, #tpu.memory_space<vmem>>, vector<1x32x64xf32>
    %424 = vector.shape_cast %423 : vector<1x32x64xf32> to vector<32x64xf32>
    %425 = arith.truncf %422 : vector<8x32xf32> to vector<8x32xbf16>
    %426 = arith.truncf %424 : vector<32x64xf32> to vector<32x64xbf16>
    %cst_154 = arith.constant dense<0.000000e+00> : vector<8x64xf32>
    %427 = tpu.matmul %425, %426, %cst_154 {dimension_numbers = #tpu.dot_dimension_numbers<[1], [0], [0], [1], [0, 0, 1, 1], [], []>} : vector<8x32xbf16>, vector<32x64xbf16>, vector<8x64xf32> -> vector<8x64xf32>
    %c1_155 = arith.constant 1 : index
    %c0_156 = arith.constant 0 : index
    %c0_157 = arith.constant 0 : index
    %428 = vector.load %arg13[%c1_155, %c0_156, %c0_157] : memref<3x1x64xf32, #tpu.memory_space<vmem>>, vector<1x1x64xf32>
    %429 = vector.shape_cast %428 : vector<1x1x64xf32> to vector<1x64xf32>
    %430 = vector.broadcast %429 : vector<1x64xf32> to vector<8x64xf32>
    %431 = arith.addf %427, %430 : vector<8x64xf32>
    %cst_158 = arith.constant 0.000000e+00 : f32
    %432 = vector.broadcast %cst_158 : f32 to vector<8x64xf32>
    %433 = arith.maximumf %431, %432 : vector<8x64xf32>
    %c1_159 = arith.constant 1 : index
    %c0_160 = arith.constant 0 : index
    %c0_161 = arith.constant 0 : index
    %434 = vector.load %arg14[%c1_159, %c0_160, %c0_161] : memref<3x64x32xf32, #tpu.memory_space<vmem>>, vector<1x64x32xf32>
    %435 = vector.shape_cast %434 : vector<1x64x32xf32> to vector<64x32xf32>
    %436 = arith.truncf %433 : vector<8x64xf32> to vector<8x64xbf16>
    %437 = arith.truncf %435 : vector<64x32xf32> to vector<64x32xbf16>
    %cst_162 = arith.constant dense<0.000000e+00> : vector<8x32xf32>
    %438 = tpu.matmul %436, %437, %cst_162 {dimension_numbers = #tpu.dot_dimension_numbers<[1], [0], [0], [1], [0, 0, 1, 1], [], []>} : vector<8x64xbf16>, vector<64x32xbf16>, vector<8x32xf32> -> vector<8x32xf32>
    %c1_163 = arith.constant 1 : index
    %c0_164 = arith.constant 0 : index
    %c0_165 = arith.constant 0 : index
    %439 = vector.load %arg15[%c1_163, %c0_164, %c0_165] : memref<3x1x32xf32, #tpu.memory_space<vmem>>, vector<1x1x32xf32>
    %440 = vector.shape_cast %439 : vector<1x1x32xf32> to vector<1x32xf32>
    %441 = vector.broadcast %440 : vector<1x32xf32> to vector<8x32xf32>
    %442 = arith.addf %438, %441 : vector<8x32xf32>
    %443 = arith.addf %392, %442 : vector<8x32xf32>
    %c2 = arith.constant 2 : index
    %c0_166 = arith.constant 0 : index
    %c0_167 = arith.constant 0 : index
    %444 = vector.load %arg6[%c2, %c0_166, %c0_167] : memref<3x32x32xf32, #tpu.memory_space<vmem>>, vector<1x32x32xf32>
    %445 = vector.shape_cast %444 : vector<1x32x32xf32> to vector<32x32xf32>
    %c2_168 = arith.constant 2 : index
    %c0_169 = arith.constant 0 : index
    %c0_170 = arith.constant 0 : index
    %446 = vector.load %arg7[%c2_168, %c0_169, %c0_170] : memref<3x32x32xf32, #tpu.memory_space<vmem>>, vector<1x32x32xf32>
    %447 = vector.shape_cast %446 : vector<1x32x32xf32> to vector<32x32xf32>
    %c2_171 = arith.constant 2 : index
    %c0_172 = arith.constant 0 : index
    %c0_173 = arith.constant 0 : index
    %448 = vector.load %arg8[%c2_171, %c0_172, %c0_173] : memref<3x32x32xf32, #tpu.memory_space<vmem>>, vector<1x32x32xf32>
    %449 = vector.shape_cast %448 : vector<1x32x32xf32> to vector<32x32xf32>
    %c2_174 = arith.constant 2 : index
    %c0_175 = arith.constant 0 : index
    %c0_176 = arith.constant 0 : index
    %450 = vector.load %arg9[%c2_174, %c0_175, %c0_176] : memref<3x32x32xf32, #tpu.memory_space<vmem>>, vector<1x32x32xf32>
    %451 = vector.shape_cast %450 : vector<1x32x32xf32> to vector<32x32xf32>
    %c2_177 = arith.constant 2 : index
    %c0_178 = arith.constant 0 : index
    %c0_179 = arith.constant 0 : index
    %452 = vector.load %arg10[%c2_177, %c0_178, %c0_179] : memref<3x1x32xf32, #tpu.memory_space<vmem>>, vector<1x1x32xf32>
    %453 = vector.shape_cast %452 : vector<1x1x32xf32> to vector<1x32xf32>
    %c2_180 = arith.constant 2 : index
    %c0_181 = arith.constant 0 : index
    %c0_182 = arith.constant 0 : index
    %454 = vector.load %arg11[%c2_180, %c0_181, %c0_182] : memref<3x1x32xf32, #tpu.memory_space<vmem>>, vector<1x1x32xf32>
    %455 = vector.shape_cast %454 : vector<1x1x32xf32> to vector<1x32xf32>
    %456 = vector.shape_cast %443 : vector<8x32xf32> to vector<1x8x32xf32>
    %cst_183 = arith.constant dense<0.000000e+00> : vector<1x32xf32>
    %457 = vector.multi_reduction <add>, %456, %cst_183 [1] : vector<1x8x32xf32> to vector<1x32xf32>
    %458 = vector.shape_cast %457 : vector<1x32xf32> to vector<1x1x32xf32>
    %cst_184 = arith.constant 8.000000e+00 : f32
    %459 = vector.broadcast %cst_184 : f32 to vector<1x1x32xf32>
    %460 = arith.divf %458, %459 : vector<1x1x32xf32>
    %461 = vector.broadcast %460 : vector<1x1x32xf32> to vector<1x8x32xf32>
    %462 = arith.subf %456, %461 : vector<1x8x32xf32>
    %463 = arith.mulf %462, %462 : vector<1x8x32xf32>
    %cst_185 = arith.constant dense<0.000000e+00> : vector<1x32xf32>
    %464 = vector.multi_reduction <add>, %463, %cst_185 [1] : vector<1x8x32xf32> to vector<1x32xf32>
    %465 = vector.shape_cast %464 : vector<1x32xf32> to vector<1x1x32xf32>
    %cst_186 = arith.constant 8.000000e+00 : f32
    %466 = vector.broadcast %cst_186 : f32 to vector<1x1x32xf32>
    %467 = arith.divf %465, %466 : vector<1x1x32xf32>
    %468 = vector.broadcast %460 : vector<1x1x32xf32> to vector<1x8x32xf32>
    %469 = arith.subf %456, %468 : vector<1x8x32xf32>
    %cst_187 = arith.constant 9.99999974E-6 : f32
    %470 = vector.broadcast %cst_187 : f32 to vector<1x1x32xf32>
    %471 = arith.addf %467, %470 : vector<1x1x32xf32>
    %472 = math.rsqrt %471 : vector<1x1x32xf32>
    %473 = vector.broadcast %472 : vector<1x1x32xf32> to vector<1x8x32xf32>
    %474 = arith.mulf %469, %473 : vector<1x8x32xf32>
    %475 = vector.shape_cast %453 : vector<1x32xf32> to vector<1x1x32xf32>
    %476 = vector.broadcast %475 : vector<1x1x32xf32> to vector<1x8x32xf32>
    %477 = arith.mulf %474, %476 : vector<1x8x32xf32>
    %478 = vector.shape_cast %455 : vector<1x32xf32> to vector<1x1x32xf32>
    %479 = vector.broadcast %478 : vector<1x1x32xf32> to vector<1x8x32xf32>
    %480 = arith.addf %477, %479 : vector<1x8x32xf32>
    %481 = vector.shape_cast %480 : vector<1x8x32xf32> to vector<8x32xf32>
    %482 = arith.truncf %481 : vector<8x32xf32> to vector<8x32xbf16>
    %483 = arith.truncf %445 : vector<32x32xf32> to vector<32x32xbf16>
    %cst_188 = arith.constant dense<0.000000e+00> : vector<8x32xf32>
    %484 = tpu.matmul %482, %483, %cst_188 {dimension_numbers = #tpu.dot_dimension_numbers<[1], [0], [0], [1], [0, 0, 1, 1], [], []>} : vector<8x32xbf16>, vector<32x32xbf16>, vector<8x32xf32> -> vector<8x32xf32>
    %485 = arith.truncf %481 : vector<8x32xf32> to vector<8x32xbf16>
    %486 = arith.truncf %447 : vector<32x32xf32> to vector<32x32xbf16>
    %cst_189 = arith.constant dense<0.000000e+00> : vector<8x32xf32>
    %487 = tpu.matmul %485, %486, %cst_189 {dimension_numbers = #tpu.dot_dimension_numbers<[1], [0], [0], [1], [0, 0, 1, 1], [], []>} : vector<8x32xbf16>, vector<32x32xbf16>, vector<8x32xf32> -> vector<8x32xf32>
    %488 = arith.truncf %481 : vector<8x32xf32> to vector<8x32xbf16>
    %489 = arith.truncf %449 : vector<32x32xf32> to vector<32x32xbf16>
    %cst_190 = arith.constant dense<0.000000e+00> : vector<8x32xf32>
    %490 = tpu.matmul %488, %489, %cst_190 {dimension_numbers = #tpu.dot_dimension_numbers<[1], [0], [0], [1], [0, 0, 1, 1], [], []>} : vector<8x32xbf16>, vector<32x32xbf16>, vector<8x32xf32> -> vector<8x32xf32>
    %cst_191 = arith.constant 0.000000e+00 : f32
    %491 = vector.broadcast %cst_191 : f32 to vector<8x32xf32>
    %492 = vector.extract_strided_slice %484 {offsets = [0, 0], sizes = [8, 8], strides = [1, 1]} : vector<8x32xf32> to vector<8x8xf32>
    %493 = vector.extract_strided_slice %487 {offsets = [0, 0], sizes = [8, 8], strides = [1, 1]} : vector<8x32xf32> to vector<8x8xf32>
    %494 = vector.extract_strided_slice %490 {offsets = [0, 0], sizes = [8, 8], strides = [1, 1]} : vector<8x32xf32> to vector<8x8xf32>
    %495 = tpu.transpose %493, [1, 0] : vector<8x8xf32> -> vector<8x8xf32>
    %496 = arith.truncf %492 : vector<8x8xf32> to vector<8x8xbf16>
    %497 = arith.truncf %495 : vector<8x8xf32> to vector<8x8xbf16>
    %cst_192 = arith.constant dense<0.000000e+00> : vector<8x8xf32>
    %498 = tpu.matmul %496, %497, %cst_192 {dimension_numbers = #tpu.dot_dimension_numbers<[1], [0], [0], [1], [0, 0, 1, 1], [], []>} : vector<8x8xbf16>, vector<8x8xbf16>, vector<8x8xf32> -> vector<8x8xf32>
    %cst_193 = arith.constant 0.353553385 : f32
    %499 = vector.broadcast %cst_193 : f32 to vector<8x8xf32>
    %500 = arith.mulf %498, %499 : vector<8x8xf32>
    %cst_194 = arith.constant dense<0xFF800000> : vector<8xf32>
    %501 = vector.multi_reduction <maximumf>, %500, %cst_194 [1] : vector<8x8xf32> to vector<8xf32>
    %502 = vector.shape_cast %501 : vector<8xf32> to vector<8x1xf32>
    %503 = vector.broadcast %502 : vector<8x1xf32> to vector<8x8xf32>
    %504 = arith.subf %500, %503 : vector<8x8xf32>
    %505 = math.exp %504 : vector<8x8xf32>
    %cst_195 = arith.constant dense<0.000000e+00> : vector<8xf32>
    %506 = vector.multi_reduction <add>, %505, %cst_195 [1] : vector<8x8xf32> to vector<8xf32>
    %507 = vector.shape_cast %506 : vector<8xf32> to vector<8x1xf32>
    %508 = tpu.reciprocal %507 {approx = true} : vector<8x1xf32> -> vector<8x1xf32>
    %509 = vector.broadcast %508 : vector<8x1xf32> to vector<8x8xf32>
    %510 = arith.mulf %505, %509 : vector<8x8xf32>
    %511 = arith.truncf %510 : vector<8x8xf32> to vector<8x8xbf16>
    %512 = arith.truncf %494 : vector<8x8xf32> to vector<8x8xbf16>
    %cst_196 = arith.constant dense<0.000000e+00> : vector<8x8xf32>
    %513 = tpu.matmul %511, %512, %cst_196 {dimension_numbers = #tpu.dot_dimension_numbers<[1], [0], [0], [1], [0, 0, 1, 1], [], []>} : vector<8x8xbf16>, vector<8x8xbf16>, vector<8x8xf32> -> vector<8x8xf32>
    %514 = vector.extract_strided_slice %451 {offsets = [0, 0], sizes = [8, 32], strides = [1, 1]} : vector<32x32xf32> to vector<8x32xf32>
    %515 = arith.truncf %513 : vector<8x8xf32> to vector<8x8xbf16>
    %516 = arith.truncf %514 : vector<8x32xf32> to vector<8x32xbf16>
    %cst_197 = arith.constant dense<0.000000e+00> : vector<8x32xf32>
    %517 = tpu.matmul %515, %516, %cst_197 {dimension_numbers = #tpu.dot_dimension_numbers<[1], [0], [0], [1], [0, 0, 1, 1], [], []>} : vector<8x8xbf16>, vector<8x32xbf16>, vector<8x32xf32> -> vector<8x32xf32>
    %518 = arith.addf %491, %517 : vector<8x32xf32>
    %519 = vector.extract_strided_slice %484 {offsets = [0, 8], sizes = [8, 8], strides = [1, 1]} : vector<8x32xf32> to vector<8x8xf32>
    %520 = vector.extract_strided_slice %487 {offsets = [0, 8], sizes = [8, 8], strides = [1, 1]} : vector<8x32xf32> to vector<8x8xf32>
    %521 = vector.extract_strided_slice %490 {offsets = [0, 8], sizes = [8, 8], strides = [1, 1]} : vector<8x32xf32> to vector<8x8xf32>
    %522 = tpu.transpose %520, [1, 0] : vector<8x8xf32> -> vector<8x8xf32>
    %523 = arith.truncf %519 : vector<8x8xf32> to vector<8x8xbf16>
    %524 = arith.truncf %522 : vector<8x8xf32> to vector<8x8xbf16>
    %cst_198 = arith.constant dense<0.000000e+00> : vector<8x8xf32>
    %525 = tpu.matmul %523, %524, %cst_198 {dimension_numbers = #tpu.dot_dimension_numbers<[1], [0], [0], [1], [0, 0, 1, 1], [], []>} : vector<8x8xbf16>, vector<8x8xbf16>, vector<8x8xf32> -> vector<8x8xf32>
    %cst_199 = arith.constant 0.353553385 : f32
    %526 = vector.broadcast %cst_199 : f32 to vector<8x8xf32>
    %527 = arith.mulf %525, %526 : vector<8x8xf32>
    %cst_200 = arith.constant dense<0xFF800000> : vector<8xf32>
    %528 = vector.multi_reduction <maximumf>, %527, %cst_200 [1] : vector<8x8xf32> to vector<8xf32>
    %529 = vector.shape_cast %528 : vector<8xf32> to vector<8x1xf32>
    %530 = vector.broadcast %529 : vector<8x1xf32> to vector<8x8xf32>
    %531 = arith.subf %527, %530 : vector<8x8xf32>
    %532 = math.exp %531 : vector<8x8xf32>
    %cst_201 = arith.constant dense<0.000000e+00> : vector<8xf32>
    %533 = vector.multi_reduction <add>, %532, %cst_201 [1] : vector<8x8xf32> to vector<8xf32>
    %534 = vector.shape_cast %533 : vector<8xf32> to vector<8x1xf32>
    %535 = tpu.reciprocal %534 {approx = true} : vector<8x1xf32> -> vector<8x1xf32>
    %536 = vector.broadcast %535 : vector<8x1xf32> to vector<8x8xf32>
    %537 = arith.mulf %532, %536 : vector<8x8xf32>
    %538 = arith.truncf %537 : vector<8x8xf32> to vector<8x8xbf16>
    %539 = arith.truncf %521 : vector<8x8xf32> to vector<8x8xbf16>
    %cst_202 = arith.constant dense<0.000000e+00> : vector<8x8xf32>
    %540 = tpu.matmul %538, %539, %cst_202 {dimension_numbers = #tpu.dot_dimension_numbers<[1], [0], [0], [1], [0, 0, 1, 1], [], []>} : vector<8x8xbf16>, vector<8x8xbf16>, vector<8x8xf32> -> vector<8x8xf32>
    %541 = vector.extract_strided_slice %451 {offsets = [8, 0], sizes = [8, 32], strides = [1, 1]} : vector<32x32xf32> to vector<8x32xf32>
    %542 = arith.truncf %540 : vector<8x8xf32> to vector<8x8xbf16>
    %543 = arith.truncf %541 : vector<8x32xf32> to vector<8x32xbf16>
    %cst_203 = arith.constant dense<0.000000e+00> : vector<8x32xf32>
    %544 = tpu.matmul %542, %543, %cst_203 {dimension_numbers = #tpu.dot_dimension_numbers<[1], [0], [0], [1], [0, 0, 1, 1], [], []>} : vector<8x8xbf16>, vector<8x32xbf16>, vector<8x32xf32> -> vector<8x32xf32>
    %545 = arith.addf %518, %544 : vector<8x32xf32>
    %546 = vector.extract_strided_slice %484 {offsets = [0, 16], sizes = [8, 8], strides = [1, 1]} : vector<8x32xf32> to vector<8x8xf32>
    %547 = vector.extract_strided_slice %487 {offsets = [0, 16], sizes = [8, 8], strides = [1, 1]} : vector<8x32xf32> to vector<8x8xf32>
    %548 = vector.extract_strided_slice %490 {offsets = [0, 16], sizes = [8, 8], strides = [1, 1]} : vector<8x32xf32> to vector<8x8xf32>
    %549 = tpu.transpose %547, [1, 0] : vector<8x8xf32> -> vector<8x8xf32>
    %550 = arith.truncf %546 : vector<8x8xf32> to vector<8x8xbf16>
    %551 = arith.truncf %549 : vector<8x8xf32> to vector<8x8xbf16>
    %cst_204 = arith.constant dense<0.000000e+00> : vector<8x8xf32>
    %552 = tpu.matmul %550, %551, %cst_204 {dimension_numbers = #tpu.dot_dimension_numbers<[1], [0], [0], [1], [0, 0, 1, 1], [], []>} : vector<8x8xbf16>, vector<8x8xbf16>, vector<8x8xf32> -> vector<8x8xf32>
    %cst_205 = arith.constant 0.353553385 : f32
    %553 = vector.broadcast %cst_205 : f32 to vector<8x8xf32>
    %554 = arith.mulf %552, %553 : vector<8x8xf32>
    %cst_206 = arith.constant dense<0xFF800000> : vector<8xf32>
    %555 = vector.multi_reduction <maximumf>, %554, %cst_206 [1] : vector<8x8xf32> to vector<8xf32>
    %556 = vector.shape_cast %555 : vector<8xf32> to vector<8x1xf32>
    %557 = vector.broadcast %556 : vector<8x1xf32> to vector<8x8xf32>
    %558 = arith.subf %554, %557 : vector<8x8xf32>
    %559 = math.exp %558 : vector<8x8xf32>
    %cst_207 = arith.constant dense<0.000000e+00> : vector<8xf32>
    %560 = vector.multi_reduction <add>, %559, %cst_207 [1] : vector<8x8xf32> to vector<8xf32>
    %561 = vector.shape_cast %560 : vector<8xf32> to vector<8x1xf32>
    %562 = tpu.reciprocal %561 {approx = true} : vector<8x1xf32> -> vector<8x1xf32>
    %563 = vector.broadcast %562 : vector<8x1xf32> to vector<8x8xf32>
    %564 = arith.mulf %559, %563 : vector<8x8xf32>
    %565 = arith.truncf %564 : vector<8x8xf32> to vector<8x8xbf16>
    %566 = arith.truncf %548 : vector<8x8xf32> to vector<8x8xbf16>
    %cst_208 = arith.constant dense<0.000000e+00> : vector<8x8xf32>
    %567 = tpu.matmul %565, %566, %cst_208 {dimension_numbers = #tpu.dot_dimension_numbers<[1], [0], [0], [1], [0, 0, 1, 1], [], []>} : vector<8x8xbf16>, vector<8x8xbf16>, vector<8x8xf32> -> vector<8x8xf32>
    %568 = vector.extract_strided_slice %451 {offsets = [16, 0], sizes = [8, 32], strides = [1, 1]} : vector<32x32xf32> to vector<8x32xf32>
    %569 = arith.truncf %567 : vector<8x8xf32> to vector<8x8xbf16>
    %570 = arith.truncf %568 : vector<8x32xf32> to vector<8x32xbf16>
    %cst_209 = arith.constant dense<0.000000e+00> : vector<8x32xf32>
    %571 = tpu.matmul %569, %570, %cst_209 {dimension_numbers = #tpu.dot_dimension_numbers<[1], [0], [0], [1], [0, 0, 1, 1], [], []>} : vector<8x8xbf16>, vector<8x32xbf16>, vector<8x32xf32> -> vector<8x32xf32>
    %572 = arith.addf %545, %571 : vector<8x32xf32>
    %573 = vector.extract_strided_slice %484 {offsets = [0, 24], sizes = [8, 8], strides = [1, 1]} : vector<8x32xf32> to vector<8x8xf32>
    %574 = vector.extract_strided_slice %487 {offsets = [0, 24], sizes = [8, 8], strides = [1, 1]} : vector<8x32xf32> to vector<8x8xf32>
    %575 = vector.extract_strided_slice %490 {offsets = [0, 24], sizes = [8, 8], strides = [1, 1]} : vector<8x32xf32> to vector<8x8xf32>
    %576 = tpu.transpose %574, [1, 0] : vector<8x8xf32> -> vector<8x8xf32>
    %577 = arith.truncf %573 : vector<8x8xf32> to vector<8x8xbf16>
    %578 = arith.truncf %576 : vector<8x8xf32> to vector<8x8xbf16>
    %cst_210 = arith.constant dense<0.000000e+00> : vector<8x8xf32>
    %579 = tpu.matmul %577, %578, %cst_210 {dimension_numbers = #tpu.dot_dimension_numbers<[1], [0], [0], [1], [0, 0, 1, 1], [], []>} : vector<8x8xbf16>, vector<8x8xbf16>, vector<8x8xf32> -> vector<8x8xf32>
    %cst_211 = arith.constant 0.353553385 : f32
    %580 = vector.broadcast %cst_211 : f32 to vector<8x8xf32>
    %581 = arith.mulf %579, %580 : vector<8x8xf32>
    %cst_212 = arith.constant dense<0xFF800000> : vector<8xf32>
    %582 = vector.multi_reduction <maximumf>, %581, %cst_212 [1] : vector<8x8xf32> to vector<8xf32>
    %583 = vector.shape_cast %582 : vector<8xf32> to vector<8x1xf32>
    %584 = vector.broadcast %583 : vector<8x1xf32> to vector<8x8xf32>
    %585 = arith.subf %581, %584 : vector<8x8xf32>
    %586 = math.exp %585 : vector<8x8xf32>
    %cst_213 = arith.constant dense<0.000000e+00> : vector<8xf32>
    %587 = vector.multi_reduction <add>, %586, %cst_213 [1] : vector<8x8xf32> to vector<8xf32>
    %588 = vector.shape_cast %587 : vector<8xf32> to vector<8x1xf32>
    %589 = tpu.reciprocal %588 {approx = true} : vector<8x1xf32> -> vector<8x1xf32>
    %590 = vector.broadcast %589 : vector<8x1xf32> to vector<8x8xf32>
    %591 = arith.mulf %586, %590 : vector<8x8xf32>
    %592 = arith.truncf %591 : vector<8x8xf32> to vector<8x8xbf16>
    %593 = arith.truncf %575 : vector<8x8xf32> to vector<8x8xbf16>
    %cst_214 = arith.constant dense<0.000000e+00> : vector<8x8xf32>
    %594 = tpu.matmul %592, %593, %cst_214 {dimension_numbers = #tpu.dot_dimension_numbers<[1], [0], [0], [1], [0, 0, 1, 1], [], []>} : vector<8x8xbf16>, vector<8x8xbf16>, vector<8x8xf32> -> vector<8x8xf32>
    %595 = vector.extract_strided_slice %451 {offsets = [24, 0], sizes = [8, 32], strides = [1, 1]} : vector<32x32xf32> to vector<8x32xf32>
    %596 = arith.truncf %594 : vector<8x8xf32> to vector<8x8xbf16>
    %597 = arith.truncf %595 : vector<8x32xf32> to vector<8x32xbf16>
    %cst_215 = arith.constant dense<0.000000e+00> : vector<8x32xf32>
    %598 = tpu.matmul %596, %597, %cst_215 {dimension_numbers = #tpu.dot_dimension_numbers<[1], [0], [0], [1], [0, 0, 1, 1], [], []>} : vector<8x8xbf16>, vector<8x32xbf16>, vector<8x32xf32> -> vector<8x32xf32>
    %599 = arith.addf %572, %598 : vector<8x32xf32>
    %600 = arith.addf %443, %599 : vector<8x32xf32>
    %c2_216 = arith.constant 2 : index
    %c0_217 = arith.constant 0 : index
    %c0_218 = arith.constant 0 : index
    %601 = vector.load %arg16[%c2_216, %c0_217, %c0_218] : memref<3x1x32xf32, #tpu.memory_space<vmem>>, vector<1x1x32xf32>
    %602 = vector.shape_cast %601 : vector<1x1x32xf32> to vector<1x32xf32>
    %c2_219 = arith.constant 2 : index
    %c0_220 = arith.constant 0 : index
    %c0_221 = arith.constant 0 : index
    %603 = vector.load %arg17[%c2_219, %c0_220, %c0_221] : memref<3x1x32xf32, #tpu.memory_space<vmem>>, vector<1x1x32xf32>
    %604 = vector.shape_cast %603 : vector<1x1x32xf32> to vector<1x32xf32>
    %605 = vector.shape_cast %600 : vector<8x32xf32> to vector<1x8x32xf32>
    %cst_222 = arith.constant dense<0.000000e+00> : vector<1x32xf32>
    %606 = vector.multi_reduction <add>, %605, %cst_222 [1] : vector<1x8x32xf32> to vector<1x32xf32>
    %607 = vector.shape_cast %606 : vector<1x32xf32> to vector<1x1x32xf32>
    %cst_223 = arith.constant 8.000000e+00 : f32
    %608 = vector.broadcast %cst_223 : f32 to vector<1x1x32xf32>
    %609 = arith.divf %607, %608 : vector<1x1x32xf32>
    %610 = vector.broadcast %609 : vector<1x1x32xf32> to vector<1x8x32xf32>
    %611 = arith.subf %605, %610 : vector<1x8x32xf32>
    %612 = arith.mulf %611, %611 : vector<1x8x32xf32>
    %cst_224 = arith.constant dense<0.000000e+00> : vector<1x32xf32>
    %613 = vector.multi_reduction <add>, %612, %cst_224 [1] : vector<1x8x32xf32> to vector<1x32xf32>
    %614 = vector.shape_cast %613 : vector<1x32xf32> to vector<1x1x32xf32>
    %cst_225 = arith.constant 8.000000e+00 : f32
    %615 = vector.broadcast %cst_225 : f32 to vector<1x1x32xf32>
    %616 = arith.divf %614, %615 : vector<1x1x32xf32>
    %617 = vector.broadcast %609 : vector<1x1x32xf32> to vector<1x8x32xf32>
    %618 = arith.subf %605, %617 : vector<1x8x32xf32>
    %cst_226 = arith.constant 9.99999974E-6 : f32
    %619 = vector.broadcast %cst_226 : f32 to vector<1x1x32xf32>
    %620 = arith.addf %616, %619 : vector<1x1x32xf32>
    %621 = math.rsqrt %620 : vector<1x1x32xf32>
    %622 = vector.broadcast %621 : vector<1x1x32xf32> to vector<1x8x32xf32>
    %623 = arith.mulf %618, %622 : vector<1x8x32xf32>
    %624 = vector.shape_cast %602 : vector<1x32xf32> to vector<1x1x32xf32>
    %625 = vector.broadcast %624 : vector<1x1x32xf32> to vector<1x8x32xf32>
    %626 = arith.mulf %623, %625 : vector<1x8x32xf32>
    %627 = vector.shape_cast %604 : vector<1x32xf32> to vector<1x1x32xf32>
    %628 = vector.broadcast %627 : vector<1x1x32xf32> to vector<1x8x32xf32>
    %629 = arith.addf %626, %628 : vector<1x8x32xf32>
    %630 = vector.shape_cast %629 : vector<1x8x32xf32> to vector<8x32xf32>
    %c2_227 = arith.constant 2 : index
    %c0_228 = arith.constant 0 : index
    %c0_229 = arith.constant 0 : index
    %631 = vector.load %arg12[%c2_227, %c0_228, %c0_229] : memref<3x32x64xf32, #tpu.memory_space<vmem>>, vector<1x32x64xf32>
    %632 = vector.shape_cast %631 : vector<1x32x64xf32> to vector<32x64xf32>
    %633 = arith.truncf %630 : vector<8x32xf32> to vector<8x32xbf16>
    %634 = arith.truncf %632 : vector<32x64xf32> to vector<32x64xbf16>
    %cst_230 = arith.constant dense<0.000000e+00> : vector<8x64xf32>
    %635 = tpu.matmul %633, %634, %cst_230 {dimension_numbers = #tpu.dot_dimension_numbers<[1], [0], [0], [1], [0, 0, 1, 1], [], []>} : vector<8x32xbf16>, vector<32x64xbf16>, vector<8x64xf32> -> vector<8x64xf32>
    %c2_231 = arith.constant 2 : index
    %c0_232 = arith.constant 0 : index
    %c0_233 = arith.constant 0 : index
    %636 = vector.load %arg13[%c2_231, %c0_232, %c0_233] : memref<3x1x64xf32, #tpu.memory_space<vmem>>, vector<1x1x64xf32>
    %637 = vector.shape_cast %636 : vector<1x1x64xf32> to vector<1x64xf32>
    %638 = vector.broadcast %637 : vector<1x64xf32> to vector<8x64xf32>
    %639 = arith.addf %635, %638 : vector<8x64xf32>
    %cst_234 = arith.constant 0.000000e+00 : f32
    %640 = vector.broadcast %cst_234 : f32 to vector<8x64xf32>
    %641 = arith.maximumf %639, %640 : vector<8x64xf32>
    %c2_235 = arith.constant 2 : index
    %c0_236 = arith.constant 0 : index
    %c0_237 = arith.constant 0 : index
    %642 = vector.load %arg14[%c2_235, %c0_236, %c0_237] : memref<3x64x32xf32, #tpu.memory_space<vmem>>, vector<1x64x32xf32>
    %643 = vector.shape_cast %642 : vector<1x64x32xf32> to vector<64x32xf32>
    %644 = arith.truncf %641 : vector<8x64xf32> to vector<8x64xbf16>
    %645 = arith.truncf %643 : vector<64x32xf32> to vector<64x32xbf16>
    %cst_238 = arith.constant dense<0.000000e+00> : vector<8x32xf32>
    %646 = tpu.matmul %644, %645, %cst_238 {dimension_numbers = #tpu.dot_dimension_numbers<[1], [0], [0], [1], [0, 0, 1, 1], [], []>} : vector<8x64xbf16>, vector<64x32xbf16>, vector<8x32xf32> -> vector<8x32xf32>
    %c2_239 = arith.constant 2 : index
    %c0_240 = arith.constant 0 : index
    %c0_241 = arith.constant 0 : index
    %647 = vector.load %arg15[%c2_239, %c0_240, %c0_241] : memref<3x1x32xf32, #tpu.memory_space<vmem>>, vector<1x1x32xf32>
    %648 = vector.shape_cast %647 : vector<1x1x32xf32> to vector<1x32xf32>
    %649 = vector.broadcast %648 : vector<1x32xf32> to vector<8x32xf32>
    %650 = arith.addf %646, %649 : vector<8x32xf32>
    %651 = arith.addf %600, %650 : vector<8x32xf32>
    %652 = vector.shape_cast %651 : vector<8x32xf32> to vector<1x8x32xf32>
    %c0_242 = arith.constant 0 : index
    %c0_243 = arith.constant 0 : index
    %c0_244 = arith.constant 0 : index
    %653 = vector.load %arg18[%c0_242, %c0_243, %c0_244] : memref<1x8x32xf32, #tpu.memory_space<vmem>>, vector<1x8x32xf32>
    tpu.vector_store %arg18[%c0_242, %c0_243, %c0_244], %652 {strides = array<i32>} : memref<1x8x32xf32, #tpu.memory_space<vmem>>, vector<1x8x32xf32>,
    return
  }
  func.func @transform_0(%arg0: i32) -> (i32, i32, i32) {
    %c0_i32 = arith.constant 0 : i32
    %c0_i32_0 = arith.constant 0 : i32
    %c0_i32_1 = arith.constant 0 : i32
    return %arg0, %c0_i32, %c0_i32_0 : i32, i32, i32
  }
  func.func @transform_1(%arg0: i32) -> (i32, i32, i32) {
    %c0_i32 = arith.constant 0 : i32
    %c0_i32_0 = arith.constant 0 : i32
    %c0_i32_1 = arith.constant 0 : i32
    return %arg0, %c0_i32, %c0_i32_0 : i32, i32, i32
  }
  func.func @transform_2(%arg0: i32) -> (i32, i32) {
    %c0_i32 = arith.constant 0 : i32
    %c0_i32_0 = arith.constant 0 : i32
    %c0_i32_1 = arith.constant 0 : i32
    return %c0_i32, %c0_i32_0 : i32, i32
  }
  func.func @transform_3(%arg0: i32) -> (i32, i32) {
    %c0_i32 = arith.constant 0 : i32
    %c0_i32_0 = arith.constant 0 : i32
    %c0_i32_1 = arith.constant 0 : i32
    return %c0_i32, %c0_i32_0 : i32, i32
  }
  func.func @transform_4(%arg0: i32) -> (i32, i32) {
    %c0_i32 = arith.constant 0 : i32
    %c0_i32_0 = arith.constant 0 : i32
    %c0_i32_1 = arith.constant 0 : i32
    return %c0_i32, %c0_i32_0 : i32, i32
  }
  func.func @transform_5(%arg0: i32) -> (i32, i32, i32) {
    %c0_i32 = arith.constant 0 : i32
    %c0_i32_0 = arith.constant 0 : i32
    %c0_i32_1 = arith.constant 0 : i32
    %c0_i32_2 = arith.constant 0 : i32
    return %c0_i32, %c0_i32_0, %c0_i32_1 : i32, i32, i32
  }
  func.func @transform_6(%arg0: i32) -> (i32, i32, i32) {
    %c0_i32 = arith.constant 0 : i32
    %c0_i32_0 = arith.constant 0 : i32
    %c0_i32_1 = arith.constant 0 : i32
    %c0_i32_2 = arith.constant 0 : i32
    return %c0_i32, %c0_i32_0, %c0_i32_1 : i32, i32, i32
  }
  func.func @transform_7(%arg0: i32) -> (i32, i32, i32) {
    %c0_i32 = arith.constant 0 : i32
    %c0_i32_0 = arith.constant 0 : i32
    %c0_i32_1 = arith.constant 0 : i32
    %c0_i32_2 = arith.constant 0 : i32
    return %c0_i32, %c0_i32_0, %c0_i32_1 : i32, i32, i32
  }
  func.func @transform_8(%arg0: i32) -> (i32, i32, i32) {
    %c0_i32 = arith.constant 0 : i32
    %c0_i32_0 = arith.constant 0 : i32
    %c0_i32_1 = arith.constant 0 : i32
    %c0_i32_2 = arith.constant 0 : i32
    return %c0_i32, %c0_i32_0, %c0_i32_1 : i32, i32, i32
  }
  func.func @transform_9(%arg0: i32) -> (i32, i32, i32) {
    %c0_i32 = arith.constant 0 : i32
    %c0_i32_0 = arith.constant 0 : i32
    %c0_i32_1 = arith.constant 0 : i32
    %c0_i32_2 = arith.constant 0 : i32
    return %c0_i32, %c0_i32_0, %c0_i32_1 : i32, i32, i32
  }
  func.func @transform_10(%arg0: i32) -> (i32, i32, i32) {
    %c0_i32 = arith.constant 0 : i32
    %c0_i32_0 = arith.constant 0 : i32
    %c0_i32_1 = arith.constant 0 : i32
    %c0_i32_2 = arith.constant 0 : i32
    return %c0_i32, %c0_i32_0, %c0_i32_1 : i32, i32, i32
  }
  func.func @transform_11(%arg0: i32) -> (i32, i32, i32) {
    %c0_i32 = arith.constant 0 : i32
    %c0_i32_0 = arith.constant 0 : i32
    %c0_i32_1 = arith.constant 0 : i32
    %c0_i32_2 = arith.constant 0 : i32
    return %c0_i32, %c0_i32_0, %c0_i32_1 : i32, i32, i32
  }
  func.func @transform_12(%arg0: i32) -> (i32, i32, i32) {
    %c0_i32 = arith.constant 0 : i32
    %c0_i32_0 = arith.constant 0 : i32
    %c0_i32_1 = arith.constant 0 : i32
    %c0_i32_2 = arith.constant 0 : i32
    return %c0_i32, %c0_i32_0, %c0_i32_1 : i32, i32, i32
  }
  func.func @transform_13(%arg0: i32) -> (i32, i32, i32) {
    %c0_i32 = arith.constant 0 : i32
    %c0_i32_0 = arith.constant 0 : i32
    %c0_i32_1 = arith.constant 0 : i32
    %c0_i32_2 = arith.constant 0 : i32
    return %c0_i32, %c0_i32_0, %c0_i32_1 : i32, i32, i32
  }
  func.func @transform_14(%arg0: i32) -> (i32, i32, i32) {
    %c0_i32 = arith.constant 0 : i32
    %c0_i32_0 = arith.constant 0 : i32
    %c0_i32_1 = arith.constant 0 : i32
    %c0_i32_2 = arith.constant 0 : i32
    return %c0_i32, %c0_i32_0, %c0_i32_1 : i32, i32, i32
  }
  func.func @transform_15(%arg0: i32) -> (i32, i32, i32) {
    %c0_i32 = arith.constant 0 : i32
    %c0_i32_0 = arith.constant 0 : i32
    %c0_i32_1 = arith.constant 0 : i32
    %c0_i32_2 = arith.constant 0 : i32
    return %c0_i32, %c0_i32_0, %c0_i32_1 : i32, i32, i32
  }
  func.func @transform_16(%arg0: i32) -> (i32, i32, i32) {
    %c0_i32 = arith.constant 0 : i32
    %c0_i32_0 = arith.constant 0 : i32
    %c0_i32_1 = arith.constant 0 : i32
    %c0_i32_2 = arith.constant 0 : i32
    return %c0_i32, %c0_i32_0, %c0_i32_1 : i32, i32, i32
  }
  func.func @transform_17(%arg0: i32) -> (i32, i32, i32) {
    %c0_i32 = arith.constant 0 : i32
    %c0_i32_0 = arith.constant 0 : i32
    %c0_i32_1 = arith.constant 0 : i32
    return %arg0, %c0_i32, %c0_i32_0 : i32, i32, i32
  }
  func.func @transform_18(%arg0: i32) -> (i32, i32, i32) {
    %c0_i32 = arith.constant 0 : i32
    %c0_i32_0 = arith.constant 0 : i32
    %c0_i32_1 = arith.constant 0 : i32
    return %arg0, %c0_i32, %c0_i32_0 : i32, i32, i32
  }
}

</mosaic_0001>

<bundles_post_ra>
// kernel: tpu_custom_call.1
= control target key start
LH: loop header
LB: loop body
LE: loop exit
PB: predicated region body
PF: predicated region fallthrough
CT: control target
= control target key end

     0   :  { %s6106_s0 = inlined_call_operand.vmem [shape: f32[2,8,2], index: 0, kind: input, shape index: {}]   ;;  %s6107_s1 = inlined_call_operand.vmem [shape: f32[2,8,1], index: 1, kind: input, shape index: {}]   ;;  %s6108_s2 = inlined_call_operand.vmem [shape: f32[2,32], index: 2, kind: input, shape index: {}]   ;;  %s6109_s3 = inlined_call_operand.vmem [shape: f32[1,32], index: 3, kind: input, shape index: {}]   ;;  %s6110_s4 = inlined_call_operand.vmem [shape: f32[1,32], index: 4, kind: input, shape index: {}]   ;;  %s6111_s5 = inlined_call_operand.vmem [shape: f32[3,32,32], index: 5, kind: input, shape index: {}]   ;;  %s6112_s6 = inlined_call_operand.vmem [shape: f32[3,32,32], index: 6, kind: input, shape index: {}]   ;;  %s6113_s7 = inlined_call_operand.vmem [shape: f32[3,32,32], index: 7, kind: input, shape index: {}]   ;;  %s6114_s8 = inlined_call_operand.hbm [shape: f32[3,32,32], index: 8, kind: input, shape index: {}]   ;;  %s6115_s9 = inlined_call_operand.vmem [shape: f32[3,1,32], index: 9, kind: input, shape index: {}]   ;;  %s6116_s10 = inlined_call_operand.vmem [shape: f32[3,1,32], index: 10, kind: input, shape index: {}]   ;;  %s6117_s11 = inlined_call_operand.hbm [shape: f32[3,32,64], index: 11, kind: input, shape index: {}]   ;;  %s6118_s12 = inlined_call_operand.vmem [shape: f32[3,1,64], index: 12, kind: input, shape index: {}]   ;;  %s6119_s13 = inlined_call_operand.vmem [shape: f32[3,64,32], index: 13, kind: input, shape index: {}]   ;;  %s6120_s14 = inlined_call_operand.vmem [shape: f32[3,1,32], index: 14, kind: input, shape index: {}]   ;;  %s6121_s15 = inlined_call_operand.vmem [shape: f32[3,1,32], index: 15, kind: input, shape index: {}]   ;;  %s6122_s16 = inlined_call_operand.vmem [shape: f32[3,1,32], index: 16, kind: input, shape index: {}]   ;;  %s6123_s17 = inlined_call_operand.hbm [shape: f32[2,8,32], index: 17, kind: output, shape index: {0}]   ;;  %s6124_s18 = inlined_call_operand.hbm [shape: f32[2,8,32], index: 18, kind: output, shape index: {1}]  }
   0x1   :  { %6139 = sst [smem:[#allocation21_spill]] %s6106_s0 }
   0x2   :  { %6140 = sst [smem:[#allocation22_spill]] %s6107_s1 }
   0x3   :  { %6141 = sst [smem:[#allocation23_spill]] %s6108_s2 }
   0x4   :  { %6142 = sst [smem:[#allocation24_spill]] %s6123_s17 }
   0x5   :  { %6143 = sst [smem:[#allocation25_spill]] %s6124_s18 }
   0x6   :  { %24 = vsyncpa [#allocation3], 0 }
   0x7   :  { %25 = vsyncpa [#allocation6], 0 }
   0x8   :  { %26 = vsyncpa [#allocation4], 0 }
   0x9   :  { %28 = vsyncpa [#allocation4 + $0x1], 0 }
   0xa   :  { %29 = vsyncpa [#allocation9], 0 }
   0xb   :  { %31 = vsyncpa [#allocation9 + $0x1], 0  ;;  %s5226_s27 = smov 0   ;;  %s5228_s28 = smov 0  }
   0xc   :  { %s5230_s29 = smov 0   ;;  %s5232_s30 = smov 0  }
   0xd LB: > { %6144 = sst [smem:[#allocation14_spill]] %s5104_s27  ;;  %s5247_s0 = sadd.s32 4294967295, %s5116_s30   ;;  %s5116_s30 = sphi %s5232_s30, %s6173_s30   ;;  %s5112_s29 = sphi %s5230_s29, %s6175_s29   ;;  %s5108_s28 = sphi %s5228_s28, %s6177_s28   ;;  %s5104_s27 = sphi %s5226_s27, %s6176_s27  }
   0xe   : > { %6145 = sst [smem:[#allocation15_spill]] %s5112_s29  ;;  %s4208_s19 = sadd.s32 4294967294, %s5116_s30  }
   0xf   : > { %6146 = sst [smem:[#allocation16_spill]] %s5116_s30  ;;  %s5251_s1 = sadd.s32 1, %s5116_s30  }
  0x10   : > { %6147 = sst [smem:[#allocation17_spill]] %s5251_s1  ;;  %s411_s20 = sadd.s32 1, %s5112_s29 }
  0x11   : > { %s408_s21 = ssub.s32 %s5116_s30, %s5251_s1  ;;  %p421_p0 = scmp.ne.s32.totalorder %s5112_s29, %s5108_s28 }
  0x12   : > { %p409_p1 = scmp.eq.s32.totalorder %s408_s21, 0  ;;  %p422_p2 = scmp.eq.s32.totalorder %s5247_s0, 1 }
  0x13   : > { %p427_p3 = scmp.ne.s32.totalorder %s5108_s28, %s5104_s27  ;;  %p428_p4 = scmp.eq.s32.totalorder %s4208_s19, 1 }
  0x14   : > { %s5262_s22 = scalar_select %p409_p1, %s5112_s29, %s411_s20  }
  0x15   : > { %p5264_p5 = por %p422_p2, %p421_p0  ;;  %p5268_p6 = por %p428_p4, %p427_p3 }
  0x16   : > { %6148 = sst [smem:[#allocation18_spill]] %s5262_s22  ;;  %p4209_p7 = scmp.ge.s32.totalorder %s5116_s30, 1 }
  0x17   : > { %s6149_s2 = scalar_select %p5264_p5, 1, 0 }
  0x18   : > { %s6151_s23 = scalar_select %p5268_p6, 1, 0 }
  0x19   : > { %6150 = sst [smem:[#allocation19_spill]] %s6149_s2  ;;  %p461_p8 = scmp.lt.s32.totalorder %s5116_s30, 3 }
  0x1a   : > { %6152 = sst [smem:[#allocation20_spill]] %s6151_s23  ;;  %p6131_p9 = scmp.eq.s32.totalorder %s5247_s0, 0 }
  0x1b   : > { %p5275_p10 = pnand %p4209_p7, %p461_p8  ;;  %s5118_s25 = smov [#allocation2]  }
  0x1c   : > { %s491_s26 = sshll.u32 %s5118_s25, 4  ;;  %s5119_s20 = smov [#allocation5]   ;;  %s492_s26 = int_to_ptr.vmem [resolvable:$true] %s491_s26 }
  0x1d   : > { %s6153_s24 = scalar_select %p5275_p10, 1, 0 }
  0x1e   : > { %p4832_p11 = pneg %p5275_p10  ;;  %s510_s21 = sshll.u32 %s5119_s20, 4  ;;  %s5287_s21 = int_to_ptr.vmem [resolvable:$true] %s510_s21 }
  0x1f   : > { %s4958_s1 = scalar_lea.hbm %s6114_s8, 1536 }
  0x20   : > { %p5283_p12 = pnand %p6131_p9, %p4832_p11  ;;  %p4959_p13 = scmp.ne.s32.totalorder %s6114_s8, %s4958_s1 }
  0x21   : > { %p4965_p3 = scmp.lt.u32.totalorder %s4958_s1, %s6114_s8 }
  0x22   : > { %p4960_p0 = pneg %p5283_p12 }
  0x24   : > { %p4961_p1 = pnand %p4960_p0, %p4959_p13 }
  0x26   : > { %p4962_p2 = pneg %p4961_p1 }
  0x28   : > { %p4967_p4 = pnand %p4965_p3, %p4962_p2 }
  0x2a   : > { %4970 = shalt.err (!%p4967_p4)
}
  0x2b   : > { %s4971_s20 = scalar_lea.vmem %s492_s26, 1536  ;;  %p4979_p9 = scmp.lt.s32.totalorder %s492_s26, %s492_s26 }
  0x2c   : > { %p4972_p7 = scmp.ne.s32.totalorder %s492_s26, %s4971_s20  ;;  %p4980_p6 = scmp.lt.s32.totalorder %s4971_s20, %s4971_s20 }
  0x2e   : > { %p4974_p8 = pnand %p4972_p7, %p4960_p0  ;;  %p4981_p5 = por %p4980_p6, %p4979_p9 }
  0x30   : > { %p4975_p11 = pneg %p4974_p8 }
  0x32   : > { %p4982_p10 = pnand %p4981_p5, %p4975_p11 }
  0x34   : > { %4985 = shalt.err (!%p4982_p10)
}
  0x35   : > { %s5120_s29 = smov 128   ;;  %s5121_s22 = smov 8  }
  0x36   : > { %4835 = dma.hbm_to_vmem [thread:$0]  (!%p5283_p12), %s6114_s8, 1536, %s492_s26, [#allocation3], %s5120_s29, %s5120_s29, %s5121_s22  }
  0x37   : > { %s4986_s25 = scalar_lea.hbm %s6117_s11, 1536 }
  0x38   : > { %p4987_p13 = scmp.ne.s32.totalorder %s6117_s11, %s4986_s25  ;;  %p4993_p9 = scmp.lt.u32.totalorder %s4986_s25, %s6117_s11 }
  0x3a   : > { %p4989_p5 = pnand %p4987_p13, %p4960_p0 }
  0x3c   : > { %p4990_p6 = pneg %p4989_p5 }
  0x3e   : > { %p4995_p10 = pnand %p4993_p9, %p4990_p6 }
  0x40   : > { %4998 = shalt.err (!%p4995_p10)
}
  0x41   : > { %s4999_s26 = scalar_lea.vmem %s5287_s21, 1536  ;;  %p5007_p4 = scmp.lt.s32.totalorder %s5287_s21, %s5287_s21 }
  0x42   : > { %p5000_p1 = scmp.ne.s32.totalorder %s5287_s21, %s4999_s26  ;;  %p5008_p7 = scmp.lt.s32.totalorder %s4999_s26, %s4999_s26 }
  0x44   : > { %p5002_p2 = pnand %p5000_p1, %p4960_p0  ;;  %p5009_p8 = por %p5008_p7, %p5007_p4 }
  0x46   : > { %p5003_p3 = pneg %p5002_p2 }
  0x48   : > { %p5010_p11 = pnand %p5009_p8, %p5003_p3 }
  0x4a   : > { %5013 = shalt.err (!%p5010_p11)
}
  0x4b   : > { %4838 = dma.hbm_to_vmem [thread:$0]  (!%p5283_p12), %s6117_s11, 1536, %s5287_s21, [#allocation6], %s5120_s29, %s5120_s29, %s5121_s22  }
  0x4c   : > { %p6155_p13 = scmp.ne.s32.totalorder %s6153_s24, 0 }
  0x4d   : > { %p6156_p5 = scmp.eq.s32.totalorder (!%p6155_p13), %s5247_s0, 0 }
  0x4e   : > { %555 = sbr.rel (%p6155_p13) target bundleno = 10067 (0x2753), region = 88 }
  0x55   : > { %5087 = dma.done.wait (%p6156_p5), [#allocation3], 1536   ;;  %p6157_p0 = pmov %p6156_p5 }
  0x57   : > { %5089 = vsyncadd (%p6157_p0), [#allocation3], 4294965760  ;;  %p6158_p6 = pmov %p6157_p0 }
  0x58   : > { %p6159_p9 = pmov %p6157_p0 }
  0x59   : > { %5091 = dma.done.wait (%p6158_p6), [#allocation6], 1536  }
  0x5a   : > { %5093 = vsyncadd (%p6159_p9), [#allocation6], 4294965760  ;;  %p621_p10 = scmp.lt.s32.totalorder %s5247_s0, 1  ;;  %v5122_v0 = vmov 0   ;;  %s6160_s29 = sld [smem:[#allocation21_spill]]  ;;  %v5123_v3 = vmov 1   ;;  %v638_v17 = vlaneseq }
  0x5b   : > { %4894 = vset.pattern.permute.xlu0 %v5122_v0  ;;  %4896 = vset.pattern.permute.xlu1 %v5122_v0  ;;  %s6161_s1 = sld [smem:[#allocation22_spill]]  ;;  %v677_v4 = vld [vmem:[%s6111_s5] sm:$0xff]  ;;  %v678_v5 = vld [vmem:[%s6111_s5 + $0x8] sm:$0xff]  ;;  %v5124_v7 = vmov 0.0   ;;  %v679_v10 = vld [vmem:[%s6111_s5 + $0x10] sm:$0xff]  ;;  %vm5125_vm0 = vmmov 0  }
  0x5c   : > { %s622_s2 = scalar_select %p621_p10, %s5247_s0, 1  ;;  %v685_v6 = vld [vmem:[%s6113_s7] sm:$0xff]  ;;  %4472 = vmatprep.subr.bf16.mxu1 %v5124_v7  ;;  %4488 = vmatprep.subr.bf16.mxu0 %v5124_v7  ;;  %v732_v8 = vpack.c.bf16 %v678_v5, %v677_v4  ;;  %v686_v9 = vld [vmem:[%s6113_s7 + $0x8] sm:$0xff]  ;;  %v680_v11 = vld [vmem:[%s6111_s5 + $0x18] sm:$0xff]  ;;  %v639_v18 = vshrl.u32 %v638_v17, 7  ;;  %vm675_vm1 = vcmask 261120  }
  0x5d   : > { %v819_v12 = vpack.c.bf16 %v686_v9, %v685_v6  ;;  %v687_v13 = vld [vmem:[%s6113_s7 + $0x10] sm:$0xff]  ;;  %v688_v14 = vld [vmem:[%s6113_s7 + $0x18] sm:$0xff]  ;;  %4476 = vmatprep.mubr.msk.bf16.mxu1 %vm5125_vm0, %v5124_v7  ;;  %4492 = vmatprep.mubr.msk.bf16.mxu0 %vm5125_vm0, %v5124_v7  ;;  %v733_v15 = vpack.c.bf16 %v680_v11, %v679_v10  ;;  %s6162_s17 = sld [smem:[#allocation23_spill]]  ;;  %v4220_v25 = vld [vmem:[%s6109_s3] ss:$0 sm:$0xff]  ;;  %vm899_vm2 = vcmask 1043456  }
  0x5e   : > { %s4218_s24 = sshll.u32 %s622_s2, 3  ;;  %4473 = vmatpush3.bf16.msra.mxu1 %v732_v8  ;;  %v820_v16 = vpack.c.bf16 %v688_v14, %v687_v13  ;;  %v640_v19 = vsub.s32 0, %v639_v18  ;;  %v649_v20 = vsub.s32 1, %v639_v18  ;;  %v4221_v32 = vld [vmem:[%s6110_s4] ss:$0 sm:$0xff]  ;;  %v682_v60 = vld [vmem:[%s6112_s6 + $0x8] sm:$0xff] }
  0x5f   : > { %4489 = vmatpush3.bf16.msra.mxu0 %v819_v12  ;;  %4474 = vmatprep.subr.bf16.mxu1 %v5124_v7  ;;  %v4222_v55 = vld [vmem:[%s6115_s9] ss:$0 sm:$0xff]  ;;  %s5126_s27 = smov 120   ;;  %vm895_vm3 = vcmask 64512   ;;  %s5127_s30 = smov 112   ;;  %vm1751_vm4 = vcmask 523264  }
  0x60   : > { %s624_s22 = scalar_lea.vmem %s6160_s29, %s4218_s24  ;;  %4490 = vmatprep.subr.bf16.mxu0 %v5124_v7  ;;  %v4223_v57 = vld [vmem:[%s6116_s10] ss:$0 sm:$0xff]  ;;  %s6163_s20 = sld [smem:[#allocation19_spill]] }
  0x61   : > { %s628_s23 = scalar_lea.vmem %s6161_s1, %s4218_s24  ;;  %v630_v1 = vld [vmem:[%s624_s22] sm:$0xff]  ;;  %s5397_s24 = sand.u32 1, %s5108_s28  }
  0x62   : > { %v631_v2 = vld [vmem:[%s628_s23] sm:$0xff]  ;;  %635 = vperm.xlu0 %4894, %v630_v1   ;;  %4475 = vmatpush3.bf16.msra.mxu1 %v733_v15  ;;  %s6138_s19 = sshll.u32 %s5397_s24, 3  ;;  %s5128_s1 = smov 104  }
  0x63   : > { %656 = vperm.xlu1 %4896, %v631_v2   ;;  %4491 = vmatpush3.bf16.msra.mxu0 %v820_v16  ;;  %v632_v21 = vld [vmem:[%s6162_s17] sm:$0x3]  ;;  %s5409_s22 = scalar_lea.vmem [#allocation8], %s6138_s19  ;;  %v684_v2 = vld [vmem:[%s6112_s6 + $0x18] sm:$0xff]  ;;  %s4345_s26 = sshll.u32 %s5247_s0, 7 }
  0x64   : > { %4480 = vmatprep.subr.bf16.mxu1 %v5124_v7  ;;  %4502 = vmatprep.subr.bf16.mxu0 %v5124_v7  ;;  %v641_v23 = vrot.slane %v632_v21, %v640_v19  ;;  %v650_v24 = vrot.slane %v632_v21, %v649_v20  ;;  %v681_v59 = vld [vmem:[%s6112_s6] sm:$0xff]  ;;  %s4083_s2 = sshll.u32 %s5409_s22, 4  ;;  %s4057_s21 = scalar_lea.sflag [#allocation9], %s5397_s24  ;;  %s4084_s2 = int_to_ptr.vmem [resolvable:$true] %s4083_s2 }
  0x65   : > { %v777_v62 = vpack.c.bf16 %v682_v60, %v681_v59  ;;  %v689_v59 = vld [vmem:[#allocation2] sm:$0xff]  ;;  %s5014_s29 = scalar_lea.vmem %s4084_s2, 128  ;;  %s5129_s23 = smov [#allocation8]  }
  0x66   : > { %4895 = vset.pattern.permute.xlu0 %v5123_v3  ;;  %v1004_v60 = vpack.c.bf16 %v689_v59, %v689_v59  ;;  %p5015_p12 = scmp.ne.s32.totalorder %s4084_s2, %s5014_s29  ;;  %p6166_p1 = scmp.ne.s32.totalorder %s6163_s20, 0 }
  0x67   : > { %644 = vperm.xlu0 %4895, %v630_v1   ;;  %v683_v1 = vld [vmem:[%s6112_s6 + $0x10] sm:$0xff]  ;;  %s5018_s19 = sshll.u32 %s5129_s23, 4  ;;  %s5019_s19 = int_to_ptr.vmem [resolvable:$false] %s5018_s19 }
  0x68   : > { %v778_v3 = vpack.c.bf16 %v684_v2, %v683_v1  ;;  %v1205_v1 = vsel %vm899_vm2, %v1004_v60, 0  ;;  %v690_v2 = vld [vmem:[#allocation2 + $0x8] sm:$0xff]  ;;  %p5016_p2 = pnand %p5015_p12, %p6166_p1  ;;  %s5020_s25 = scalar_lea.vmem %s5019_s19, 256 }
  0x69   : > { %p5021_p4 = scmp.lt.s32.totalorder %s4084_s2, %s5019_s19  ;;  %p5022_p7 = scmp.lt.s32.totalorder %s5020_s25, %s5014_s29 }
  0x6a   : > { %p5017_p3 = pneg %p5016_p2 }
  0x6b   : > { %p5023_p8 = por %p5022_p7, %p5021_p4 }
  0x6d   : > { %p5024_p11 = pnand %p5023_p8, %p5017_p3 }
  0xe1   : > { %v636_v22 = vpop.permute.xlu0 %635 }
  0xe2   : > { %v657_v26 = vpop.permute.xlu1 %656  ;;  %v642_v28 = vmul.f32 %v641_v23, %v636_v22 }
  0xe3   : > { %v665_v30 = vmul.f32 %v4220_v25, %v657_v26 }
  0xe6   : > { %v645_v27 = vpop.permute.xlu0 %644 }
  0xe7   : > { %v651_v29 = vmul.f32 %v650_v24, %v645_v27 }
  0xe9   : > { %v652_v31 = vadd.f32 %v651_v29, %v642_v28 }
  0xeb   : > { %v666_v33 = vadd.f32 %v665_v30, %v652_v31 }
  0xed   : > { %v5403_v34 = vadd.f32 %v4221_v32, %v666_v33 }
  0xef   : > { %v695_v35 = vsel %vm675_vm1, %v5403_v34, 0.0  ;;  %676 = vst.msk [vmem:[%s5409_s22] sm:$0xff] %vm675_vm1, %v5403_v34 }
  0xf0   : > { %v696_v36 = vrot.slane %v695_v35, 4 }
  0xf2   : > { %v697_v37 = vadd.f32 %v696_v36, %v695_v35 }
  0xf4   : > { %v698_v38 = vrot.slane %v697_v37, 2 }
  0xf6   : > { %v699_v39 = vadd.f32 %v698_v38, %v697_v37 }
  0xf8   : > { %v700_v40 = vrot.slane %v699_v39, 1 }
  0xfa   : > { %v701_v41 = vadd.f32 %v700_v40, %v699_v39 }
  0xfc   : > { %v703_v42 = vmul.f32 0.125, %v701_v41 }
  0xfe   : > { %v704_v43 = vsub.f32 %v5403_v34, %v703_v42 }
 0x100   : > { %v705_v44 = vmul.f32 %v704_v43, %v704_v43 }
 0x102   : > { %v706_v45 = vsel %vm675_vm1, %v705_v44, 0.0 }
 0x103   : > { %v707_v46 = vrot.slane %v706_v45, 4 }
 0x105   : > { %v708_v47 = vadd.f32 %v707_v46, %v706_v45 }
 0x107   : > { %v709_v48 = vrot.slane %v708_v47, 2 }
 0x109   : > { %v710_v49 = vadd.f32 %v709_v48, %v708_v47 }
 0x10b   : > { %v711_v50 = vrot.slane %v710_v49, 1 }
 0x10d   : > { %v712_v51 = vadd.f32 %v711_v50, %v710_v49 }
 0x10f   : > { %v713_v52 = vmul.f32 0.125, %v712_v51 }
 0x111   : > { %v714_v53 = vadd.f32 1e-05, %v713_v52 }
 0x113   : > { %4898 = vrsqrt.f32 %v714_v53 }
 0x11d   : > { %v4899_v54 = vpop.eup %4898 }
 0x11e   : > { %v716_v56 = vmul.f32 %v4899_v54, %v704_v43 }
 0x120   : > { %v723_v58 = vmul.f32 %v4222_v55, %v716_v56 }
 0x122   : > { %v730_v61 = vadd.f32 %v4223_v57, %v723_v58 }
 0x124   : > { %v731_v63 = vpack.c.bf16 %v730_v61, %v730_v61 }
 0x126   : > { %4477 = vmatmul.mubr.msk.bf16.vlgmr.msra.gmra.mrb[0].mxu1 %vm675_vm1, %v731_v63  ;;  %4493 = vmatmul.mubr.msk.bf16.vlgmr.msra.gmra.mrb[0].mxu0 %vm675_vm1, %v731_v63 }
 0x127   : > { %4481 = vmatpush3.bf16.msra.mxu1 %v777_v62  ;;  %4484 = vmatprep.mubr.msk.bf16.mxu1 %vm5125_vm0, %v5124_v7 }
 0x128   : > { %4482 = vmatprep.subr.bf16.mxu1 %v5124_v7  ;;  %4504 = vmatprep.mubr.msk.bf16.mxu0 %vm5125_vm0, %v5124_v7 }
 0x12b   : > { %4483 = vmatpush3.bf16.msra.mxu1 %v778_v3  ;;  %v1154_v3 = vpack.c.bf16 %v690_v2, %v690_v2 }
 0x12c   : > { %4496 = vmatprep.subr.bf16.mxu1 %v5124_v7 }
 0x12e   : > { %4485 = vmatmul.mubr.msk.bf16.vlgmr.msra.gmra.mrb[4].mxu1 %vm675_vm1, %v731_v63 }
 0x12f   : > { %4498 = vmatprep.mubr.msk.bf16.mxu1 %vm5125_vm0, %v5124_v7 }
 0x1f9   : > { %v771_v4 = vpop.f32.mrb[0].mxu1  ;;  %v855_v5 = vpop.f32.mrb[0].mxu0 }
 0x1fa   : > { %v5445_v6 = vpack.c.bf16 %v855_v5, %v855_v5  ;;  %v4478_v8 = vpop.f32.mrb[1].mxu1  ;;  %v4494_v9 = vpop.f32.mrb[1].mxu0  ;;  %v5455_v18 = vpack.c.bf16 %v771_v4, %v771_v4  ;;  %v1159_v4 = vsel %vm899_vm2, %v1154_v3, 0 }
 0x1fb   : > { %v774_v10 = vpop.f32.mrb[2].mxu1  ;;  %v858_v11 = vpop.f32.mrb[2].mxu0 }
 0x1fc   : > { %v4479_v12 = vpop.f32.mrb[3].mxu1  ;;  %v4495_v13 = vpop.f32.mrb[3].mxu0  ;;  %v961_v14 = vsel %vm899_vm2, %v5445_v6, 0 }
 0x1fd   : > { %4503 = vmatpush3.bf16.msra.mxu0 %v961_v14 }
 0x1fe   : > { %4514 = vmatprep.subr.bf16.mxu0 %v5124_v7 }
 0x201   : > { %v5450_v15 = vpop.f32.mrb[4].mxu1 }
 0x202   : > { %861 = vxpose.xlu0.b32.start.end [1/1] (short) (narrow) %v5450_v15, 8  ;;  %1006 = vrot.lane.b32.xlu1 %v5450_v15, %s5126_s27  ;;  %v4486_v16 = vpop.f32.mrb[5].mxu1 }
 0x203   : > { %v816_v17 = vpop.f32.mrb[6].mxu1 }
 0x204   : > { %v4487_v19 = vpop.f32.mrb[7].mxu1 }
 0x206   : > { %1043 = vrot.lane.b32.xlu1 %v5455_v18, %s5126_s27 }
 0x274   : > { %v1007_v20 = vpop.permute.xlu1 %1006 }
 0x275   : > { %1009 = vxpose.xlu1.b32.start.end [1/1] (short) (narrow) %v1007_v20, 8 }
 0x278   : > { %v1044_v24 = vpop.permute.xlu1 %1043 }
 0x282   : > { %v877_v21 = vpop.trf.xlu0 }
 0x283   : > { %v894_v22 = vpack.c.bf16 %v877_v21, %v877_v21 }
 0x285   : > { %v901_v23 = vsel %vm899_vm2, %v894_v22, 0 }
 0x286   : > { %4497 = vmatpush3.bf16.msra.mxu1 %v901_v23 }
 0x287   : > { %4508 = vmatprep.subr.bf16.mxu1 %v5124_v7 }
 0x289   : > { %4499 = vmatmul.mubr.msk.bf16.vlgmr.msra.gmra.mrb[8].mxu1 %vm895_vm3, %v5455_v18 }
 0x28a   : > { %4510 = vmatprep.mubr.msk.bf16.mxu1 %vm5125_vm0, %v5124_v7 }
 0x2f5   : > { %v1025_v25 = vpop.trf.xlu1 }
 0x2f6   : > { %v1041_v26 = vpack.c.bf16 %v1025_v25, %v1025_v25 }
 0x2f8   : > { %v1049_v27 = vsel %vm899_vm2, %v1041_v26, 0 }
 0x2f9   : > { %4509 = vmatpush3.bf16.msra.mxu1 %v1049_v27 }
 0x2fa   : > { %4520 = vmatprep.subr.bf16.mxu1 %v5124_v7 }
 0x2fc   : > { %4511 = vmatmul.mubr.msk.bf16.vlgmr.msra.gmra.mrb[12].mxu1 %vm895_vm3, %v1044_v24 }
 0x2fd   : > { %4522 = vmatprep.mubr.msk.bf16.mxu1 %vm5125_vm0, %v5124_v7  ;;  %4521 = vmatpush3.bf16.msra.mxu1 %v1159_v4 }
 0x2fe   : > { %4532 = vmatprep.subr.bf16.mxu1 %v5124_v7 }
 0x35c   : > { %v937_v28 = vpop.f32.mrb[8].mxu1 }
 0x35d   : > { %v943_v29 = vmul.f32 0.35355338, %v937_v28  ;;  %v4500_v30 = vpop.f32.mrb[9].mxu1 }
 0x35e   : > { %v940_v31 = vpop.f32.mrb[10].mxu1 }
 0x35f   : > { %v4501_v32 = vpop.f32.mrb[11].mxu1  ;;  %v944_v33 = vsel %vm895_vm3, %v943_v29, -inf }
 0x360   : > { %945 = vmax.xlane.f32.xlu0 %v944_v33 }
 0x3cf   : > { %v1085_v35 = vpop.f32.mrb[12].mxu1 }
 0x3d0   : > { %v1091_v36 = vmul.f32 0.35355338, %v1085_v35  ;;  %v4512_v37 = vpop.f32.mrb[13].mxu1 }
 0x3d1   : > { %v1088_v38 = vpop.f32.mrb[14].mxu1 }
 0x3d2   : > { %v4513_v39 = vpop.f32.mrb[15].mxu1  ;;  %v1092_v40 = vsel %vm895_vm3, %v1091_v36, -inf }
 0x3d3   : > { %1093 = vmax.xlane.f32.xlu1 %v1092_v40 }
 0x3e4   : > { %1105 = vrot.lane.b32.xlu1 %v5445_v6, %s5126_s27 }
 0x3e8   : > { %1283 = vrot.lane.b32.xlu1 %v5455_v18, %s5127_s30 }
 0x3ed   : > { %v946_v41 = vpop.xlane.xlu0 %945 }
 0x3ee   : > { %v947_v42 = vsub.f32 %v943_v29, %v946_v41 }
 0x3f0   : > { %v948_v43 = vmul.f32 1.442695, %v947_v42 }
 0x3f2   : > { %4900 = vpow2.f32 %v948_v43 }
 0x3fc   : > { %v4901_v44 = vpop.eup %4900 }
 0x3fd   : > { %v950_v45 = vsel %vm895_vm3, %v4901_v44, 0.0 }
 0x3fe   : > { %951 = vadd.xlane.f32.xlu0 %v950_v45 }
 0x460   : > { %v1094_v46 = vpop.xlane.xlu1 %1093 }
 0x461   : > { %v1095_v47 = vsub.f32 %v1091_v36, %v1094_v46 }
 0x463   : > { %v1096_v48 = vmul.f32 1.442695, %v1095_v47 }
 0x464   : > { %v1106_v54 = vpop.permute.xlu1 %1105 }
 0x465   : > { %4902 = vpow2.f32 %v1096_v48  ;;  %v1111_v56 = vsel %vm899_vm2, %v1106_v54, 0 }
 0x468   : > { %v1284_v12 = vpop.permute.xlu1 %1283 }
 0x46f   : > { %v4903_v49 = vpop.eup %4902 }
 0x470   : > { %v1098_v50 = vsel %vm895_vm3, %v4903_v49, 0.0 }
 0x471   : > { %1099 = vadd.xlane.f32.xlu0 %v1098_v50 }
 0x487   : > { %1247 = vrot.lane.b32.xlu0 %v5450_v15, %s5127_s30 }
 0x48b   : > { %v952_v51 = vpop.xlane.xlu0 %951 }
 0x48c   : > { %4904 = vrcp.f32 %v952_v51 }
 0x496   : > { %v4905_v52 = vpop.eup %4904 }
 0x497   : > { %v954_v53 = vmul.f32 %v4905_v52, %v4901_v44 }
 0x499   : > { %v955_v55 = vpack.c.bf16 %v954_v53, %v954_v53  ;;  %v691_v53 = vld [vmem:[#allocation2 + $0x10] sm:$0xff] }
 0x49a   : > { %v1393_v54 = vpack.c.bf16 %v691_v53, %v691_v53 }
 0x49b   : > { %4505 = vmatmul.mubr.msk.bf16.vlgmr.msra.gmra.mrb[4].mxu0 %vm895_vm3, %v955_v55 }
 0x49c   : > { %4515 = vmatpush3.bf16.msra.mxu0 %v1111_v56  ;;  %4516 = vmatprep.mubr.msk.bf16.mxu0 %vm5125_vm0, %v5124_v7  ;;  %v1398_v55 = vsel %vm899_vm2, %v1393_v54, 0 }
 0x49d   : > { %4526 = vmatprep.subr.bf16.mxu0 %v5124_v7 }
 0x4fe   : > { %v1100_v57 = vpop.xlane.xlu0 %1099 }
 0x4ff   : > { %4906 = vrcp.f32 %v1100_v57 }
 0x502   : > { %v1248_v58 = vpop.permute.xlu0 %1247 }
 0x503   : > { %1250 = vxpose.xlu1.b32.start.end [1/1] (short) (narrow) %v1248_v58, 8 }
 0x509   : > { %v4907_v61 = vpop.eup %4906 }
 0x50a   : > { %v1102_v62 = vmul.f32 %v4907_v61, %v4903_v49 }
 0x50c   : > { %v1103_v63 = vpack.c.bf16 %v1102_v62, %v1102_v62 }
 0x50e   : > { %4517 = vmatmul.mubr.msk.bf16.vlgmr.msra.gmra.mrb[8].mxu0 %vm895_vm3, %v1103_v63 }
 0x50f   : > { %4527 = vmatpush3.bf16.msra.mxu0 %v1205_v1  ;;  %4528 = vmatprep.mubr.msk.bf16.mxu0 %vm5125_vm0, %v5124_v7 }
 0x510   : > { %4538 = vmatprep.subr.bf16.mxu0 %v5124_v7 }
 0x56e   : > { %v997_v5 = vpop.f32.mrb[4].mxu0 }
 0x56f   : > { %v1003_v8 = vpack.c.bf16 %v997_v5, %v997_v5  ;;  %v4506_v9 = vpop.f32.mrb[5].mxu0 }
 0x570   : > { %v1000_v10 = vpop.f32.mrb[6].mxu0 }
 0x571   : > { %v4507_v11 = vpop.f32.mrb[7].mxu0  ;;  %4529 = vmatmul.mubr.msk.bf16.vlgmr.msra.gmra.mrb[12].mxu0 %vm895_vm3, %v1003_v8 }
 0x572   : > { %4540 = vmatprep.mubr.msk.bf16.mxu0 %vm5125_vm0, %v5124_v7 }
 0x583   : > { %v1266_v13 = vpop.trf.xlu1 }
 0x584   : > { %v1282_v14 = vpack.c.bf16 %v1266_v13, %v1266_v13 }
 0x586   : > { %v1289_v20 = vsel %vm899_vm2, %v1282_v14, 0 }
 0x5e1   : > { %v1147_v16 = vpop.f32.mrb[8].mxu0 }
 0x5e2   : > { %v1153_v17 = vpack.c.bf16 %v1147_v16, %v1147_v16  ;;  %v4518_v19 = vpop.f32.mrb[9].mxu0 }
 0x5e3   : > { %v1150_v21 = vpop.f32.mrb[10].mxu0 }
 0x5e4   : > { %v4519_v22 = vpop.f32.mrb[11].mxu0  ;;  %4523 = vmatmul.mubr.msk.bf16.vlgmr.msra.gmra.mrb[16].mxu1 %vm895_vm3, %v1153_v17 }
 0x5e5   : > { %4533 = vmatpush3.bf16.msra.mxu1 %v1289_v20  ;;  %4534 = vmatprep.mubr.msk.bf16.mxu1 %vm5125_vm0, %v5124_v7 }
 0x5e6   : > { %4544 = vmatprep.subr.bf16.mxu1 %v5124_v7 }
 0x5ec   : > { %4535 = vmatmul.mubr.msk.bf16.vlgmr.msra.gmra.mrb[20].mxu1 %vm895_vm3, %v1284_v12 }
 0x5ed   : > { %4546 = vmatprep.mubr.msk.bf16.mxu1 %vm5125_vm0, %v5124_v7  ;;  %4545 = vmatpush3.bf16.msra.mxu1 %v1398_v55 }
 0x5ee   : > { %4556 = vmatprep.subr.bf16.mxu1 %v5124_v7 }
 0x644   : > { %v1241_v23 = vpop.f32.mrb[12].mxu0 }
 0x645   : > { %v4530_v24 = vpop.f32.mrb[13].mxu0 }
 0x646   : > { %v1244_v25 = vpop.f32.mrb[14].mxu0 }
 0x647   : > { %v4531_v26 = vpop.f32.mrb[15].mxu0 }
 0x6b7   : > { %v1195_v27 = vpop.f32.mrb[16].mxu1 }
 0x6b8   : > { %v5503_v28 = vadd.f32 %v1241_v23, %v1195_v27  ;;  %v4524_v29 = vpop.f32.mrb[17].mxu1 }
 0x6b9   : > { %v1198_v30 = vpop.f32.mrb[18].mxu1 }
 0x6ba   : > { %v4525_v31 = vpop.f32.mrb[19].mxu1 }
 0x6bb   : > { %v1673_v31 = vld [vmem:[#allocation5] sm:$0xff] }
 0x6bf   : > { %v1325_v32 = vpop.f32.mrb[20].mxu1 }
 0x6c0   : > { %v1331_v33 = vmul.f32 0.35355338, %v1325_v32  ;;  %v4536_v35 = vpop.f32.mrb[21].mxu1  ;;  %v1674_v32 = vld [vmem:[#allocation5 + $0x8] sm:$0xff] }
 0x6c1   : > { %v1328_v36 = vpop.f32.mrb[22].mxu1  ;;  %v1675_v35 = vld [vmem:[#allocation5 + $0x10] sm:$0xff] }
 0x6c2   : > { %v4537_v37 = vpop.f32.mrb[23].mxu1  ;;  %v1332_v38 = vsel %vm895_vm3, %v1331_v33, -inf  ;;  %v1676_v36 = vld [vmem:[#allocation5 + $0x18] sm:$0xff] }
 0x6c3   : > { %1333 = vmax.xlane.f32.xlu0 %v1332_v38  ;;  %v1679_v37 = vpack.c.bf16 %v1676_v36, %v1675_v35  ;;  %v1731_v38 = vld [vmem:[%s6119_s13] sm:$0xff]  ;;  %v4248_v35 = vld [vmem:[%s6111_s5 + $0x38] sm:$0xff]  ;;  %v4255_v36 = vld [vmem:[%s6113_s7 + $0x30] sm:$0xff] }
 0x6d9   : > { %1441 = vrot.lane.b32.xlu0 %v5450_v15, %s5128_s1 }
 0x6dd   : > { %1344 = vrot.lane.b32.xlu0 %v5445_v6, %s5127_s30 }
 0x6e1   : > { %1477 = vrot.lane.b32.xlu0 %v5455_v18, %s5128_s1 }
 0x750   : > { %v1334_v39 = vpop.xlane.xlu0 %1333 }
 0x751   : > { %v1335_v40 = vsub.f32 %v1331_v33, %v1334_v39  ;;  %v1678_v33 = vpack.c.bf16 %v1674_v32, %v1673_v31  ;;  %v1732_v39 = vld [vmem:[%s6119_s13 + $0x8] sm:$0xff] }
 0x752   : > { %v4254_v31 = vld [vmem:[%s6113_s7 + $0x28] sm:$0xff] }
 0x753   : > { %v1336_v41 = vmul.f32 1.442695, %v1335_v40  ;;  %v1733_v40 = vld [vmem:[%s6119_s13 + $0x10] sm:$0xff] }
 0x754   : > { %v1442_v42 = vpop.permute.xlu0 %1441 }
 0x755   : > { %4908 = vpow2.f32 %v1336_v41  ;;  %1444 = vxpose.xlu0.b32.start.end [1/1] (short) (narrow) %v1442_v42, 8  ;;  %v1740_v41 = vpack.c.bf16 %v1732_v39, %v1731_v38  ;;  %v1734_v42 = vld [vmem:[%s6119_s13 + $0x18] sm:$0xff] }
 0x756   : > { %v4256_v38 = vld [vmem:[%s6113_s7 + $0x38] sm:$0xff] }
 0x757   : > { %v1944_v39 = vpack.c.bf16 %v4256_v38, %v4255_v36 }
 0x758   : > { %v1345_v43 = vpop.permute.xlu0 %1344 }
 0x759   : > { %v1350_v44 = vsel %vm899_vm2, %v1345_v43, 0  ;;  %v1741_v43 = vpack.c.bf16 %v1734_v42, %v1733_v40  ;;  %v4243_v40 = vld [vmem:[%s6120_s14] ss:$0 sm:$0xff] }
 0x75a   : > { %4539 = vmatpush3.bf16.msra.mxu0 %v1350_v44 }
 0x75b   : > { %4550 = vmatprep.subr.bf16.mxu0 %v5124_v7 }
 0x75c   : > { %v1478_v47 = vpop.permute.xlu0 %1477 }
 0x75f   : > { %v4909_v45 = vpop.eup %4908 }
 0x760   : > { %v1338_v15 = vsel %vm895_vm3, %v4909_v45, 0.0 }
 0x761   : > { %1339 = vadd.xlane.f32.xlu1 %v1338_v15 }
 0x7d5   : > { %v1460_v18 = vpop.trf.xlu0 }
 0x7d6   : > { %v1476_v48 = vpack.c.bf16 %v1460_v18, %v1460_v18 }
 0x7d8   : > { %v1483_v52 = vsel %vm899_vm2, %v1476_v48, 0 }
 0x7ee   : > { %v1340_v46 = vpop.xlane.xlu1 %1339 }
 0x7ef   : > { %4910 = vrcp.f32 %v1340_v46 }
 0x7f9   : > { %v4911_v49 = vpop.eup %4910 }
 0x7fa   : > { %v1342_v50 = vmul.f32 %v4911_v49, %v4909_v45 }
 0x7fc   : > { %v1343_v51 = vpack.c.bf16 %v1342_v50, %v1342_v50 }
 0x7fe   : > { %4541 = vmatmul.mubr.msk.bf16.vlgmr.msra.gmra.mrb[16].mxu0 %vm895_vm3, %v1343_v51 }
 0x7ff   : > { %4551 = vmatpush3.bf16.msra.mxu0 %v1483_v52  ;;  %4552 = vmatprep.mubr.msk.bf16.mxu0 %vm5125_vm0, %v5124_v7 }
 0x800   : > { %4562 = vmatprep.subr.bf16.mxu0 %v5124_v7 }
 0x806   : > { %4553 = vmatmul.mubr.msk.bf16.vlgmr.msra.gmra.mrb[20].mxu0 %vm895_vm3, %v1478_v47 }
 0x807   : > { %4564 = vmatprep.mubr.msk.bf16.mxu0 %vm5125_vm0, %v5124_v7 }
 0x8d1   : > { %v1386_v56 = vpop.f32.mrb[16].mxu0 }
 0x8d2   : > { %v1392_v57 = vpack.c.bf16 %v1386_v56, %v1386_v56  ;;  %v4542_v58 = vpop.f32.mrb[17].mxu0 }
 0x8d3   : > { %v1389_v59 = vpop.f32.mrb[18].mxu0 }
 0x8d4   : > { %v4543_v60 = vpop.f32.mrb[19].mxu0  ;;  %4547 = vmatmul.mubr.msk.bf16.vlgmr.msra.gmra.mrb[24].mxu1 %vm895_vm3, %v1392_v57 }
 0x8d5   : > { %4558 = vmatprep.mubr.msk.bf16.mxu1 %vm5125_vm0, %v5124_v7 }
 0x8d9   : > { %v1519_v61 = vpop.f32.mrb[20].mxu0 }
 0x8da   : > { %v1525_v62 = vmul.f32 0.35355338, %v1519_v61  ;;  %v4554_v63 = vpop.f32.mrb[21].mxu0 }
 0x8db   : > { %v1522_v1 = vpop.f32.mrb[22].mxu0 }
 0x8dc   : > { %v4555_v2 = vpop.f32.mrb[23].mxu0  ;;  %v1526_v3 = vsel %vm895_vm3, %v1525_v62, -inf }
 0x8dd   : > { %1527 = vmax.xlane.f32.xlu1 %v1526_v3 }
 0x96a   : > { %v1528_v4 = vpop.xlane.xlu1 %1527 }
 0x96b   : > { %v1529_v5 = vsub.f32 %v1525_v62, %v1528_v4  ;;  %v4239_v4 = vld [vmem:[%s6121_s15] ss:$0 sm:$0xff] }
 0x96d   : > { %v1530_v8 = vmul.f32 1.442695, %v1529_v5 }
 0x96f   : > { %4912 = vpow2.f32 %v1530_v8  ;;  %v4240_v8 = vld [vmem:[%s6122_s16] ss:$0 sm:$0xff] }
 0x979   : > { %v4913_v9 = vpop.eup %4912 }
 0x97a   : > { %v1532_v10 = vsel %vm895_vm3, %v4913_v9, 0.0 }
 0x97b   : > { %1533 = vadd.xlane.f32.xlu1 %v1532_v10 }
 0x98c   : > { %1538 = vrot.lane.b32.xlu1 %v5445_v6, %s5128_s1  ;;  %v692_v6 = vld [vmem:[#allocation2 + $0x18] sm:$0xff] }
 0x98d   : > { %v1587_v24 = vpack.c.bf16 %v692_v6, %v692_v6 }
 0x98f   : > { %v1592_v25 = vsel %vm899_vm2, %v1587_v24, 0 }
 0x990   : > { %4563 = vmatpush3.bf16.msra.mxu0 %v1592_v25 }
 0x991   : > { %4576 = vmatprep.subr.bf16.mxu0 %v5124_v7 }
 0x9a7   : > { %v1434_v11 = vpop.f32.mrb[24].mxu1 }
 0x9a8   : > { %v1440_v12 = vadd.f32 %v1434_v11, %v5503_v28  ;;  %v4548_v13 = vpop.f32.mrb[25].mxu1 }
 0x9a9   : > { %v1437_v14 = vpop.f32.mrb[26].mxu1  ;;  %v1736_v13 = vld [vmem:[%s6119_s13 + $0x28] sm:$0xff] }
 0x9aa   : > { %v4549_v16 = vpop.f32.mrb[27].mxu1 }
 0x9ab   : > { %v1737_v16 = vld [vmem:[%s6119_s13 + $0x30] sm:$0xff] }
 0xa08   : > { %v1534_v17 = vpop.xlane.xlu1 %1533 }
 0xa09   : > { %4914 = vrcp.f32 %v1534_v17  ;;  %v1738_v17 = vld [vmem:[%s6119_s13 + $0x38] sm:$0xff] }
 0xa0c   : > { %v1539_v19 = vpop.permute.xlu1 %1538 }
 0xa0d   : > { %v1544_v20 = vsel %vm899_vm2, %v1539_v19, 0  ;;  %v1743_v19 = vpack.c.bf16 %v1738_v17, %v1737_v16 }
 0xa0e   : > { %4557 = vmatpush3.bf16.msra.mxu1 %v1544_v20  ;;  %v4241_v20 = vld [vmem:[%s6118_s12] ss:$0 sm:$0xff] }
 0xa0f   : > { %4568 = vmatprep.subr.bf16.mxu1 %v5124_v7 }
 0xa13   : > { %v4915_v21 = vpop.eup %4914 }
 0xa14   : > { %v1536_v22 = vmul.f32 %v4915_v21, %v4913_v9 }
 0xa16   : > { %v1537_v23 = vpack.c.bf16 %v1536_v22, %v1536_v22 }
 0xa18   : > { %4559 = vmatmul.mubr.msk.bf16.vlgmr.msra.gmra.mrb[28].mxu1 %vm895_vm3, %v1537_v23 }
 0xa19   : > { %4572 = vmatprep.mubr.msk.bf16.mxu1 %vm5125_vm0, %v5124_v7  ;;  %4569 = vmatpush3.bf16.msra.mxu1 %v1678_v33  ;;  %v4247_v33 = vld [vmem:[%s6111_s5 + $0x30] sm:$0xff] }
 0xa1a   : > { %4570 = vmatprep.subr.bf16.mxu1 %v5124_v7 }
 0xa1d   : > { %4571 = vmatpush3.bf16.msra.mxu1 %v1679_v37  ;;  %v1857_v37 = vpack.c.bf16 %v4248_v35, %v4247_v33 }
 0xa1e   : > { %4588 = vmatprep.subr.bf16.mxu1 %v5124_v7 }
 0xaeb   : > { %v1580_v26 = vpop.f32.mrb[28].mxu1 }
 0xaec   : > { %v1586_v27 = vpack.c.bf16 %v1580_v26, %v1580_v26  ;;  %v4560_v28 = vpop.f32.mrb[29].mxu1 }
 0xaed   : > { %v1583_v29 = vpop.f32.mrb[30].mxu1  ;;  %v4246_v28 = vld [vmem:[%s6111_s5 + $0x28] sm:$0xff] }
 0xaee   : > { %v4561_v30 = vpop.f32.mrb[31].mxu1  ;;  %4565 = vmatmul.mubr.msk.bf16.vlgmr.msra.gmra.mrb[24].mxu0 %vm895_vm3, %v1586_v27  ;;  %v4245_v27 = vld [vmem:[%s6111_s5 + $0x20] sm:$0xff] }
 0xaef   : > { %4584 = vmatprep.mubr.msk.bf16.mxu0 %vm5125_vm0, %v5124_v7  ;;  %4577 = vmatpush3.bf16.msra.mxu0 %v1740_v41  ;;  %v4253_v29 = vld [vmem:[%s6113_s7 + $0x20] sm:$0xff]  ;;  %v1856_v30 = vpack.c.bf16 %v4246_v28, %v4245_v27 }
 0xaf0   : > { %4578 = vmatprep.subr.bf16.mxu0 %v5124_v7  ;;  %v1943_v32 = vpack.c.bf16 %v4254_v31, %v4253_v29 }
 0xaf3   : > { %4579 = vmatpush3.bf16.msra.mxu0 %v1741_v43 }
 0xaf4   : > { %4580 = vmatprep.subr.bf16.mxu0 %v5124_v7 }
 0xbc1   : > { %v1628_v44 = vpop.f32.mrb[24].mxu0 }
 0xbc2   : > { %v1634_v45 = vadd.f32 %v1628_v44, %v1440_v12  ;;  %v4566_v15 = vpop.f32.mrb[25].mxu0  ;;  %v1735_v12 = vld [vmem:[%s6119_s13 + $0x20] sm:$0xff] }
 0xbc3   : > { %v1631_v46 = vpop.f32.mrb[26].mxu0  ;;  %v1742_v14 = vpack.c.bf16 %v1736_v13, %v1735_v12  ;;  %v4251_v12 = vld [vmem:[%s6112_s6 + $0x30] sm:$0xff]  ;;  %v4252_v13 = vld [vmem:[%s6112_s6 + $0x38] sm:$0xff] }
 0xbc4   : > { %v5560_v47 = vadd.f32 %v1634_v45, %v5403_v34  ;;  %v4567_v18 = vpop.f32.mrb[27].mxu0 }
 0xbc5   : > { %4581 = vmatpush3.bf16.msra.mxu0 %v1742_v14  ;;  %v1902_v14 = vpack.c.bf16 %v4252_v13, %v4251_v12  ;;  %v1813_v13 = vld [vmem:[#allocation2 + $0x28] sm:$0xff] }
 0xbc6   : > { %v1638_v48 = vsel %vm675_vm1, %v5560_v47, 0.0  ;;  %4582 = vmatprep.subr.bf16.mxu0 %v5124_v7 }
 0xbc7   : > { %v1639_v49 = vrot.slane %v1638_v48, 4 }
 0xbc9   : > { %v1640_v50 = vadd.f32 %v1639_v49, %v1638_v48  ;;  %4583 = vmatpush3.bf16.msra.mxu0 %v1743_v19 }
 0xbca   : > { %4604 = vmatprep.subr.bf16.mxu0 %v5124_v7 }
 0xbcb   : > { %v1641_v51 = vrot.slane %v1640_v50, 2 }
 0xbcd   : > { %v1642_v52 = vadd.f32 %v1641_v51, %v1640_v50 }
 0xbcf   : > { %v1643_v53 = vrot.slane %v1642_v52, 1 }
 0xbd1   : > { %v1644_v54 = vadd.f32 %v1643_v53, %v1642_v52 }
 0xbd3   : > { %v1645_v55 = vmul.f32 0.125, %v1644_v54 }
 0xbd5   : > { %v1646_v56 = vsub.f32 %v5560_v47, %v1645_v55 }
 0xbd7   : > { %v1647_v57 = vmul.f32 %v1646_v56, %v1646_v56 }
 0xbd9   : > { %v1648_v58 = vsel %vm675_vm1, %v1647_v57, 0.0 }
 0xbda   : > { %v1649_v59 = vrot.slane %v1648_v58, 4 }
 0xbdc   : > { %v1650_v60 = vadd.f32 %v1649_v59, %v1648_v58 }
 0xbde   : > { %v1651_v34 = vrot.slane %v1650_v60, 2 }
 0xbe0   : > { %v1652_v61 = vadd.f32 %v1651_v34, %v1650_v60 }
 0xbe2   : > { %v1653_v62 = vrot.slane %v1652_v61, 1 }
 0xbe4   : > { %v1654_v63 = vadd.f32 %v1653_v62, %v1652_v61 }
 0xbe6   : > { %v1655_v1 = vmul.f32 0.125, %v1654_v63 }
 0xbe8   : > { %v1656_v2 = vadd.f32 1e-05, %v1655_v1  ;;  %v4259_v1 = vld [vmem:[%s6115_s9 + $0x1] ss:$0 sm:$0xff] }
 0xbea   : > { %4916 = vrsqrt.f32 %v1656_v2 }
 0xbf4   : > { %v4917_v3 = vpop.eup %4916 }
 0xbf5   : > { %v1658_v5 = vmul.f32 %v4917_v3, %v1646_v56  ;;  %v4260_v3 = vld [vmem:[%s6116_s10 + $0x1] ss:$0 sm:$0xff] }
 0xbf7   : > { %v1665_v9 = vmul.f32 %v4239_v4, %v1658_v5  ;;  %v4249_v5 = vld [vmem:[%s6112_s6 + $0x20] sm:$0xff] }
 0xbf9   : > { %v1672_v10 = vadd.f32 %v4240_v8, %v1665_v9  ;;  %v4250_v8 = vld [vmem:[%s6112_s6 + $0x28] sm:$0xff] }
 0xbfb   : > { %v1677_v11 = vpack.c.bf16 %v1672_v10, %v1672_v10  ;;  %v1901_v10 = vpack.c.bf16 %v4250_v8, %v4249_v5 }
 0xbfd   : > { %4573 = vmatmul.mubr.msk.bf16.vlgmr.msra.gmra.mrb[32].mxu1 %vm675_vm1, %v1677_v11 }
 0xbfe   : > { %4592 = vmatprep.mubr.msk.bf16.mxu1 %vm5125_vm0, %v5124_v7  ;;  %4589 = vmatpush3.bf16.msra.mxu1 %v1856_v30 }
 0xbff   : > { %4590 = vmatprep.subr.bf16.mxu1 %v5124_v7 }
 0xc02   : > { %4591 = vmatpush3.bf16.msra.mxu1 %v1857_v37 }
 0xc03   : > { %4596 = vmatprep.subr.bf16.mxu1 %v5124_v7 }
 0xcd0   : > { %v1724_v21 = vpop.f32.mrb[32].mxu1 }
 0xcd1   : > { %v1725_v22 = vadd.f32 %v4241_v20, %v1724_v21  ;;  %v4574_v23 = vpop.f32.mrb[33].mxu1 }
 0xcd2   : > { %v1727_v6 = vpop.f32.mrb[34].mxu1 }
 0xcd3   : > { %v1730_v24 = vmax.f32 %v1725_v22, 0.0  ;;  %v4575_v25 = vpop.f32.mrb[35].mxu1 }
 0xcd5   : > { %v1739_v26 = vpack.c.bf16 %v1730_v24, %v1730_v24 }
 0xcd7   : > { %4585 = vmatmul.mubr.msk.bf16.vlgmr.msra.gmra.mrb[28].mxu0 %vm1751_vm4, %v1739_v26 }
 0xcd8   : > { %4608 = vmatprep.mubr.msk.bf16.mxu0 %vm5125_vm0, %v5124_v7  ;;  %4605 = vmatpush3.bf16.msra.mxu0 %v1943_v32 }
 0xcd9   : > { %4606 = vmatprep.subr.bf16.mxu0 %v5124_v7 }
 0xcdc   : > { %4607 = vmatpush3.bf16.msra.mxu0 %v1944_v39 }
 0xcdd   : > { %4618 = vmatprep.subr.bf16.mxu0 %v5124_v7 }
 0xdaa   : > { %v1789_v41 = vpop.f32.mrb[28].mxu0 }
 0xdab   : > { %v1790_v42 = vadd.f32 %v4243_v40, %v1789_v41  ;;  %v4586_v43 = vpop.f32.mrb[29].mxu0 }
 0xdac   : > { %v1792_v44 = vpop.f32.mrb[30].mxu0 }
 0xdad   : > { %v5627_v45 = vadd.f32 %v1790_v42, %v5560_v47  ;;  %v4587_v15 = vpop.f32.mrb[31].mxu0 }
 0xdaf   : > { %v1820_v46 = vsel %vm675_vm1, %v5627_v45, 0.0 }
 0xdb0   : > { %v1821_v18 = vrot.slane %v1820_v46, 4 }
 0xdb2   : > { %v1822_v48 = vadd.f32 %v1821_v18, %v1820_v46 }
 0xdb4   : > { %v1823_v49 = vrot.slane %v1822_v48, 2 }
 0xdb6   : > { %v1824_v50 = vadd.f32 %v1823_v49, %v1822_v48 }
 0xdb8   : > { %v1825_v51 = vrot.slane %v1824_v50, 1 }
 0xdba   : > { %v1826_v52 = vadd.f32 %v1825_v51, %v1824_v50 }
 0xdbc   : > { %v1827_v53 = vmul.f32 0.125, %v1826_v52 }
 0xdbe   : > { %v1828_v54 = vsub.f32 %v5627_v45, %v1827_v53 }
 0xdc0   : > { %v1829_v55 = vmul.f32 %v1828_v54, %v1828_v54 }
 0xdc2   : > { %v1830_v56 = vsel %vm675_vm1, %v1829_v55, 0.0 }
 0xdc3   : > { %v1831_v57 = vrot.slane %v1830_v56, 4 }
 0xdc5   : > { %v1832_v58 = vadd.f32 %v1831_v57, %v1830_v56 }
 0xdc7   : > { %v1833_v47 = vrot.slane %v1832_v58, 2 }
 0xdc9   : > { %v1834_v59 = vadd.f32 %v1833_v47, %v1832_v58 }
 0xdcb   : > { %v1835_v60 = vrot.slane %v1834_v59, 1 }
 0xdcd   : > { %v1836_v34 = vadd.f32 %v1835_v60, %v1834_v59 }
 0xdcf   : > { %v1837_v61 = vmul.f32 0.125, %v1836_v34 }
 0xdd1   : > { %v1838_v62 = vadd.f32 1e-05, %v1837_v61 }
 0xdd3   : > { %4918 = vrsqrt.f32 %v1838_v62 }
 0xddd   : > { %v4919_v63 = vpop.eup %4918 }
 0xdde   : > { %v1840_v2 = vmul.f32 %v4919_v63, %v1828_v54 }
 0xde0   : > { %v1847_v4 = vmul.f32 %v4259_v1, %v1840_v2 }
 0xde2   : > { %v1854_v9 = vadd.f32 %v4260_v3, %v1847_v4 }
 0xde4   : > { %v1855_v11 = vpack.c.bf16 %v1854_v9, %v1854_v9 }
 0xde6   : > { %4593 = vmatmul.mubr.msk.bf16.vlgmr.msra.gmra.mrb[36].mxu1 %vm675_vm1, %v1855_v11  ;;  %4609 = vmatmul.mubr.msk.bf16.vlgmr.msra.gmra.mrb[32].mxu0 %vm675_vm1, %v1855_v11 }
 0xde7   : > { %4597 = vmatpush3.bf16.msra.mxu1 %v1901_v10  ;;  %4600 = vmatprep.mubr.msk.bf16.mxu1 %vm5125_vm0, %v5124_v7  ;;  %v1812_v10 = vld [vmem:[#allocation2 + $0x20] sm:$0xff] }
 0xde8   : > { %4598 = vmatprep.subr.bf16.mxu1 %v5124_v7  ;;  %4620 = vmatprep.mubr.msk.bf16.mxu0 %vm5125_vm0, %v5124_v7 }
 0xdeb   : > { %4599 = vmatpush3.bf16.msra.mxu1 %v1902_v14  ;;  %v2276_v14 = vpack.c.bf16 %v1813_v13, %v1813_v13 }
 0xdec   : > { %4612 = vmatprep.subr.bf16.mxu1 %v5124_v7 }
 0xdee   : > { %4601 = vmatmul.mubr.msk.bf16.vlgmr.msra.gmra.mrb[40].mxu1 %vm675_vm1, %v1855_v11  ;;  %v2126_v11 = vpack.c.bf16 %v1812_v10, %v1812_v10 }
 0xdef   : > { %4614 = vmatprep.mubr.msk.bf16.mxu1 %vm5125_vm0, %v5124_v7 }
 0xdf0   : > { %v2327_v12 = vsel %vm899_vm2, %v2126_v11, 0 }
 0xeb9   : > { %v1895_v16 = vpop.f32.mrb[36].mxu1  ;;  %v1979_v17 = vpop.f32.mrb[32].mxu0 }
 0xeba   : > { %v5662_v19 = vpack.c.bf16 %v1895_v16, %v1895_v16  ;;  %v5664_v20 = vpack.c.bf16 %v1979_v17, %v1979_v17  ;;  %v4594_v21 = vpop.f32.mrb[37].mxu1  ;;  %v4610_v22 = vpop.f32.mrb[33].mxu0  ;;  %v2281_v16 = vsel %vm899_vm2, %v2276_v14, 0 }
 0xebb   : > { %v1898_v23 = vpop.f32.mrb[38].mxu1  ;;  %v1982_v6 = vpop.f32.mrb[34].mxu0 }
 0xebc   : > { %v4611_v24 = vpop.f32.mrb[35].mxu0  ;;  %2165 = vrot.lane.b32.xlu1 %v5662_v19, %s5126_s27  ;;  %v4595_v25 = vpop.f32.mrb[39].mxu1  ;;  %v2083_v26 = vsel %vm899_vm2, %v5664_v20, 0 }
 0xebd   : > { %4619 = vmatpush3.bf16.msra.mxu0 %v2083_v26 }
 0xebe   : > { %4630 = vmatprep.subr.bf16.mxu0 %v5124_v7 }
 0xec1   : > { %v5671_v27 = vpop.f32.mrb[40].mxu1 }
 0xec2   : > { %2128 = vrot.lane.b32.xlu0 %v5671_v27, %s5126_s27  ;;  %v4602_v28 = vpop.f32.mrb[41].mxu1 }
 0xec3   : > { %v1940_v29 = vpop.f32.mrb[42].mxu1 }
 0xec4   : > { %v4603_v30 = vpop.f32.mrb[43].mxu1 }
 0xee5   : > { %1985 = vxpose.xlu1.b32.start.end [1/1] (short) (narrow) %v5671_v27, 8 }
 0xf2e   : > { %v2166_v32 = vpop.permute.xlu1 %2165 }
 0xf34   : > { %v2129_v31 = vpop.permute.xlu0 %2128 }
 0xf35   : > { %2131 = vxpose.xlu0.b32.start.end [1/1] (short) (narrow) %v2129_v31, 8 }
 0xf65   : > { %v2001_v33 = vpop.trf.xlu1 }
 0xf66   : > { %v2018_v35 = vpack.c.bf16 %v2001_v33, %v2001_v33 }
 0xf68   : > { %v2023_v36 = vsel %vm899_vm2, %v2018_v35, 0 }
 0xf69   : > { %4613 = vmatpush3.bf16.msra.mxu1 %v2023_v36 }
 0xf6a   : > { %4624 = vmatprep.subr.bf16.mxu1 %v5124_v7 }
 0xf6c   : > { %4615 = vmatmul.mubr.msk.bf16.vlgmr.msra.gmra.mrb[44].mxu1 %vm895_vm3, %v5662_v19 }
 0xf6d   : > { %4626 = vmatprep.mubr.msk.bf16.mxu1 %vm5125_vm0, %v5124_v7 }
 0xfb5   : > { %v2147_v37 = vpop.trf.xlu0 }
 0xfb6   : > { %v2163_v38 = vpack.c.bf16 %v2147_v37, %v2147_v37 }
 0xfb8   : > { %v2171_v39 = vsel %vm899_vm2, %v2163_v38, 0 }
 0xfb9   : > { %4625 = vmatpush3.bf16.msra.mxu1 %v2171_v39 }
 0xfba   : > { %4636 = vmatprep.subr.bf16.mxu1 %v5124_v7 }
 0xfbc   : > { %4627 = vmatmul.mubr.msk.bf16.vlgmr.msra.gmra.mrb[48].mxu1 %vm895_vm3, %v2166_v32 }
 0xfbd   : > { %4638 = vmatprep.mubr.msk.bf16.mxu1 %vm5125_vm0, %v5124_v7  ;;  %4637 = vmatpush3.bf16.msra.mxu1 %v2281_v16 }
 0xfbe   : > { %4648 = vmatprep.subr.bf16.mxu1 %v5124_v7 }
0x103f   : > { %v2059_v40 = vpop.f32.mrb[44].mxu1 }
0x1040   : > { %v2065_v41 = vmul.f32 0.35355338, %v2059_v40  ;;  %v4616_v42 = vpop.f32.mrb[45].mxu1 }
0x1041   : > { %v2062_v43 = vpop.f32.mrb[46].mxu1 }
0x1042   : > { %v4617_v44 = vpop.f32.mrb[47].mxu1  ;;  %v2066_v15 = vsel %vm895_vm3, %v2065_v41, -inf }
0x1043   : > { %2067 = vmax.xlane.f32.xlu1 %v2066_v15 }
0x108f   : > { %v2207_v46 = vpop.f32.mrb[48].mxu1 }
0x1090   : > { %v2213_v18 = vmul.f32 0.35355338, %v2207_v46  ;;  %v4628_v48 = vpop.f32.mrb[49].mxu1 }
0x1091   : > { %v2210_v49 = vpop.f32.mrb[50].mxu1 }
0x1092   : > { %v4629_v50 = vpop.f32.mrb[51].mxu1  ;;  %v2214_v51 = vsel %vm895_vm3, %v2213_v18, -inf }
0x1093   : > { %2215 = vmax.xlane.f32.xlu0 %v2214_v51 }
0x10a9   : > { %2369 = vrot.lane.b32.xlu0 %v5671_v27, %s5127_s30 }
0x10d0   : > { %v2068_v52 = vpop.xlane.xlu1 %2067 }
0x10d1   : > { %v2069_v53 = vsub.f32 %v2065_v41, %v2068_v52 }
0x10d3   : > { %v2070_v54 = vmul.f32 1.442695, %v2069_v53 }
0x10d5   : > { %4920 = vpow2.f32 %v2070_v54 }
0x10df   : > { %v4921_v55 = vpop.eup %4920 }
0x10e0   : > { %v2072_v56 = vsel %vm895_vm3, %v4921_v55, 0.0 }
0x10e1   : > { %2073 = vadd.xlane.f32.xlu1 %v2072_v56 }
0x1120   : > { %v2216_v57 = vpop.xlane.xlu0 %2215 }
0x1121   : > { %v2217_v58 = vsub.f32 %v2213_v18, %v2216_v57 }
0x1123   : > { %v2218_v47 = vmul.f32 1.442695, %v2217_v58 }
0x1124   : > { %v2370_v34 = vpop.permute.xlu0 %2369 }
0x1125   : > { %4922 = vpow2.f32 %v2218_v47 }
0x112f   : > { %v4923_v59 = vpop.eup %4922 }
0x1130   : > { %v2220_v60 = vsel %vm895_vm3, %v4923_v59, 0.0 }
0x1131   : > { %2221 = vadd.xlane.f32.xlu1 %v2220_v60 }
0x1142   : > { %2227 = vrot.lane.b32.xlu1 %v5664_v20, %s5126_s27 }
0x1146   : > { %2405 = vrot.lane.b32.xlu1 %v5662_v19, %s5127_s30 }
0x116e   : > { %v2074_v61 = vpop.xlane.xlu1 %2073 }
0x116f   : > { %4924 = vrcp.f32 %v2074_v61  ;;  %2372 = vxpose.xlu1.b32.start.end [1/1] (short) (narrow) %v2370_v34, 8 }
0x1179   : > { %v4925_v62 = vpop.eup %4924 }
0x117a   : > { %v2076_v63 = vmul.f32 %v4925_v62, %v4921_v55  ;;  %v1814_v62 = vld [vmem:[#allocation2 + $0x30] sm:$0xff] }
0x117c   : > { %v2077_v1 = vpack.c.bf16 %v2076_v63, %v2076_v63  ;;  %v2515_v63 = vpack.c.bf16 %v1814_v62, %v1814_v62 }
0x117e   : > { %4621 = vmatmul.mubr.msk.bf16.vlgmr.msra.gmra.mrb[36].mxu0 %vm895_vm3, %v2077_v1  ;;  %v2520_v1 = vsel %vm899_vm2, %v2515_v63, 0 }
0x117f   : > { %4632 = vmatprep.mubr.msk.bf16.mxu0 %vm5125_vm0, %v5124_v7 }
0x118d   : > { %2563 = vrot.lane.b32.xlu1 %v5671_v27, %s5128_s1 }
0x1191   : > { %2599 = vrot.lane.b32.xlu1 %v5662_v19, %s5128_s1 }
0x11be   : > { %v2222_v2 = vpop.xlane.xlu1 %2221 }
0x11bf   : > { %4926 = vrcp.f32 %v2222_v2 }
0x11c2   : > { %v2228_v3 = vpop.permute.xlu1 %2227 }
0x11c3   : > { %v2233_v4 = vsel %vm899_vm2, %v2228_v3, 0 }
0x11c4   : > { %4631 = vmatpush3.bf16.msra.mxu0 %v2233_v4 }
0x11c5   : > { %4642 = vmatprep.subr.bf16.mxu0 %v5124_v7 }
0x11c6   : > { %v2406_v6 = vpop.permute.xlu1 %2405 }
0x11c9   : > { %v4927_v5 = vpop.eup %4926 }
0x11ca   : > { %v2224_v8 = vmul.f32 %v4927_v5, %v4923_v59 }
0x11cc   : > { %v2225_v9 = vpack.c.bf16 %v2224_v8, %v2224_v8 }
0x11ce   : > { %4633 = vmatmul.mubr.msk.bf16.vlgmr.msra.gmra.mrb[40].mxu0 %vm895_vm3, %v2225_v9 }
0x11cf   : > { %4644 = vmatprep.mubr.msk.bf16.mxu0 %vm5125_vm0, %v5124_v7  ;;  %4643 = vmatpush3.bf16.msra.mxu0 %v2327_v12 }
0x11d0   : > { %4654 = vmatprep.subr.bf16.mxu0 %v5124_v7 }
0x11ef   : > { %v2388_v24 = vpop.trf.xlu1 }
0x11f0   : > { %v2404_v25 = vpack.c.bf16 %v2388_v24, %v2388_v24 }
0x11f2   : > { %v2411_v27 = vsel %vm899_vm2, %v2404_v25, 0 }
0x11ff   : > { %v2564_v53 = vpop.permute.xlu1 %2563 }
0x1203   : > { %v2600_v61 = vpop.permute.xlu1 %2599 }
0x1251   : > { %v2119_v17 = vpop.f32.mrb[36].mxu0 }
0x1252   : > { %v2125_v19 = vpack.c.bf16 %v2119_v17, %v2119_v17  ;;  %v4622_v21 = vpop.f32.mrb[37].mxu0 }
0x1253   : > { %v2122_v22 = vpop.f32.mrb[38].mxu0 }
0x1254   : > { %v4623_v23 = vpop.f32.mrb[39].mxu0  ;;  %4645 = vmatmul.mubr.msk.bf16.vlgmr.msra.gmra.mrb[44].mxu0 %vm895_vm3, %v2125_v19 }
0x1255   : > { %4656 = vmatprep.mubr.msk.bf16.mxu0 %vm5125_vm0, %v5124_v7 }
0x12a1   : > { %v2269_v26 = vpop.f32.mrb[40].mxu0 }
0x12a2   : > { %v2275_v28 = vpack.c.bf16 %v2269_v26, %v2269_v26  ;;  %v4634_v29 = vpop.f32.mrb[41].mxu0 }
0x12a3   : > { %v2272_v30 = vpop.f32.mrb[42].mxu0 }
0x12a4   : > { %v4635_v31 = vpop.f32.mrb[43].mxu0  ;;  %4639 = vmatmul.mubr.msk.bf16.vlgmr.msra.gmra.mrb[52].mxu1 %vm895_vm3, %v2275_v28 }
0x12a5   : > { %4649 = vmatpush3.bf16.msra.mxu1 %v2411_v27  ;;  %4650 = vmatprep.mubr.msk.bf16.mxu1 %vm5125_vm0, %v5124_v7 }
0x12a6   : > { %4660 = vmatprep.subr.bf16.mxu1 %v5124_v7 }
0x12ac   : > { %4651 = vmatmul.mubr.msk.bf16.vlgmr.msra.gmra.mrb[56].mxu1 %vm895_vm3, %v2406_v6 }
0x12ad   : > { %4662 = vmatprep.mubr.msk.bf16.mxu1 %vm5125_vm0, %v5124_v7  ;;  %4661 = vmatpush3.bf16.msra.mxu1 %v2520_v1 }
0x12ae   : > { %4672 = vmatprep.subr.bf16.mxu1 %v5124_v7 }
0x1327   : > { %v2363_v32 = vpop.f32.mrb[44].mxu0 }
0x1328   : > { %v4646_v33 = vpop.f32.mrb[45].mxu0 }
0x1329   : > { %v2366_v35 = vpop.f32.mrb[46].mxu0 }
0x132a   : > { %v4647_v36 = vpop.f32.mrb[47].mxu0 }
0x1377   : > { %v2317_v37 = vpop.f32.mrb[52].mxu1 }
0x1378   : > { %v5724_v38 = vadd.f32 %v2363_v32, %v2317_v37  ;;  %v4640_v39 = vpop.f32.mrb[53].mxu1  ;;  %v1815_v32 = vld [vmem:[#allocation2 + $0x38] sm:$0xff] }
0x1379   : > { %v2320_v40 = vpop.f32.mrb[54].mxu1  ;;  %v2709_v33 = vpack.c.bf16 %v1815_v32, %v1815_v32 }
0x137a   : > { %v4641_v41 = vpop.f32.mrb[55].mxu1 }
0x137b   : > { %v2714_v35 = vsel %vm899_vm2, %v2709_v33, 0  ;;  %v2798_v41 = vld [vmem:[#allocation5 + $0x20] sm:$0xff] }
0x137f   : > { %v2447_v42 = vpop.f32.mrb[56].mxu1 }
0x1380   : > { %v2453_v43 = vmul.f32 0.35355338, %v2447_v42  ;;  %v4652_v44 = vpop.f32.mrb[57].mxu1  ;;  %v2799_v42 = vld [vmem:[#allocation5 + $0x28] sm:$0xff] }
0x1381   : > { %v2450_v15 = vpop.f32.mrb[58].mxu1  ;;  %v2800_v44 = vld [vmem:[#allocation5 + $0x30] sm:$0xff] }
0x1382   : > { %v4653_v46 = vpop.f32.mrb[59].mxu1  ;;  %v2454_v18 = vsel %vm895_vm3, %v2453_v43, -inf  ;;  %v2801_v15 = vld [vmem:[#allocation5 + $0x38] sm:$0xff] }
0x1383   : > { %2455 = vmax.xlane.f32.xlu0 %v2454_v18  ;;  %v2804_v46 = vpack.c.bf16 %v2801_v15, %v2800_v44  ;;  %v4283_v18 = vld [vmem:[%s6119_s13 + $0x40] sm:$0xff]  ;;  %v4297_v44 = vld [vmem:[%s6111_s5 + $0x58] sm:$0xff]  ;;  %v4304_v15 = vld [vmem:[%s6113_s7 + $0x50] sm:$0xff] }
0x1410   : > { %v2456_v48 = vpop.xlane.xlu0 %2455 }
0x1411   : > { %v2457_v49 = vsub.f32 %v2453_v43, %v2456_v48  ;;  %v2803_v43 = vpack.c.bf16 %v2799_v42, %v2798_v41  ;;  %v4284_v48 = vld [vmem:[%s6119_s13 + $0x48] sm:$0xff] }
0x1412   : > { %v4303_v41 = vld [vmem:[%s6113_s7 + $0x48] sm:$0xff] }
0x1413   : > { %v2458_v50 = vmul.f32 1.442695, %v2457_v49  ;;  %v4285_v49 = vld [vmem:[%s6119_s13 + $0x50] sm:$0xff] }
0x1415   : > { %4928 = vpow2.f32 %v2458_v50  ;;  %v2867_v50 = vpack.c.bf16 %v4284_v48, %v4283_v18  ;;  %v4305_v18 = vld [vmem:[%s6113_s7 + $0x58] sm:$0xff] }
0x1416   : > { %v3071_v48 = vpack.c.bf16 %v4305_v18, %v4304_v15 }
0x141f   : > { %v4929_v51 = vpop.eup %4928 }
0x1420   : > { %v2460_v52 = vsel %vm895_vm3, %v4929_v51, 0.0 }
0x1421   : > { %2461 = vadd.xlane.f32.xlu0 %v2460_v52 }
0x1437   : > { %2466 = vrot.lane.b32.xlu0 %v5664_v20, %s5127_s30 }
0x1455   : > { %2566 = vxpose.xlu0.b32.start.end [1/1] (short) (narrow) %v2564_v53, 8 }
0x14ae   : > { %v2462_v54 = vpop.xlane.xlu0 %2461 }
0x14af   : > { %4930 = vrcp.f32 %v2462_v54 }
0x14b2   : > { %v2467_v55 = vpop.permute.xlu0 %2466 }
0x14b3   : > { %v2472_v56 = vsel %vm899_vm2, %v2467_v55, 0 }
0x14b4   : > { %4655 = vmatpush3.bf16.msra.mxu0 %v2472_v56 }
0x14b5   : > { %4666 = vmatprep.subr.bf16.mxu0 %v5124_v7 }
0x14b9   : > { %v4931_v57 = vpop.eup %4930 }
0x14ba   : > { %v2464_v58 = vmul.f32 %v4931_v57, %v4929_v51  ;;  %v4286_v51 = vld [vmem:[%s6119_s13 + $0x58] sm:$0xff] }
0x14bb   : > { %v2868_v52 = vpack.c.bf16 %v4286_v51, %v4285_v49  ;;  %v4292_v49 = vld [vmem:[%s6120_s14 + $0x1] ss:$0 sm:$0xff] }
0x14bc   : > { %v2465_v47 = vpack.c.bf16 %v2464_v58, %v2464_v58 }
0x14be   : > { %4657 = vmatmul.mubr.msk.bf16.vlgmr.msra.gmra.mrb[48].mxu0 %vm895_vm3, %v2465_v47 }
0x14bf   : > { %4668 = vmatprep.mubr.msk.bf16.mxu0 %vm5125_vm0, %v5124_v7 }
0x14d5   : > { %v2582_v59 = vpop.trf.xlu0 }
0x14d6   : > { %v2598_v60 = vpack.c.bf16 %v2582_v59, %v2582_v59 }
0x14d8   : > { %v2605_v34 = vsel %vm899_vm2, %v2598_v60, 0 }
0x14d9   : > { %4667 = vmatpush3.bf16.msra.mxu0 %v2605_v34 }
0x14da   : > { %4678 = vmatprep.subr.bf16.mxu0 %v5124_v7 }
0x14dc   : > { %4669 = vmatmul.mubr.msk.bf16.vlgmr.msra.gmra.mrb[52].mxu0 %vm895_vm3, %v2600_v61 }
0x14dd   : > { %4680 = vmatprep.mubr.msk.bf16.mxu0 %vm5125_vm0, %v5124_v7  ;;  %4679 = vmatpush3.bf16.msra.mxu0 %v2714_v35 }
0x14de   : > { %4692 = vmatprep.subr.bf16.mxu0 %v5124_v7 }
0x1591   : > { %v2508_v2 = vpop.f32.mrb[48].mxu0 }
0x1592   : > { %v2514_v3 = vpack.c.bf16 %v2508_v2, %v2508_v2  ;;  %v4658_v4 = vpop.f32.mrb[49].mxu0 }
0x1593   : > { %v2511_v5 = vpop.f32.mrb[50].mxu0 }
0x1594   : > { %v4659_v8 = vpop.f32.mrb[51].mxu0  ;;  %4663 = vmatmul.mubr.msk.bf16.vlgmr.msra.gmra.mrb[60].mxu1 %vm895_vm3, %v2514_v3 }
0x1595   : > { %4674 = vmatprep.mubr.msk.bf16.mxu1 %vm5125_vm0, %v5124_v7 }
0x15af   : > { %v2641_v9 = vpop.f32.mrb[52].mxu0 }
0x15b0   : > { %v2647_v10 = vmul.f32 0.35355338, %v2641_v9  ;;  %v4670_v11 = vpop.f32.mrb[53].mxu0 }
0x15b1   : > { %v2644_v12 = vpop.f32.mrb[54].mxu0 }
0x15b2   : > { %v4671_v13 = vpop.f32.mrb[55].mxu0  ;;  %v2648_v14 = vsel %vm895_vm3, %v2647_v10, -inf }
0x15b3   : > { %2649 = vmax.xlane.f32.xlu1 %v2648_v14 }
0x15c4   : > { %2660 = vrot.lane.b32.xlu1 %v5664_v20, %s5128_s1 }
0x1640   : > { %v2650_v16 = vpop.xlane.xlu1 %2649 }
0x1641   : > { %v2651_v17 = vsub.f32 %v2647_v10, %v2650_v16  ;;  %v4278_v16 = vld [vmem:[%s6121_s15 + $0x1] ss:$0 sm:$0xff] }
0x1643   : > { %v2652_v19 = vmul.f32 1.442695, %v2651_v17 }
0x1644   : > { %v2661_v21 = vpop.permute.xlu1 %2660 }
0x1645   : > { %4932 = vpow2.f32 %v2652_v19  ;;  %v2666_v22 = vsel %vm899_vm2, %v2661_v21, 0  ;;  %v4279_v19 = vld [vmem:[%s6122_s16 + $0x1] ss:$0 sm:$0xff] }
0x1646   : > { %4673 = vmatpush3.bf16.msra.mxu1 %v2666_v22 }
0x1647   : > { %4684 = vmatprep.subr.bf16.mxu1 %v5124_v7 }
0x164f   : > { %v4933_v23 = vpop.eup %4932 }
0x1650   : > { %v2654_v6 = vsel %vm895_vm3, %v4933_v23, 0.0 }
0x1651   : > { %2655 = vadd.xlane.f32.xlu0 %v2654_v6  ;;  %v4287_v6 = vld [vmem:[%s6119_s13 + $0x60] sm:$0xff] }
0x1667   : > { %v2556_v24 = vpop.f32.mrb[60].mxu1 }
0x1668   : > { %v2562_v25 = vadd.f32 %v2556_v24, %v5724_v38  ;;  %v4664_v26 = vpop.f32.mrb[61].mxu1  ;;  %v4288_v24 = vld [vmem:[%s6119_s13 + $0x68] sm:$0xff] }
0x1669   : > { %v2559_v27 = vpop.f32.mrb[62].mxu1  ;;  %v4289_v26 = vld [vmem:[%s6119_s13 + $0x70] sm:$0xff] }
0x166a   : > { %v4665_v20 = vpop.f32.mrb[63].mxu1  ;;  %v4290_v27 = vld [vmem:[%s6119_s13 + $0x78] sm:$0xff] }
0x166b   : > { %v2870_v20 = vpack.c.bf16 %v4290_v27, %v4289_v26 }
0x16de   : > { %v2656_v28 = vpop.xlane.xlu0 %2655 }
0x16df   : > { %4934 = vrcp.f32 %v2656_v28  ;;  %v4281_v28 = vld [vmem:[%s6118_s12 + $0x1] ss:$0 sm:$0xff] }
0x16e9   : > { %v4935_v29 = vpop.eup %4934 }
0x16ea   : > { %v2658_v30 = vmul.f32 %v4935_v29, %v4933_v23 }
0x16ec   : > { %v2659_v31 = vpack.c.bf16 %v2658_v30, %v2658_v30 }
0x16ee   : > { %4675 = vmatmul.mubr.msk.bf16.vlgmr.msra.gmra.mrb[64].mxu1 %vm895_vm3, %v2659_v31 }
0x16ef   : > { %4688 = vmatprep.mubr.msk.bf16.mxu1 %vm5125_vm0, %v5124_v7  ;;  %4685 = vmatpush3.bf16.msra.mxu1 %v2803_v43  ;;  %v4296_v43 = vld [vmem:[%s6111_s5 + $0x50] sm:$0xff] }
0x16f0   : > { %4686 = vmatprep.subr.bf16.mxu1 %v5124_v7 }
0x16f3   : > { %4687 = vmatpush3.bf16.msra.mxu1 %v2804_v46  ;;  %v2984_v46 = vpack.c.bf16 %v4297_v44, %v4296_v43 }
0x16f4   : > { %4704 = vmatprep.subr.bf16.mxu1 %v5124_v7 }
0x17c1   : > { %v2702_v36 = vpop.f32.mrb[64].mxu1 }
0x17c2   : > { %v2708_v37 = vpack.c.bf16 %v2702_v36, %v2702_v36  ;;  %v4676_v38 = vpop.f32.mrb[65].mxu1 }
0x17c3   : > { %v2705_v39 = vpop.f32.mrb[66].mxu1  ;;  %v4295_v38 = vld [vmem:[%s6111_s5 + $0x48] sm:$0xff] }
0x17c4   : > { %v4677_v40 = vpop.f32.mrb[67].mxu1  ;;  %4681 = vmatmul.mubr.msk.bf16.vlgmr.msra.gmra.mrb[56].mxu0 %vm895_vm3, %v2708_v37  ;;  %v4294_v37 = vld [vmem:[%s6111_s5 + $0x40] sm:$0xff] }
0x17c5   : > { %4700 = vmatprep.mubr.msk.bf16.mxu0 %vm5125_vm0, %v5124_v7  ;;  %4693 = vmatpush3.bf16.msra.mxu0 %v2867_v50  ;;  %v4302_v39 = vld [vmem:[%s6113_s7 + $0x40] sm:$0xff]  ;;  %v2983_v40 = vpack.c.bf16 %v4295_v38, %v4294_v37 }
0x17c6   : > { %4694 = vmatprep.subr.bf16.mxu0 %v5124_v7  ;;  %v3070_v42 = vpack.c.bf16 %v4303_v41, %v4302_v39 }
0x17c9   : > { %4695 = vmatpush3.bf16.msra.mxu0 %v2868_v52 }
0x17ca   : > { %4696 = vmatprep.subr.bf16.mxu0 %v5124_v7 }
0x1897   : > { %v2750_v53 = vpop.f32.mrb[56].mxu0 }
0x1898   : > { %v2756_v54 = vadd.f32 %v2750_v53, %v2562_v25  ;;  %v4682_v55 = vpop.f32.mrb[57].mxu0  ;;  %v2869_v25 = vpack.c.bf16 %v4288_v24, %v4287_v6  ;;  %v4300_v6 = vld [vmem:[%s6112_s6 + $0x50] sm:$0xff]  ;;  %v4301_v24 = vld [vmem:[%s6112_s6 + $0x58] sm:$0xff] }
0x1899   : > { %v2753_v56 = vpop.f32.mrb[58].mxu0 }
0x189a   : > { %v5777_v57 = vadd.f32 %v2756_v54, %v5627_v45  ;;  %v4683_v58 = vpop.f32.mrb[59].mxu0  ;;  %4697 = vmatpush3.bf16.msra.mxu0 %v2869_v25  ;;  %v3029_v25 = vpack.c.bf16 %v4301_v24, %v4300_v6 }
0x189b   : > { %4698 = vmatprep.subr.bf16.mxu0 %v5124_v7 }
0x189c   : > { %v2762_v47 = vsel %vm675_vm1, %v5777_v57, 0.0 }
0x189d   : > { %v2763_v59 = vrot.slane %v2762_v47, 4 }
0x189e   : > { %4699 = vmatpush3.bf16.msra.mxu0 %v2870_v20 }
0x189f   : > { %v2764_v60 = vadd.f32 %v2763_v59, %v2762_v47  ;;  %4720 = vmatprep.subr.bf16.mxu0 %v5124_v7 }
0x18a1   : > { %v2765_v34 = vrot.slane %v2764_v60, 2 }
0x18a3   : > { %v2766_v61 = vadd.f32 %v2765_v34, %v2764_v60 }
0x18a5   : > { %v2767_v62 = vrot.slane %v2766_v61, 1 }
0x18a7   : > { %v2768_v63 = vadd.f32 %v2767_v62, %v2766_v61 }
0x18a9   : > { %v2769_v1 = vmul.f32 0.125, %v2768_v63 }
0x18ab   : > { %v2770_v2 = vsub.f32 %v5777_v57, %v2769_v1 }
0x18ad   : > { %v2771_v3 = vmul.f32 %v2770_v2, %v2770_v2 }
0x18af   : > { %v2772_v4 = vsel %vm675_vm1, %v2771_v3, 0.0 }
0x18b0   : > { %v2773_v5 = vrot.slane %v2772_v4, 4 }
0x18b2   : > { %v2774_v8 = vadd.f32 %v2773_v5, %v2772_v4 }
0x18b4   : > { %v2775_v45 = vrot.slane %v2774_v8, 2 }
0x18b6   : > { %v2776_v9 = vadd.f32 %v2775_v45, %v2774_v8 }
0x18b8   : > { %v2777_v10 = vrot.slane %v2776_v9, 1 }
0x18ba   : > { %v2778_v11 = vadd.f32 %v2777_v10, %v2776_v9 }
0x18bc   : > { %v2779_v12 = vmul.f32 0.125, %v2778_v11 }
0x18be   : > { %v2780_v13 = vadd.f32 1e-05, %v2779_v12  ;;  %v4308_v12 = vld [vmem:[%s6115_s9 + $0x2] ss:$0 sm:$0xff] }
0x18c0   : > { %4936 = vrsqrt.f32 %v2780_v13 }
0x18ca   : > { %v4937_v14 = vpop.eup %4936 }
0x18cb   : > { %v2782_v17 = vmul.f32 %v4937_v14, %v2770_v2  ;;  %v4309_v14 = vld [vmem:[%s6116_s10 + $0x2] ss:$0 sm:$0xff] }
0x18cd   : > { %v2789_v21 = vmul.f32 %v4278_v16, %v2782_v17  ;;  %v4298_v17 = vld [vmem:[%s6112_s6 + $0x40] sm:$0xff] }
0x18cf   : > { %v2796_v22 = vadd.f32 %v4279_v19, %v2789_v21  ;;  %v4299_v19 = vld [vmem:[%s6112_s6 + $0x48] sm:$0xff] }
0x18d1   : > { %v2802_v23 = vpack.c.bf16 %v2796_v22, %v2796_v22  ;;  %v3028_v22 = vpack.c.bf16 %v4299_v19, %v4298_v17 }
0x18d3   : > { %4689 = vmatmul.mubr.msk.bf16.vlgmr.msra.gmra.mrb[68].mxu1 %vm675_vm1, %v2802_v23 }
0x18d4   : > { %4708 = vmatprep.mubr.msk.bf16.mxu1 %vm5125_vm0, %v5124_v7  ;;  %4705 = vmatpush3.bf16.msra.mxu1 %v2983_v40 }
0x18d5   : > { %4706 = vmatprep.subr.bf16.mxu1 %v5124_v7 }
0x18d8   : > { %4707 = vmatpush3.bf16.msra.mxu1 %v2984_v46 }
0x18d9   : > { %4712 = vmatprep.subr.bf16.mxu1 %v5124_v7 }
0x19a6   : > { %v2850_v29 = vpop.f32.mrb[68].mxu1 }
0x19a7   : > { %v2851_v30 = vadd.f32 %v4281_v28, %v2850_v29  ;;  %v4690_v31 = vpop.f32.mrb[69].mxu1 }
0x19a8   : > { %v2853_v32 = vpop.f32.mrb[70].mxu1 }
0x19a9   : > { %v2856_v33 = vmax.f32 %v2851_v30, 0.0  ;;  %v4691_v35 = vpop.f32.mrb[71].mxu1 }
0x19ab   : > { %v2866_v36 = vpack.c.bf16 %v2856_v33, %v2856_v33 }
0x19ad   : > { %4701 = vmatmul.mubr.msk.bf16.vlgmr.msra.gmra.mrb[60].mxu0 %vm1751_vm4, %v2866_v36 }
0x19ae   : > { %4724 = vmatprep.mubr.msk.bf16.mxu0 %vm5125_vm0, %v5124_v7  ;;  %4721 = vmatpush3.bf16.msra.mxu0 %v3070_v42 }
0x19af   : > { %4722 = vmatprep.subr.bf16.mxu0 %v5124_v7 }
0x19b2   : > { %4723 = vmatpush3.bf16.msra.mxu0 %v3071_v48 }
0x19b3   : > { %4734 = vmatprep.subr.bf16.mxu0 %v5124_v7 }
0x1a80   : > { %v2916_v50 = vpop.f32.mrb[60].mxu0 }
0x1a81   : > { %v2917_v51 = vadd.f32 %v4292_v49, %v2916_v50  ;;  %v4702_v52 = vpop.f32.mrb[61].mxu0 }
0x1a82   : > { %v2919_v53 = vpop.f32.mrb[62].mxu0 }
0x1a83   : > { %v5844_v54 = vadd.f32 %v2917_v51, %v5777_v57  ;;  %v4703_v55 = vpop.f32.mrb[63].mxu0 }
0x1a85   : > { %v2947_v56 = vsel %vm675_vm1, %v5844_v54, 0.0 }
0x1a86   : > { %v2948_v58 = vrot.slane %v2947_v56, 4 }
0x1a88   : > { %v2949_v47 = vadd.f32 %v2948_v58, %v2947_v56 }
0x1a8a   : > { %v2950_v59 = vrot.slane %v2949_v47, 2 }
0x1a8c   : > { %v2951_v60 = vadd.f32 %v2950_v59, %v2949_v47 }
0x1a8e   : > { %v2952_v34 = vrot.slane %v2951_v60, 1 }
0x1a90   : > { %v2953_v61 = vadd.f32 %v2952_v34, %v2951_v60 }
0x1a92   : > { %v2954_v62 = vmul.f32 0.125, %v2953_v61 }
0x1a94   : > { %v2955_v63 = vsub.f32 %v5844_v54, %v2954_v62 }
0x1a96   : > { %v2956_v1 = vmul.f32 %v2955_v63, %v2955_v63 }
0x1a98   : > { %v2957_v2 = vsel %vm675_vm1, %v2956_v1, 0.0 }
0x1a99   : > { %v2958_v3 = vrot.slane %v2957_v2, 4 }
0x1a9b   : > { %v2959_v4 = vadd.f32 %v2958_v3, %v2957_v2 }
0x1a9d   : > { %v2960_v57 = vrot.slane %v2959_v4, 2 }
0x1a9f   : > { %v2961_v5 = vadd.f32 %v2960_v57, %v2959_v4 }
0x1aa1   : > { %v2962_v8 = vrot.slane %v2961_v5, 1 }
0x1aa3   : > { %v2963_v45 = vadd.f32 %v2962_v8, %v2961_v5 }
0x1aa5   : > { %v2964_v9 = vmul.f32 0.125, %v2963_v45 }
0x1aa7   : > { %v2965_v10 = vadd.f32 1e-05, %v2964_v9 }
0x1aa9   : > { %4938 = vrsqrt.f32 %v2965_v10 }
0x1ab3   : > { %v4939_v11 = vpop.eup %4938 }
0x1ab4   : > { %v2967_v13 = vmul.f32 %v4939_v11, %v2955_v63 }
0x1ab6   : > { %v2974_v16 = vmul.f32 %v4308_v12, %v2967_v13 }
0x1ab8   : > { %v2981_v21 = vadd.f32 %v4309_v14, %v2974_v16 }
0x1aba   : > { %v2982_v23 = vpack.c.bf16 %v2981_v21, %v2981_v21  ;;  %v2939_v21 = vld [vmem:[#allocation2 + $0x40] sm:$0xff] }
0x1abc   : > { %4709 = vmatmul.mubr.msk.bf16.vlgmr.msra.gmra.mrb[72].mxu1 %vm675_vm1, %v2982_v23  ;;  %4725 = vmatmul.mubr.msk.bf16.vlgmr.msra.gmra.mrb[64].mxu0 %vm675_vm1, %v2982_v23 }
0x1abd   : > { %4713 = vmatpush3.bf16.msra.mxu1 %v3028_v22  ;;  %4716 = vmatprep.mubr.msk.bf16.mxu1 %vm5125_vm0, %v5124_v7  ;;  %v3253_v22 = vpack.c.bf16 %v2939_v21, %v2939_v21 }
0x1abe   : > { %4714 = vmatprep.subr.bf16.mxu1 %v5124_v7  ;;  %4736 = vmatprep.mubr.msk.bf16.mxu0 %vm5125_vm0, %v5124_v7 }
0x1ac1   : > { %4715 = vmatpush3.bf16.msra.mxu1 %v3029_v25 }
0x1ac2   : > { %4728 = vmatprep.subr.bf16.mxu1 %v5124_v7 }
0x1ac4   : > { %4717 = vmatmul.mubr.msk.bf16.vlgmr.msra.gmra.mrb[76].mxu1 %vm675_vm1, %v2982_v23  ;;  %v3454_v23 = vsel %vm899_vm2, %v3253_v22, 0 }
0x1ac5   : > { %4730 = vmatprep.mubr.msk.bf16.mxu1 %vm5125_vm0, %v5124_v7 }
0x1b8f   : > { %v3022_v26 = vpop.f32.mrb[72].mxu1  ;;  %v3106_v27 = vpop.f32.mrb[64].mxu0 }
0x1b90   : > { %v5879_v20 = vpack.c.bf16 %v3106_v27, %v3106_v27  ;;  %v4710_v28 = vpop.f32.mrb[73].mxu1  ;;  %v4726_v29 = vpop.f32.mrb[65].mxu0  ;;  %v5888_v39 = vpack.c.bf16 %v3022_v26, %v3022_v26  ;;  %v2940_v26 = vld [vmem:[#allocation2 + $0x48] sm:$0xff] }
0x1b91   : > { %v3025_v30 = vpop.f32.mrb[74].mxu1  ;;  %v3109_v31 = vpop.f32.mrb[66].mxu0  ;;  %v3403_v27 = vpack.c.bf16 %v2940_v26, %v2940_v26 }
0x1b92   : > { %v4711_v32 = vpop.f32.mrb[75].mxu1  ;;  %v4727_v33 = vpop.f32.mrb[67].mxu0  ;;  %v3210_v35 = vsel %vm899_vm2, %v5879_v20, 0 }
0x1b93   : > { %4735 = vmatpush3.bf16.msra.mxu0 %v3210_v35  ;;  %v3408_v28 = vsel %vm899_vm2, %v3403_v27, 0 }
0x1b94   : > { %4746 = vmatprep.subr.bf16.mxu0 %v5124_v7 }
0x1b97   : > { %v5884_v36 = vpop.f32.mrb[76].mxu1 }
0x1b98   : > { %3255 = vrot.lane.b32.xlu1 %v5884_v36, %s5126_s27  ;;  %v4718_v37 = vpop.f32.mrb[77].mxu1 }
0x1b99   : > { %v3067_v38 = vpop.f32.mrb[78].mxu1 }
0x1b9a   : > { %v4719_v40 = vpop.f32.mrb[79].mxu1 }
0x1b9c   : > { %3292 = vrot.lane.b32.xlu1 %v5888_v39, %s5126_s27 }
0x1bc5   : > { %3112 = vxpose.xlu1.b32.start.end [1/1] (short) (narrow) %v5884_v36, 8 }
0x1c0a   : > { %v3256_v41 = vpop.permute.xlu1 %3255 }
0x1c0b   : > { %3258 = vxpose.xlu0.b32.start.end [1/1] (short) (narrow) %v3256_v41, 8 }
0x1c0e   : > { %v3293_v42 = vpop.permute.xlu1 %3292 }
0x1c34   : > { %4897 = vset.pattern.permute.xlu0 %v5122_v0 }
0x1c45   : > { %v3128_v43 = vpop.trf.xlu1 }
0x1c46   : > { %v3145_v44 = vpack.c.bf16 %v3128_v43, %v3128_v43 }
0x1c48   : > { %v3150_v15 = vsel %vm899_vm2, %v3145_v44, 0 }
0x1c49   : > { %4729 = vmatpush3.bf16.msra.mxu1 %v3150_v15 }
0x1c4a   : > { %4740 = vmatprep.subr.bf16.mxu1 %v5124_v7 }
0x1c4c   : > { %4731 = vmatmul.mubr.msk.bf16.vlgmr.msra.gmra.mrb[80].mxu1 %vm895_vm3, %v5888_v39 }
0x1c4d   : > { %4742 = vmatprep.mubr.msk.bf16.mxu1 %vm5125_vm0, %v5124_v7 }
0x1c8b   : > { %v3274_v46 = vpop.trf.xlu0 }
0x1c8c   : > { %v3290_v18 = vpack.c.bf16 %v3274_v46, %v3274_v46 }
0x1c8e   : > { %v3298_v48 = vsel %vm899_vm2, %v3290_v18, 0 }
0x1c8f   : > { %4741 = vmatpush3.bf16.msra.mxu1 %v3298_v48 }
0x1c90   : > { %4752 = vmatprep.subr.bf16.mxu1 %v5124_v7 }
0x1c92   : > { %4743 = vmatmul.mubr.msk.bf16.vlgmr.msra.gmra.mrb[84].mxu1 %vm895_vm3, %v3293_v42 }
0x1c93   : > { %4754 = vmatprep.mubr.msk.bf16.mxu1 %vm5125_vm0, %v5124_v7  ;;  %4753 = vmatpush3.bf16.msra.mxu1 %v3408_v28 }
0x1c94   : > { %4764 = vmatprep.subr.bf16.mxu1 %v5124_v7 }
0x1d1f   : > { %v3186_v0 = vpop.f32.mrb[80].mxu1 }
0x1d20   : > { %v3192_v49 = vmul.f32 0.35355338, %v3186_v0  ;;  %v4732_v50 = vpop.f32.mrb[81].mxu1 }
0x1d21   : > { %v3189_v51 = vpop.f32.mrb[82].mxu1 }
0x1d22   : > { %v4733_v52 = vpop.f32.mrb[83].mxu1  ;;  %v3193_v53 = vsel %vm895_vm3, %v3192_v49, -inf }
0x1d23   : > { %3194 = vmax.xlane.f32.xlu1 %v3193_v53 }
0x1d65   : > { %v3334_v55 = vpop.f32.mrb[84].mxu1 }
0x1d66   : > { %v3340_v56 = vmul.f32 0.35355338, %v3334_v55  ;;  %v4744_v58 = vpop.f32.mrb[85].mxu1 }
0x1d67   : > { %v3337_v47 = vpop.f32.mrb[86].mxu1 }
0x1d68   : > { %v4745_v59 = vpop.f32.mrb[87].mxu1  ;;  %v3341_v60 = vsel %vm895_vm3, %v3340_v56, -inf }
0x1d69   : > { %3342 = vmax.xlane.f32.xlu0 %v3341_v60 }
0x1d7f   : > { %3496 = vrot.lane.b32.xlu0 %v5884_v36, %s5127_s30 }
0x1db0   : > { %v3195_v34 = vpop.xlane.xlu1 %3194 }
0x1db1   : > { %v3196_v61 = vsub.f32 %v3192_v49, %v3195_v34 }
0x1db3   : > { %v3197_v62 = vmul.f32 1.442695, %v3196_v61 }
0x1db5   : > { %4940 = vpow2.f32 %v3197_v62 }
0x1dbf   : > { %v4941_v63 = vpop.eup %4940 }
0x1dc0   : > { %v3199_v1 = vsel %vm895_vm3, %v4941_v63, 0.0 }
0x1dc1   : > { %3200 = vadd.xlane.f32.xlu1 %v3199_v1 }
0x1df6   : > { %v3343_v2 = vpop.xlane.xlu0 %3342 }
0x1df7   : > { %v3344_v3 = vsub.f32 %v3340_v56, %v3343_v2 }
0x1df9   : > { %v3345_v4 = vmul.f32 1.442695, %v3344_v3 }
0x1dfa   : > { %v3497_v8 = vpop.permute.xlu0 %3496 }
0x1dfb   : > { %4942 = vpow2.f32 %v3345_v4 }
0x1e05   : > { %v4943_v57 = vpop.eup %4942 }
0x1e06   : > { %v3347_v5 = vsel %vm895_vm3, %v4943_v57, 0.0 }
0x1e07   : > { %3348 = vadd.xlane.f32.xlu1 %v3347_v5 }
0x1e18   : > { %3354 = vrot.lane.b32.xlu1 %v5879_v20, %s5126_s27  ;;  %s6164_s27 = sld [smem:[#allocation25_spill]] }
0x1e1c   : > { %3532 = vrot.lane.b32.xlu1 %v5888_v39, %s5127_s30 }
0x1e45   : > { %3499 = vxpose.xlu1.b32.start.end [1/1] (short) (narrow) %v3497_v8, 8 }
0x1e4e   : > { %v3201_v45 = vpop.xlane.xlu1 %3200 }
0x1e4f   : > { %4944 = vrcp.f32 %v3201_v45  ;;  %v2941_v45 = vld [vmem:[#allocation2 + $0x50] sm:$0xff] }
0x1e59   : > { %v4945_v9 = vpop.eup %4944 }
0x1e5a   : > { %v3203_v10 = vmul.f32 %v4945_v9, %v4941_v63  ;;  %v3642_v9 = vpack.c.bf16 %v2941_v45, %v2941_v45 }
0x1e5c   : > { %v3204_v11 = vpack.c.bf16 %v3203_v10, %v3203_v10  ;;  %v3647_v10 = vsel %vm899_vm2, %v3642_v9, 0 }
0x1e5e   : > { %4737 = vmatmul.mubr.msk.bf16.vlgmr.msra.gmra.mrb[68].mxu0 %vm895_vm3, %v3204_v11 }
0x1e5f   : > { %4748 = vmatprep.mubr.msk.bf16.mxu0 %vm5125_vm0, %v5124_v7 }
0x1e63   : > { %3690 = vrot.lane.b32.xlu1 %v5884_v36, %s5128_s1 }
0x1e94   : > { %v3349_v12 = vpop.xlane.xlu1 %3348 }
0x1e95   : > { %4946 = vrcp.f32 %v3349_v12 }
0x1e98   : > { %v3355_v13 = vpop.permute.xlu1 %3354 }
0x1e99   : > { %v3360_v14 = vsel %vm899_vm2, %v3355_v13, 0 }
0x1e9a   : > { %4747 = vmatpush3.bf16.msra.mxu0 %v3360_v14 }
0x1e9b   : > { %4758 = vmatprep.subr.bf16.mxu0 %v5124_v7 }
0x1e9c   : > { %v3533_v6 = vpop.permute.xlu1 %3532 }
0x1e9f   : > { %v4947_v16 = vpop.eup %4946 }
0x1ea0   : > { %v3351_v17 = vmul.f32 %v4947_v16, %v4943_v57 }
0x1ea2   : > { %v3352_v19 = vpack.c.bf16 %v3351_v17, %v3351_v17 }
0x1ea4   : > { %4749 = vmatmul.mubr.msk.bf16.vlgmr.msra.gmra.mrb[72].mxu0 %vm895_vm3, %v3352_v19 }
0x1ea5   : > { %4760 = vmatprep.mubr.msk.bf16.mxu0 %vm5125_vm0, %v5124_v7  ;;  %4759 = vmatpush3.bf16.msra.mxu0 %v3454_v23 }
0x1ea6   : > { %4770 = vmatprep.subr.bf16.mxu0 %v5124_v7 }
0x1ec5   : > { %v3515_v24 = vpop.trf.xlu1 }
0x1ec6   : > { %v3531_v35 = vpack.c.bf16 %v3515_v24, %v3515_v24 }
0x1ec8   : > { %v3538_v37 = vsel %vm899_vm2, %v3531_v35, 0 }
0x1ed5   : > { %v3691_v25 = vpop.permute.xlu1 %3690 }
0x1ed6   : > { %3693 = vxpose.xlu1.b32.start.end [1/1] (short) (narrow) %v3691_v25, 8 }
0x1f31   : > { %v3246_v29 = vpop.f32.mrb[68].mxu0 }
0x1f32   : > { %v3252_v30 = vpack.c.bf16 %v3246_v29, %v3246_v29  ;;  %v4738_v31 = vpop.f32.mrb[69].mxu0 }
0x1f33   : > { %v3249_v32 = vpop.f32.mrb[70].mxu0 }
0x1f34   : > { %v4739_v33 = vpop.f32.mrb[71].mxu0  ;;  %4761 = vmatmul.mubr.msk.bf16.vlgmr.msra.gmra.mrb[76].mxu0 %vm895_vm3, %v3252_v30 }
0x1f35   : > { %4772 = vmatprep.mubr.msk.bf16.mxu0 %vm5125_vm0, %v5124_v7 }
0x1f56   : > { %v3709_v2 = vpop.trf.xlu1 }
0x1f57   : > { %v3725_v3 = vpack.c.bf16 %v3709_v2, %v3709_v2 }
0x1f59   : > { %v3732_v8 = vsel %vm899_vm2, %v3725_v3, 0 }
0x1f77   : > { %v3396_v36 = vpop.f32.mrb[72].mxu0 }
0x1f78   : > { %v3402_v38 = vpack.c.bf16 %v3396_v36, %v3396_v36  ;;  %v4750_v40 = vpop.f32.mrb[73].mxu0 }
0x1f79   : > { %v3399_v41 = vpop.f32.mrb[74].mxu0 }
0x1f7a   : > { %v4751_v42 = vpop.f32.mrb[75].mxu0  ;;  %4755 = vmatmul.mubr.msk.bf16.vlgmr.msra.gmra.mrb[88].mxu1 %vm895_vm3, %v3402_v38 }
0x1f7b   : > { %4765 = vmatpush3.bf16.msra.mxu1 %v3538_v37  ;;  %4766 = vmatprep.mubr.msk.bf16.mxu1 %vm5125_vm0, %v5124_v7 }
0x1f7c   : > { %4776 = vmatprep.subr.bf16.mxu1 %v5124_v7 }
0x1f82   : > { %4767 = vmatmul.mubr.msk.bf16.vlgmr.msra.gmra.mrb[92].mxu1 %vm895_vm3, %v3533_v6 }
0x1f83   : > { %4778 = vmatprep.mubr.msk.bf16.mxu1 %vm5125_vm0, %v5124_v7  ;;  %4777 = vmatpush3.bf16.msra.mxu1 %v3647_v10 }
0x1f84   : > { %4788 = vmatprep.subr.bf16.mxu1 %v5124_v7 }
0x2007   : > { %v3490_v43 = vpop.f32.mrb[76].mxu0 }
0x2008   : > { %v4762_v44 = vpop.f32.mrb[77].mxu0 }
0x2009   : > { %v3493_v15 = vpop.f32.mrb[78].mxu0 }
0x200a   : > { %v4763_v46 = vpop.f32.mrb[79].mxu0 }
0x204d   : > { %v3444_v18 = vpop.f32.mrb[88].mxu1 }
0x204e   : > { %v5940_v48 = vadd.f32 %v3490_v43, %v3444_v18  ;;  %v4756_v0 = vpop.f32.mrb[89].mxu1 }
0x204f   : > { %v3447_v49 = vpop.f32.mrb[90].mxu1  ;;  %v3925_v0 = vld [vmem:[#allocation5 + $0x40] sm:$0xff] }
0x2050   : > { %v4757_v50 = vpop.f32.mrb[91].mxu1  ;;  %v3926_v49 = vld [vmem:[#allocation5 + $0x48] sm:$0xff] }
0x2051   : > { %v3930_v50 = vpack.c.bf16 %v3926_v49, %v3925_v0 }
0x2055   : > { %v3574_v51 = vpop.f32.mrb[92].mxu1 }
0x2056   : > { %v3580_v52 = vmul.f32 0.35355338, %v3574_v51  ;;  %v4768_v53 = vpop.f32.mrb[93].mxu1  ;;  %v3927_v51 = vld [vmem:[#allocation5 + $0x50] sm:$0xff] }
0x2057   : > { %v3577_v55 = vpop.f32.mrb[94].mxu1 }
0x2058   : > { %v4769_v56 = vpop.f32.mrb[95].mxu1  ;;  %v3581_v58 = vsel %vm895_vm3, %v3580_v52, -inf  ;;  %v4332_v55 = vld [vmem:[%s6119_s13 + $0x80] sm:$0xff] }
0x2059   : > { %3582 = vmax.xlane.f32.xlu0 %v3581_v58  ;;  %v4333_v56 = vld [vmem:[%s6119_s13 + $0x88] sm:$0xff]  ;;  %v4334_v58 = vld [vmem:[%s6119_s13 + $0x90] sm:$0xff] }
0x20e6   : > { %v3583_v47 = vpop.xlane.xlu0 %3582 }
0x20e7   : > { %v3584_v59 = vsub.f32 %v3580_v52, %v3583_v47  ;;  %v3928_v52 = vld [vmem:[#allocation5 + $0x58] sm:$0xff]  ;;  %v3994_v47 = vpack.c.bf16 %v4333_v56, %v4332_v55 }
0x20e8   : > { %v3931_v53 = vpack.c.bf16 %v3928_v52, %v3927_v51 }
0x20e9   : > { %v3585_v60 = vmul.f32 1.442695, %v3584_v59  ;;  %v4335_v59 = vld [vmem:[%s6119_s13 + $0x98] sm:$0xff] }
0x20eb   : > { %4948 = vpow2.f32 %v3585_v60  ;;  %v3995_v60 = vpack.c.bf16 %v4335_v59, %v4334_v58 }
0x20f5   : > { %v4949_v34 = vpop.eup %4948 }
0x20f6   : > { %v3587_v61 = vsel %vm895_vm3, %v4949_v34, 0.0 }
0x20f7   : > { %3588 = vadd.xlane.f32.xlu0 %v3587_v61 }
0x210d   : > { %3593 = vrot.lane.b32.xlu0 %v5879_v20, %s5127_s30  ;;  %s6030_s30 = scalar_lea.hbm %s6164_s27, %s4345_s26 }
0x2111   : > { %3726 = vrot.lane.b32.xlu0 %v5888_v39, %s5128_s1 }
0x2184   : > { %v3589_v62 = vpop.xlane.xlu0 %3588 }
0x2185   : > { %4950 = vrcp.f32 %v3589_v62 }
0x2188   : > { %v3594_v63 = vpop.permute.xlu0 %3593 }
0x2189   : > { %v3599_v1 = vsel %vm899_vm2, %v3594_v63, 0 }
0x218a   : > { %4771 = vmatpush3.bf16.msra.mxu0 %v3599_v1 }
0x218b   : > { %4782 = vmatprep.subr.bf16.mxu0 %v5124_v7 }
0x218c   : > { %v3727_v39 = vpop.permute.xlu0 %3726 }
0x218f   : > { %v4951_v4 = vpop.eup %4950 }
0x2190   : > { %v3591_v57 = vmul.f32 %v4951_v4, %v4949_v34 }
0x2192   : > { %v3592_v5 = vpack.c.bf16 %v3591_v57, %v3591_v57 }
0x2194   : > { %4773 = vmatmul.mubr.msk.bf16.vlgmr.msra.gmra.mrb[80].mxu0 %vm895_vm3, %v3592_v5 }
0x2195   : > { %4783 = vmatpush3.bf16.msra.mxu0 %v3732_v8  ;;  %4784 = vmatprep.mubr.msk.bf16.mxu0 %vm5125_vm0, %v5124_v7 }
0x2196   : > { %4794 = vmatprep.subr.bf16.mxu0 %v5124_v7 }
0x219c   : > { %4785 = vmatmul.mubr.msk.bf16.vlgmr.msra.gmra.mrb[84].mxu0 %vm895_vm3, %v3727_v39 }
0x219d   : > { %4796 = vmatprep.mubr.msk.bf16.mxu0 %vm5125_vm0, %v5124_v7 }
0x2267   : > { %v3635_v11 = vpop.f32.mrb[80].mxu0 }
0x2268   : > { %v3641_v12 = vpack.c.bf16 %v3635_v11, %v3635_v11  ;;  %v4774_v13 = vpop.f32.mrb[81].mxu0 }
0x2269   : > { %v3638_v14 = vpop.f32.mrb[82].mxu0 }
0x226a   : > { %v4775_v16 = vpop.f32.mrb[83].mxu0  ;;  %4779 = vmatmul.mubr.msk.bf16.vlgmr.msra.gmra.mrb[96].mxu1 %vm895_vm3, %v3641_v12 }
0x226b   : > { %4790 = vmatprep.mubr.msk.bf16.mxu1 %vm5125_vm0, %v5124_v7 }
0x226f   : > { %v3768_v17 = vpop.f32.mrb[84].mxu0 }
0x2270   : > { %v3774_v19 = vmul.f32 0.35355338, %v3768_v17  ;;  %v4786_v21 = vpop.f32.mrb[85].mxu0 }
0x2271   : > { %v3771_v22 = vpop.f32.mrb[86].mxu0 }
0x2272   : > { %v4787_v23 = vpop.f32.mrb[87].mxu0  ;;  %v3775_v6 = vsel %vm895_vm3, %v3774_v19, -inf }
0x2273   : > { %3776 = vmax.xlane.f32.xlu0 %v3775_v6  ;;  %v4327_v6 = vld [vmem:[%s6121_s15 + $0x2] ss:$0 sm:$0xff] }
0x2300   : > { %v3777_v24 = vpop.xlane.xlu0 %3776 }
0x2301   : > { %v3778_v25 = vsub.f32 %v3774_v19, %v3777_v24 }
0x2303   : > { %v3779_v26 = vmul.f32 1.442695, %v3778_v25  ;;  %v4328_v25 = vld [vmem:[%s6122_s16 + $0x2] ss:$0 sm:$0xff] }
0x2305   : > { %4952 = vpow2.f32 %v3779_v26 }
0x230f   : > { %v4953_v27 = vpop.eup %4952 }
0x2310   : > { %v3781_v28 = vsel %vm895_vm3, %v4953_v27, 0.0 }
0x2311   : > { %3782 = vadd.xlane.f32.xlu0 %v3781_v28 }
0x2327   : > { %3787 = vrot.lane.b32.xlu0 %v5879_v20, %s5128_s1  ;;  %v2942_v20 = vld [vmem:[#allocation2 + $0x58] sm:$0xff]  ;;  %s6165_s1 = smov %s6164_s27 }
0x2328   : > { %v3836_v42 = vpack.c.bf16 %v2942_v20, %v2942_v20 }
0x232a   : > { %v3841_v43 = vsel %vm899_vm2, %v3836_v42, 0 }
0x232b   : > { %4795 = vmatpush3.bf16.msra.mxu0 %v3841_v43 }
0x232c   : > { %4808 = vmatprep.subr.bf16.mxu0 %v5124_v7 }
0x233d   : > { %v3683_v29 = vpop.f32.mrb[96].mxu1 }
0x233e   : > { %v3689_v30 = vadd.f32 %v3683_v29, %v5940_v48  ;;  %v4780_v31 = vpop.f32.mrb[97].mxu1  ;;  %v4336_v29 = vld [vmem:[%s6119_s13 + $0xa0] sm:$0xff] }
0x233f   : > { %v3686_v32 = vpop.f32.mrb[98].mxu1 }
0x2340   : > { %v4781_v33 = vpop.f32.mrb[99].mxu1  ;;  %v4338_v32 = vld [vmem:[%s6119_s13 + $0xb0] sm:$0xff] }
0x2341   : > { %v4339_v33 = vld [vmem:[%s6119_s13 + $0xb8] sm:$0xff] }
0x239e   : > { %v3783_v35 = vpop.xlane.xlu0 %3782 }
0x239f   : > { %4954 = vrcp.f32 %v3783_v35  ;;  %v3997_v35 = vpack.c.bf16 %v4339_v33, %v4338_v32 }
0x23a2   : > { %v3788_v36 = vpop.permute.xlu0 %3787 }
0x23a3   : > { %v3793_v37 = vsel %vm899_vm2, %v3788_v36, 0  ;;  %v4330_v36 = vld [vmem:[%s6118_s12 + $0x2] ss:$0 sm:$0xff] }
0x23a4   : > { %4789 = vmatpush3.bf16.msra.mxu1 %v3793_v37 }
0x23a5   : > { %4800 = vmatprep.subr.bf16.mxu1 %v5124_v7 }
0x23a9   : > { %v4955_v38 = vpop.eup %4954 }
0x23aa   : > { %v3785_v40 = vmul.f32 %v4955_v38, %v4953_v27 }
0x23ac   : > { %v3786_v41 = vpack.c.bf16 %v3785_v40, %v3785_v40 }
0x23ae   : > { %4791 = vmatmul.mubr.msk.bf16.vlgmr.msra.gmra.mrb[100].mxu1 %vm895_vm3, %v3786_v41 }
0x23af   : > { %4804 = vmatprep.mubr.msk.bf16.mxu1 %vm5125_vm0, %v5124_v7  ;;  %4801 = vmatpush3.bf16.msra.mxu1 %v3930_v50 }
0x23b0   : > { %4802 = vmatprep.subr.bf16.mxu1 %v5124_v7 }
0x23b3   : > { %4803 = vmatpush3.bf16.msra.mxu1 %v3931_v53 }
0x2481   : > { %v3829_v44 = vpop.f32.mrb[100].mxu1 }
0x2482   : > { %v3835_v15 = vpack.c.bf16 %v3829_v44, %v3829_v44  ;;  %v4792_v46 = vpop.f32.mrb[101].mxu1 }
0x2483   : > { %v3832_v18 = vpop.f32.mrb[102].mxu1 }
0x2484   : > { %v4793_v48 = vpop.f32.mrb[103].mxu1  ;;  %4797 = vmatmul.mubr.msk.bf16.vlgmr.msra.gmra.mrb[88].mxu0 %vm895_vm3, %v3835_v15 }
0x2485   : > { %4816 = vmatprep.mubr.msk.bf16.mxu0 %vm5125_vm0, %v5124_v7  ;;  %4809 = vmatpush3.bf16.msra.mxu0 %v3994_v47 }
0x2486   : > { %4810 = vmatprep.subr.bf16.mxu0 %v5124_v7 }
0x2489   : > { %4811 = vmatpush3.bf16.msra.mxu0 %v3995_v60 }
0x248a   : > { %4812 = vmatprep.subr.bf16.mxu0 %v5124_v7 }
0x2557   : > { %v3877_v34 = vpop.f32.mrb[88].mxu0 }
0x2558   : > { %v3883_v61 = vadd.f32 %v3877_v34, %v3689_v30  ;;  %v4798_v62 = vpop.f32.mrb[89].mxu0  ;;  %v4337_v30 = vld [vmem:[%s6119_s13 + $0xa8] sm:$0xff] }
0x2559   : > { %v3880_v63 = vpop.f32.mrb[90].mxu0  ;;  %v3996_v31 = vpack.c.bf16 %v4337_v30, %v4336_v29 }
0x255a   : > { %v5994_v1 = vadd.f32 %v3883_v61, %v5844_v54  ;;  %v4799_v2 = vpop.f32.mrb[91].mxu0 }
0x255b   : > { %4813 = vmatpush3.bf16.msra.mxu0 %v3996_v31 }
0x255c   : > { %v3889_v3 = vsel %vm675_vm1, %v5994_v1, 0.0  ;;  %4814 = vmatprep.subr.bf16.mxu0 %v5124_v7 }
0x255d   : > { %v3890_v4 = vrot.slane %v3889_v3, 4 }
0x255f   : > { %v3891_v57 = vadd.f32 %v3890_v4, %v3889_v3  ;;  %4815 = vmatpush3.bf16.msra.mxu0 %v3997_v35 }
0x2561   : > { %v3892_v5 = vrot.slane %v3891_v57, 2 }
0x2563   : > { %v3893_v8 = vadd.f32 %v3892_v5, %v3891_v57 }
0x2565   : > { %v3894_v39 = vrot.slane %v3893_v8, 1 }
0x2567   : > { %v3895_v45 = vadd.f32 %v3894_v39, %v3893_v8 }
0x2569   : > { %v3896_v9 = vmul.f32 0.125, %v3895_v45 }
0x256b   : > { %v3897_v10 = vsub.f32 %v5994_v1, %v3896_v9 }
0x256d   : > { %v3898_v11 = vmul.f32 %v3897_v10, %v3897_v10 }
0x256f   : > { %v3899_v12 = vsel %vm675_vm1, %v3898_v11, 0.0 }
0x2570   : > { %v3900_v13 = vrot.slane %v3899_v12, 4 }
0x2572   : > { %v3901_v14 = vadd.f32 %v3900_v13, %v3899_v12 }
0x2574   : > { %v3902_v54 = vrot.slane %v3901_v14, 2 }
0x2576   : > { %v3903_v16 = vadd.f32 %v3902_v54, %v3901_v14 }
0x2578   : > { %v3904_v17 = vrot.slane %v3903_v16, 1 }
0x257a   : > { %v3905_v19 = vadd.f32 %v3904_v17, %v3903_v16 }
0x257c   : > { %v3906_v21 = vmul.f32 0.125, %v3905_v19 }
0x257e   : > { %v3907_v22 = vadd.f32 1e-05, %v3906_v21 }
0x2580   : > { %4956 = vrsqrt.f32 %v3907_v22 }
0x258a   : > { %v4957_v23 = vpop.eup %4956 }
0x258b   : > { %v3909_v24 = vmul.f32 %v4957_v23, %v3897_v10 }
0x258d   : > { %v3916_v26 = vmul.f32 %v4327_v6, %v3909_v24 }
0x258f   : > { %v3923_v27 = vadd.f32 %v4328_v25, %v3916_v26 }
0x2591   : > { %v3929_v28 = vpack.c.bf16 %v3923_v27, %v3923_v27 }
0x2593   : > { %4805 = vmatmul.mubr.msk.bf16.vlgmr.msra.gmra.mrb[104].mxu1 %vm675_vm1, %v3929_v28 }
0x2666   : > { %v3977_v37 = vpop.f32.mrb[104].mxu1 }
0x2667   : > { %v3978_v38 = vadd.f32 %v4330_v36, %v3977_v37  ;;  %v4806_v7 = vpop.f32.mrb[105].mxu1 }
0x2668   : > { %v3980_v40 = vpop.f32.mrb[106].mxu1 }
0x2669   : > { %v3983_v41 = vmax.f32 %v3978_v38, 0.0  ;;  %v4807_v20 = vpop.f32.mrb[107].mxu1 }
0x266b   : > { %v3993_v42 = vpack.c.bf16 %v3983_v41, %v3983_v41 }
0x266d   : > { %4817 = vmatmul.mubr.msk.bf16.vlgmr.msra.gmra.mrb[92].mxu0 %vm1751_vm4, %v3993_v42 }
0x266e   : > { %5027 = shalt.err (!%p5024_p11)
}
0x266f   : > { %s5028_s22 = scalar_lea.hbm %s6030_s30, 128  ;;  %s5032_s27 = scalar_lea.hbm %s6165_s1, 256 }
0x2670   : > { %p5029_p13 = scmp.ne.s32.totalorder %s6030_s30, %s5028_s22  ;;  %p5033_p6 = scmp.lt.u32.totalorder %s6030_s30, %s6165_s1 }
0x2671   : > { %p5034_p9 = scmp.lt.u32.totalorder %s5032_s27, %s5028_s22  ;;  %p5036_p12 = scmp.lt.u32.totalorder %s5028_s22, %s6030_s30 }
0x2672   : > { %p5030_p5 = pnand %p5029_p13, %p6166_p1 }
0x2673   : > { %p5035_p10 = por %p5034_p9, %p5033_p6 }
0x2674   : > { %p5031_p0 = pneg %p5030_p5 }
0x2675   : > { %p5037_p2 = por %p5036_p12, %p5035_p10 }
0x2677   : > { %p5038_p3 = pnand %p5037_p2, %p5031_p0 }
0x2679   : > { %5041 = shalt.err (!%p5038_p3)
}
0x267a   : > { %4829 = dma.vmem_to_hbm [thread:$0]  (%p6166_p1), %s4084_s2, 128, %s6030_s30, %s4057_s21   ;;  %v4341_v43 = vld [vmem:[%s6120_s14 + $0x2] ss:$0 sm:$0xff] }
0x267b   : > { %s6167_s17 = sshll.u32 %s5397_s24, 3  ;;  %s6168_s19 = sld [smem:[#allocation24_spill]] }
0x267c   : > { %s613_s18 = scalar_lea.vmem [#allocation7], %s6167_s17  ;;  %s4052_s2 = scalar_lea.sflag [#allocation4], %s5397_s24 }
0x267d   : > { %s4070_s27 = sshll.u32 %s613_s18, 4  ;;  %s5130_s29 = smov [#allocation7]   ;;  %s6064_s27 = int_to_ptr.vmem [resolvable:$true] %s4070_s27 }
0x267e   : > { %s5042_s21 = scalar_lea.vmem %s6064_s27, 128  ;;  %s5046_s0 = sshll.u32 %s5130_s29, 4  ;;  %s5047_s0 = int_to_ptr.vmem [resolvable:$false] %s5046_s0 }
0x267f   : > { %p5043_p4 = scmp.ne.s32.totalorder %s6064_s27, %s5042_s21  ;;  %s5048_s25 = scalar_lea.vmem %s5047_s0, 256 }
0x2680   : > { %p5049_p11 = scmp.lt.s32.totalorder %s6064_s27, %s5047_s0  ;;  %p5050_p13 = scmp.lt.s32.totalorder %s5048_s25, %s5042_s21 }
0x2681   : > { %s6062_s30 = scalar_lea.hbm %s6168_s19, %s4345_s26  ;;  %p5044_p7 = pnand %p5043_p4, %p6166_p1 }
0x2682   : > { %p5051_p5 = por %p5050_p13, %p5049_p11 }
0x2683   : > { %p5045_p8 = pneg %p5044_p7 }
0x2685   : > { %p5052_p0 = pnand %p5051_p5, %p5045_p8 }
0x2740   : > { %v4043_v44 = vpop.f32.mrb[92].mxu0 }
0x2741   : > { %v4044_v15 = vadd.f32 %v4341_v43, %v4043_v44  ;;  %v4818_v46 = vpop.f32.mrb[93].mxu0 }
0x2742   : > { %v4046_v18 = vpop.f32.mrb[94].mxu0 }
0x2743   : > { %v4049_v48 = vadd.f32 %v4044_v15, %v5994_v1  ;;  %v4819_v0 = vpop.f32.mrb[95].mxu0 }
0x2745   : > { %4050 = vst.msk [vmem:[%s613_s18] sm:$0xff] %vm675_vm1, %v4049_v48 }
0x2746   : > { %5055 = shalt.err (!%p5052_p0)
}
0x2747   : > { %s5056_s24 = scalar_lea.hbm %s6062_s30, 128  ;;  %s5060_s18 = scalar_lea.hbm %s6168_s19, 256 }
0x2748   : > { %p5057_p6 = scmp.ne.s32.totalorder %s6062_s30, %s5056_s24  ;;  %p5061_p12 = scmp.lt.u32.totalorder %s6062_s30, %s6168_s19 }
0x2749   : > { %p5062_p2 = scmp.lt.u32.totalorder %s5060_s18, %s5056_s24  ;;  %p5064_p4 = scmp.lt.u32.totalorder %s5056_s24, %s6062_s30 }
0x274a   : > { %p5058_p9 = pnand %p5057_p6, %p6166_p1 }
0x274b   : > { %p5063_p3 = por %p5062_p2, %p5061_p12 }
0x274c   : > { %p5059_p10 = pneg %p5058_p9 }
0x274d   : > { %p5065_p7 = por %p5064_p4, %p5063_p3 }
0x274f   : > { %p5066_p8 = pnand %p5065_p7, %p5059_p10 }
0x2751   : > { %5069 = shalt.err (!%p5066_p8)
}
0x2752   : > { %4828 = dma.vmem_to_hbm [thread:$0]  (%p6166_p1), %s6064_s27, 128, %s6062_s30, %s4052_s2  }
0x2753 PF: > { %s6169_s21 = sld [smem:[#allocation16_spill]]  ;;  %s6170_s29 = sld [smem:[#allocation14_spill]] }
0x2754   : > { %s6171_s0 = sld [smem:[#allocation20_spill]] }
0x2759   : > { %p4850_p11 = scmp.ge.s32.totalorder %s6169_s21, 2  ;;  %s4095_s25 = sand.u32 1, %s6170_s29  }
0x275a   : > { %p6172_p13 = scmp.ne.s32.totalorder %s6171_s0, 0  ;;  %s4096_s26 = scalar_lea.sflag [#allocation4], %s4095_s25 }
0x275c   : > { %p4840_p5 = pnand %p4850_p11, %p6172_p13 }
0x275e   : > { %5095 = dma.done.wait (!%p4840_p5), %s4096_s26, 128  }
0x275f   : > { %5097 = vsyncadd (!%p4840_p5), %s4096_s26, 4294967168  ;;  %s4105_s24 = scalar_lea.sflag [#allocation9], %s4095_s25 }
0x2760   : > { %5099 = dma.done.wait (!%p4840_p5), %s4105_s24, 128  }
0x2761   : > { %5101 = vsyncadd (!%p4840_p5), %s4105_s24, 4294967168  ;;  %s6173_s30 = sld [smem:[#allocation17_spill]]  ;;  %s6174_s20 = sld [smem:[#allocation15_spill]] }
0x2762   : > { %s6175_s29 = sld [smem:[#allocation18_spill]]  ;;  %s6176_s27 = smov %s5108_s28 }
0x2767   : > { %p34_p1 = scmp.ge.s32.totalorder %s6173_s30, 4   ;;  %s6177_s28 = smov %s6174_s20 }
0x2769   :  { %36 = sbr.rel (!%p34_p1) target bundleno = 13 (0xd), region = 176 }
0x2770   :  { %4110 = vsyncpa [#allocation3], 1 }
0x2771   :  { %4112 = vsyncpa [#allocation3 + $0x1], 1 }
0x2772   :  { %4113 = vsyncpa [#allocation6], 1 }
0x2773   :  { %4114 = vsyncpa [#allocation4], 1 }
0x2774   :  { %4116 = vsyncpa [#allocation4 + $0x1], 1 }
0x2775   :  { %4117 = vsyncpa [#allocation9], 1 }
0x2776   :  { %4119 = vsyncpa [#allocation9 + $0x1], 1 }

</bundles_post_ra>
